<compile_context>
chip_gen: v7x
topology: tpu7x:2x2x1
jax: 0.10.0
libtpu: 0.0.40
codegen_flags: <defaults>
</compile_context>

<pallas_src>
import functools

import jax
import jax.numpy as jnp
import numpy as np
from jax import lax
from jax.experimental import pallas as pl
from jax.experimental.pallas import tpu as pltpu

IGNORE_LABEL = -1

# "configer" constants (deterministic, in-script).
LOSS_PPL_A_WEIGHT = 0.01
LOSS_PPL_B_WEIGHT = 0.001
DIVERSITY_WEIGHT = 0.1

_VMEM_LIMIT = 48 * 1024 * 1024      # explicit scoped-VMEM cap (safe on v7x's 64 MiB)
_WINDOW_BUDGET = 20 * 1024 * 1024   # target for live windows when picking tile sizes


def _round_up(x, m):
    return ((x + m - 1) // m) * m


def _cdiv(a, b):
    return -(-a // b)


# ----------------------------------------------------------------------------
# Glue: align_corners=True bilinear interpolation as a dense weight matrix.
# ----------------------------------------------------------------------------
def interp_matrix(out_size: int, in_size: int) -> jnp.ndarray:
    """Returns W of shape (out_size, in_size) s.t. out = W @ in (align_corners=True)."""
    if in_size == 1:
        return jnp.ones((out_size, 1), jnp.float32)
    x = jnp.arange(out_size, dtype=jnp.float32) * (in_size - 1) / (out_size - 1)
    x0 = jnp.clip(jnp.floor(x).astype(jnp.int32), 0, in_size - 2)
    frac = x - x0.astype(jnp.float32)
    rows = jnp.arange(out_size)
    W = jnp.zeros((out_size, in_size), jnp.float32)
    W = W.at[rows, x0].set(1.0 - frac)
    W = W.at[rows, x0 + 1].add(frac)
    return W


# ----------------------------------------------------------------------------
# Kernel 1: bilinear upsample (bf16 MXU matmuls) + pixel cross-entropy reduction.
#   grid = (n_split, B, n_h_per_split); output = one (1,128) lane-dense partial-sum
#   row per (split, batch) pair (lane 0 = ce sum, lane 1 = valid count).
# ----------------------------------------------------------------------------
def _seg_ce_kernel(seg_ref, lab_ref, wh_ref, wwT_ref, acc_ref, tmp_ref, preds_ref,
                   *, C, n_h, n_h_per_split):
    # seg_ref : (C, Hs, Ws_pad) bf16    wh_ref : (th, Hs) bf16
    # lab_ref : (th, W) int32           wwT_ref: (Ws_pad, W) bf16
    # acc_ref : (1, 128) f32            tmp_ref: (C*th, Ws_pad) bf16 VMEM
    #                                   preds_ref: (C*th, W) f32 VMEM
    s_id = pl.program_id(0)
    h_id = pl.program_id(2)

    @pl.when(h_id == 0)
    def _init():
        acc_ref[...] = jnp.zeros_like(acc_ref)

    # Logical H-tile handled by this step; when the 2-way split over-covers an odd
    # n_h, the redundant (clamped) step is skipped entirely.
    ok = (s_id * n_h_per_split + h_id) < n_h

    @pl.when(ok)
    def _compute():
        th = wh_ref.shape[0]
        wh = wh_ref[...]                                   # (th, Hs) bf16
        labels = lab_ref[...]                              # (th, W) int32
        valid = labels != IGNORE_LABEL

        # --- Stage 1 (cheap): per-channel (th,Hs)@(Hs,Ws_pad), staged to bf16 VMEM.
        def stage1(c):
            off = c * th if isinstance(c, int) else pl.multiple_of(c * th, th)
            tmp_ref[pl.ds(off, th), :] = jnp.dot(
                wh, seg_ref[c], preferred_element_type=jnp.float32
            ).astype(tmp_ref.dtype)

        if C <= 8:
            for c in range(C):
                stage1(c)
        else:
            lax.fori_loop(0, C, lambda c, carry: (stage1(c), carry)[1], 0)

        # --- Stage 2 (dominant): one batched bf16 MXU matmul, f32 accumulation.
        preds_ref[...] = jnp.dot(tmp_ref[...], wwT_ref[...],
                                 preferred_element_type=jnp.float32)   # (C*th, W)

        # --- Online softmax over classes: single pass over preds.
        def class_slice(c):
            off = c * th if isinstance(c, int) else pl.multiple_of(c * th, th)
            return preds_ref[pl.ds(off, th), :]

        def cls_step(c, carry):
            m, ssum, picked = carry
            p_c = class_slice(c)
            m_new = jnp.maximum(m, p_c)
            ssum = ssum * jnp.exp(m - m_new) + jnp.exp(p_c - m_new)
            # NOTE: labels >= C silently give picked = 0 (PyTorch would raise).
            picked = picked + jnp.where(labels == c, p_c, 0.0)
            return m_new, ssum, picked

        p0 = class_slice(0)
        carry = (p0, jnp.ones_like(p0), jnp.where(labels == 0, p0, 0.0))
        if C <= 8:
            for c in range(1, C):
                carry = cls_step(c, carry)
        else:
            carry = lax.fori_loop(1, C, cls_step, carry)
        m, ssum, picked = carry

        lse = m + jnp.log(ssum)
        ce = jnp.where(valid, lse - picked, 0.0)

        ce_s = jnp.sum(ce, keepdims=True)                           # (1, 1)
        cnt_s = jnp.sum(valid.astype(jnp.float32), keepdims=True)   # (1, 1)
        lane = jax.lax.broadcasted_iota(jnp.int32, acc_ref.shape, 1)
        acc_ref[...] += (jnp.where(lane == 0, ce_s, 0.0)
                         + jnp.where(lane == 1, cnt_s, 0.0))


def _pick_th(H, W, C, Hs, Ws_pad):
    """Largest H-tile that divides H and keeps the live VMEM windows under budget."""
    cands = [c for c in (256, 128, 64, 32, 16, 8) if H % c == 0]
    if not cands:
        return H
    w_l = _round_up(W, 128)
    hs_l = _round_up(Hs, 128)
    for th in cands:
        est = (2 * C * Hs * Ws_pad * 2        # seg window (bf16, double-buffered)
               + 2 * th * w_l * 4             # labels window (int32)
               + 2 * th * hs_l * 2            # wh window (bf16)
               + 2 * Ws_pad * w_l * 2         # wwT window (bf16)
               + C * th * Ws_pad * 2          # tmp scratch (bf16)
               + C * th * w_l * 4             # preds scratch (f32)
               + 3 * th * w_l * 4)            # online-softmax carries
        if est <= _WINDOW_BUDGET:
            return th
    return cands[-1]


def seg_ce_loss(seg, labels, H, W):
    B, C, Hs, Ws = seg.shape
    Ws_pad = _round_up(Ws, 128)
    labels = labels.astype(jnp.int32)

    # bf16 MXU inputs (f32 accumulation).  Ws is padded to a multiple of 128 so the
    # stage-1 scratch is lane-dense (unmasked stores) and stage-2's contraction dim
    # is full-width; the zero columns/rows contribute nothing.
    seg_bf = seg.astype(jnp.bfloat16)
    wh = interp_matrix(H, Hs).astype(jnp.bfloat16)          # (H, Hs)
    wwT = interp_matrix(W, Ws).T                            # (Ws, W) f32
    if Ws_pad != Ws:
        seg_bf = jnp.pad(seg_bf, ((0, 0), (0, 0), (0, 0), (0, Ws_pad - Ws)))
        wwT = jnp.pad(wwT, ((0, Ws_pad - Ws), (0, 0)))
    wwT = wwT.astype(jnp.bfloat16)                          # (Ws_pad, W)

    th = _pick_th(H, W, C, Hs, Ws_pad)                      # divides H (or == H)
    n_h = _cdiv(H, th)
    n_split = 2 if n_h >= 2 else 1        # 2-way H split keeps both v7x TCs busy
    n_h_per_split = _cdiv(n_h, n_split)

    def h_idx(s, h):
        # Clamp so no block is fully out of bounds; redundant steps are skipped
        # inside the kernel via pl.when.
        return jnp.minimum(s * n_h_per_split + h, n_h - 1)

    kernel = functools.partial(_seg_ce_kernel, C=C, n_h=n_h,
                               n_h_per_split=n_h_per_split)
    acc = pl.pallas_call(
        kernel,
        out_shape=jax.ShapeDtypeStruct((1, n_split * B * 128), jnp.float32),
        grid_spec=pltpu.PrefetchScalarGridSpec(
            num_scalar_prefetch=0,
            grid=(n_split, B, n_h_per_split),
            in_specs=[
                pl.BlockSpec((None, C, Hs, Ws_pad), lambda s, b, h: (b, 0, 0, 0)),
                pl.BlockSpec((None, th, W), lambda s, b, h: (b, h_idx(s, h), 0)),
                pl.BlockSpec((th, Hs), lambda s, b, h: (h_idx(s, h), 0)),
                pl.BlockSpec((Ws_pad, W), lambda s, b, h: (0, 0)),
            ],
            out_specs=pl.BlockSpec((1, 128), lambda s, b, h: (0, s * B + b)),
            scratch_shapes=[pltpu.VMEM((C * th, Ws_pad), jnp.bfloat16),
                            pltpu.VMEM((C * th, W), jnp.float32)],
        ),
        compiler_params=pltpu.CompilerParams(
            dimension_semantics=("parallel", "parallel", "arbitrary"),
            vmem_limit_bytes=_VMEM_LIMIT),
    )(seg_bf, labels, wh, wwT)

    sums = acc.reshape(n_split * B, 128).sum(axis=0)
    return sums[0] / sums[1]


# ----------------------------------------------------------------------------
# Kernel 2: fused PPC (CE w/ ignore) + PPD ((1 - gathered logit)^2) reductions.
#   Logits stay in their native (N, M) layout (contiguous row-tile DMAs, no
#   wrapper transpose/pad).  Output: one (1,128) row per parallel slice with
#   lane 0 = ce sum, lane 1 = ppd sum, lane 2 = valid count.
# ----------------------------------------------------------------------------
def _contrast_kernel(logits_ref, tgt_ref, acc_ref,
                     *, n_valid, n_blocks, n_per_core, tile_n):
    p = pl.program_id(0)
    i = pl.program_id(1)

    @pl.when(i == 0)
    def _init():
        acc_ref[...] = jnp.zeros_like(acc_ref)

    blk = p * n_per_core + i          # logical row-tile this step should handle

    @pl.when(blk < n_blocks)
    def _compute():
        logits = logits_ref[...].astype(jnp.float32)        # (tile_n, M)
        t = tgt_ref[...]                                    # (tile_n, 1) int32
        gidx = blk * tile_n + jax.lax.broadcasted_iota(jnp.int32, t.shape, 0)
        valid = (t != IGNORE_LABEL) & (gidx < n_valid)      # masks ragged tail too

        m = jnp.max(logits, axis=-1, keepdims=True)                         # XLU
        lse = m + jnp.log(jnp.sum(jnp.exp(logits - m), axis=-1, keepdims=True))
        col = jax.lax.broadcasted_iota(jnp.int32, logits.shape, 1)
        # NOTE: targets >= M silently give picked = 0 (PyTorch would raise).
        picked = jnp.sum(jnp.where(col == t, logits, 0.0), axis=-1, keepdims=True)

        ce = jnp.where(valid, lse - picked, 0.0)
        ppd = jnp.where(valid, (1.0 - picked) ** 2, 0.0)

        ce_s = jnp.sum(ce, keepdims=True)
        ppd_s = jnp.sum(ppd, keepdims=True)
        cnt_s = jnp.sum(valid.astype(jnp.float32), keepdims=True)
        lane = jax.lax.broadcasted_iota(jnp.int32, acc_ref.shape, 1)
        acc_ref[...] += (jnp.where(lane == 0, ce_s, 0.0)
                         + jnp.where(lane == 1, ppd_s, 0.0)
                         + jnp.where(lane == 2, cnt_s, 0.0))


def contrast_losses(contrast_logits, contrast_target):
    N, M = contrast_logits.shape
    tgt = contrast_target.astype(jnp.int32).reshape(N, 1)   # cheap vs. N*M logits

    # Row tile derived from a VMEM budget (lane-padded), capped for tiny N.
    itemsize = jnp.dtype(contrast_logits.dtype).itemsize
    vmem_row_bytes = _round_up(M, 128) * itemsize
    per_buf_budget = 10 * 1024 * 1024
    tile_n = min(8192, max(8, (per_buf_budget // vmem_row_bytes) // 8 * 8))
    tile_n = min(tile_n, _round_up(N, 8))

    n_blocks = _cdiv(N, tile_n)
    n_par = 2 if n_blocks >= 2 else 1      # 2-way split for v7x megacore
    n_per_core = _cdiv(n_blocks, n_par)

    def blk_idx(p, i):
        # Clamp so no block is fully OOB; clamped (duplicate) steps are skipped
        # inside the kernel via pl.when.
        return jnp.minimum(p * n_per_core + i, n_blocks - 1)

    kernel = functools.partial(_contrast_kernel, n_valid=N, n_blocks=n_blocks,
                               n_per_core=n_per_core, tile_n=tile_n)
    acc = pl.pallas_call(
        kernel,
        out_shape=jax.ShapeDtypeStruct((1, n_par * 128), jnp.float32),
        grid_spec=pltpu.PrefetchScalarGridSpec(
            num_scalar_prefetch=0,
            grid=(n_par, n_per_core),
            in_specs=[
                pl.BlockSpec((tile_n, M), lambda p, i: (blk_idx(p, i), 0)),
                pl.BlockSpec((tile_n, 1), lambda p, i: (blk_idx(p, i), 0)),
            ],
            out_specs=pl.BlockSpec((1, 128), lambda p, i: (0, p)),
        ),
        compiler_params=pltpu.CompilerParams(
            dimension_semantics=("parallel", "arbitrary"),
            vmem_limit_bytes=_VMEM_LIMIT),
    )(contrast_logits, tgt)

    sums = acc.reshape(n_par, 128).sum(axis=0)
    loss_ppc = sums[0] / sums[2]
    loss_ppd = sums[1] / sums[2]
    return loss_ppc, loss_ppd


# ----------------------------------------------------------------------------
# Module forward (dict-input path).
# ----------------------------------------------------------------------------
@jax.jit
def pixel_prototype_ce_loss(seg, contrast_logits, contrast_target,
                            subdomain_probs, target):
    h, w = target.shape[1], target.shape[2]

    loss = seg_ce_loss(seg, target, h, w)                      # FSCELoss
    loss_ppc, loss_ppd = contrast_losses(contrast_logits, contrast_target)

    # Computed but NOT included in the returned loss (matches the PyTorch forward).
    mean_probs = subdomain_probs.mean(axis=(0, 2, 3))
    diversity_loss = -jnp.sum(mean_probs * jnp.log(mean_probs + 1e-5))
    _dynamic_subdomain_loss = DIVERSITY_WEIGHT * diversity_loss  # noqa: F841

    prototype_loss = (loss
                      + LOSS_PPL_A_WEIGHT * loss_ppc
                      + LOSS_PPL_B_WEIGHT * loss_ppd)
    return prototype_loss


# ----------------------------------------------------------------------------
# Pure-JAX f32 reference (same math, no Pallas) for a sanity check.
# ----------------------------------------------------------------------------
def reference_loss(seg, contrast_logits, contrast_target, target):
    B, C, Hs, Ws = seg.shape
    H, W = target.shape[1], target.shape[2]
    wh = interp_matrix(H, Hs)
    ww = interp_matrix(W, Ws)
    pred = jnp.einsum('hS,bcSw,Ww->bchW', wh, seg, ww)

    logp = jax.nn.log_softmax(pred, axis=1)
    valid = target != IGNORE_LABEL
    lab_c = jnp.clip(target, 0, C - 1)
    picked = jnp.take_along_axis(logp, lab_c[:, None, :, :], axis=1)[:, 0]
    ce = jnp.where(valid, -picked, 0.0)
    loss = ce.sum() / valid.sum()

    ct = contrast_target.astype(jnp.int32)
    v = ct != IGNORE_LABEL
    logp2 = jax.nn.log_softmax(contrast_logits, axis=1)
    ctc = jnp.clip(ct, 0, contrast_logits.shape[1] - 1)
    picked_lp = jnp.take_along_axis(logp2, ctc[:, None], axis=1)[:, 0]
    loss_ppc = jnp.where(v, -picked_lp, 0.0).sum() / v.sum()
    picked_logit = jnp.take_along_axis(contrast_logits, ctc[:, None], axis=1)[:, 0]
    loss_ppd = jnp.where(v, (1.0 - picked_logit) ** 2, 0.0).sum() / v.sum()

    return loss + LOSS_PPL_A_WEIGHT * loss_ppc + LOSS_PPL_B_WEIGHT * loss_ppd


if __name__ == "__main__":
    key = jax.random.PRNGKey(0)
    k_seg, k_lab, k_ign1, k_clog, k_ct, k_ign2, k_sub = jax.random.split(key, 7)

    B, C = 2, 4            # batch, num classes
    Hs, Ws = 8, 8          # seg logits spatial
    H, W = 16, 16          # target spatial
    NUM_PROTO = 4
    M = C * NUM_PROTO      # prototype logits per pixel
    N = B * H * W          # 512 pixels
    K_SUB = 4              # subdomains

    seg = jax.random.normal(k_seg, (B, C, Hs, Ws), jnp.float32)

    target = jax.random.randint(k_lab, (B, H, W), 0, C, jnp.int32)
    ign_mask = jax.random.uniform(k_ign1, (B, H, W)) < 0.125
    target = jnp.where(ign_mask, IGNORE_LABEL, target)

    contrast_logits = jax.random.normal(k_clog, (N, M), jnp.float32)
    contrast_target = jax.random.randint(k_ct, (N,), 0, M, jnp.int32)
    ign_mask2 = jax.random.uniform(k_ign2, (N,)) < 0.125
    contrast_target = jnp.where(ign_mask2, IGNORE_LABEL, contrast_target).astype(jnp.float32)

    subdomain_probs = jax.nn.softmax(
        jax.random.normal(k_sub, (B, K_SUB, H, W), jnp.float32), axis=1)

    out = pixel_prototype_ce_loss(seg, contrast_logits, contrast_target,
                                  subdomain_probs, target)
    out = jax.block_until_ready(out)

    ref = reference_loss(seg, contrast_logits, contrast_target, target)
    assert np.isfinite(float(out)), "non-finite loss"
    # Seg-CE path feeds the MXU in bf16 (f32 accumulation): allow ~1% vs f32 ref.
    assert abs(float(out) - float(ref)) < 2e-2, (float(out), float(ref))

    print("KERNEL_OK")
</pallas_src>

<mosaic_0001>
module attributes {stable_mosaic.version = 11 : i64} {
  func.func private @main(%arg0: i32) attributes {dimension_semantics = [#tpu.dimension_semantics<core_parallel>], iteration_bounds = array<i64: 2>, tpu.core_type = #tpu.core_type<sc_scalar_subcore>, window_params = []} {
    return
  }
}

module attributes {stable_mosaic.version = 11 : i64} {
  func.func private @main(%arg0: i32) attributes {dimension_semantics = [#tpu.dimension_semantics<core_parallel>], iteration_bounds = array<i64: 2>, tpu.core_type = #tpu.core_type<sc_scalar_subcore>, window_params = []} {
    return
  }
}

module attributes {stable_mosaic.version = 11 : i64} {
  func.func @_contrast_kernel(%arg0: i32, %arg1: i32, %arg2: memref<512x16xf32, #tpu.memory_space<vmem>>, %arg3: memref<512x1xi32, #tpu.memory_space<vmem>>, %arg4: memref<1x128xf32, #tpu.memory_space<vmem>>) attributes {dimension_semantics = [#tpu.dimension_semantics<parallel>, #tpu.dimension_semantics<arbitrary>], iteration_bounds = array<i64: 1, 1>, scalar_prefetch = 0 : i64, scratch_operands = 0 : i64, tpu.core_type = #tpu.core_type<tc>, window_params = [{transform_indices = @transform_0, window_bounds = array<i64: 512, 16>}, {transform_indices = @transform_1, window_bounds = array<i64: 512, 1>}, {transform_indices = @transform_2, window_bounds = array<i64: 1, 128>}]} {
    %c0_i32 = arith.constant 0 : i32
    %0 = arith.cmpi eq, %arg1, %c0_i32 : i32
    %1 = arith.extui %0 : i1 to i32
    %c0_i32_0 = arith.constant 0 : i32
    %2 = arith.cmpi ne, %1, %c0_i32_0 : i32
    scf.if %2 {
      %cst = arith.constant 0.000000e+00 : f32
      %8 = vector.broadcast %cst : f32 to vector<1x128xf32>
      %c0 = arith.constant 0 : index
      %c0_3 = arith.constant 0 : index
      %9 = vector.load %arg4[%c0, %c0_3] : memref<1x128xf32, #tpu.memory_space<vmem>>, vector<1x128xf32>
      tpu.vector_store %arg4[%c0, %c0_3], %8 {strides = array<i32>} : memref<1x128xf32, #tpu.memory_space<vmem>>, vector<1x128xf32>,
    } else {
    }
    %c1_i32 = arith.constant 1 : i32
    %3 = arith.muli %arg0, %c1_i32 : i32
    %4 = arith.addi %3, %arg1 : i32
    %c1_i32_1 = arith.constant 1 : i32
    %5 = arith.cmpi slt, %4, %c1_i32_1 : i32
    %6 = arith.extui %5 : i1 to i32
    %c0_i32_2 = arith.constant 0 : i32
    %7 = arith.cmpi ne, %6, %c0_i32_2 : i32
    scf.if %7 {
      %c0 = arith.constant 0 : index
      %c0_3 = arith.constant 0 : index
      %8 = vector.load %arg2[%c0, %c0_3] : memref<512x16xf32, #tpu.memory_space<vmem>>, vector<512x16xf32>
      %c0_4 = arith.constant 0 : index
      %c0_5 = arith.constant 0 : index
      %9 = vector.load %arg3[%c0_4, %c0_5] : memref<512x1xi32, #tpu.memory_space<vmem>>, vector<512x1xi32>
      %c512_i32 = arith.constant 512 : i32
      %10 = arith.muli %4, %c512_i32 : i32
      %11 = tpu.iota {dimensions = array<i32: 0>} : vector<512x1xi32>
      %12 = vector.broadcast %10 : i32 to vector<512x1xi32>
      %13 = arith.addi %12, %11 : vector<512x1xi32>
      %c-1_i32 = arith.constant -1 : i32
      %14 = vector.broadcast %c-1_i32 : i32 to vector<512x1xi32>
      %15 = arith.cmpi ne, %9, %14 : vector<512x1xi32>
      %c512_i32_6 = arith.constant 512 : i32
      %16 = vector.broadcast %c512_i32_6 : i32 to vector<512x1xi32>
      %17 = arith.cmpi slt, %13, %16 : vector<512x1xi32>
      %18 = arith.andi %15, %17 : vector<512x1xi1>
      %cst = arith.constant dense<0xFF800000> : vector<512xf32>
      %19 = vector.multi_reduction <maximumf>, %8, %cst [1] : vector<512x16xf32> to vector<512xf32>
      %20 = vector.shape_cast %19 : vector<512xf32> to vector<512x1xf32>
      %21 = vector.broadcast %20 : vector<512x1xf32> to vector<512x16xf32>
      %22 = arith.subf %8, %21 : vector<512x16xf32>
      %23 = math.exp %22 : vector<512x16xf32>
      %cst_7 = arith.constant dense<0.000000e+00> : vector<512xf32>
      %24 = vector.multi_reduction <add>, %23, %cst_7 [1] : vector<512x16xf32> to vector<512xf32>
      %25 = vector.shape_cast %24 : vector<512xf32> to vector<512x1xf32>
      %26 = math.log %25 : vector<512x1xf32>
      %27 = arith.addf %20, %26 : vector<512x1xf32>
      %28 = tpu.iota {dimensions = array<i32: 1>} : vector<512x16xi32>
      %29 = vector.broadcast %9 : vector<512x1xi32> to vector<512x16xi32>
      %30 = arith.cmpi eq, %28, %29 : vector<512x16xi32>
      %cst_8 = arith.constant 0.000000e+00 : f32
      %31 = vector.broadcast %cst_8 : f32 to vector<512x16xf32>
      %32 = arith.select %30, %8, %31 : vector<512x16xi1>, vector<512x16xf32>
      %cst_9 = arith.constant dense<0.000000e+00> : vector<512xf32>
      %33 = vector.multi_reduction <add>, %32, %cst_9 [1] : vector<512x16xf32> to vector<512xf32>
      %34 = vector.shape_cast %33 : vector<512xf32> to vector<512x1xf32>
      %35 = arith.subf %27, %34 : vector<512x1xf32>
      %cst_10 = arith.constant 0.000000e+00 : f32
      %36 = vector.broadcast %cst_10 : f32 to vector<512x1xf32>
      %37 = arith.select %18, %35, %36 : vector<512x1xi1>, vector<512x1xf32>
      %cst_11 = arith.constant 1.000000e+00 : f32
      %38 = vector.broadcast %cst_11 : f32 to vector<512x1xf32>
      %39 = arith.subf %38, %34 : vector<512x1xf32>
      %40 = arith.mulf %39, %39 : vector<512x1xf32>
      %cst_12 = arith.constant 0.000000e+00 : f32
      %41 = vector.broadcast %cst_12 : f32 to vector<512x1xf32>
      %42 = arith.select %18, %40, %41 : vector<512x1xi1>, vector<512x1xf32>
      %43 = vector.shape_cast %37 : vector<512x1xf32> to vector<1x512x1xf32>
      %cst_13 = arith.constant dense<0.000000e+00> : vector<1xf32>
      %44 = vector.multi_reduction <add>, %43, %cst_13 [1, 2] : vector<1x512x1xf32> to vector<1xf32>
      %45 = vector.shape_cast %44 : vector<1xf32> to vector<1x1x1xf32>
      %46 = vector.extract %45[0, 0, 0] : f32 from vector<1x1x1xf32>
      %47 = vector.broadcast %46 : f32 to vector<1x1xf32>
      %48 = vector.shape_cast %42 : vector<512x1xf32> to vector<1x512x1xf32>
      %cst_14 = arith.constant dense<0.000000e+00> : vector<1xf32>
      %49 = vector.multi_reduction <add>, %48, %cst_14 [1, 2] : vector<1x512x1xf32> to vector<1xf32>
      %50 = vector.shape_cast %49 : vector<1xf32> to vector<1x1x1xf32>
      %51 = vector.extract %50[0, 0, 0] : f32 from vector<1x1x1xf32>
      %52 = vector.broadcast %51 : f32 to vector<1x1xf32>
      %53 = arith.extui %18 : vector<512x1xi1> to vector<512x1xi32>
      %54 = arith.sitofp %53 : vector<512x1xi32> to vector<512x1xf32>
      %55 = vector.shape_cast %54 : vector<512x1xf32> to vector<1x512x1xf32>
      %cst_15 = arith.constant dense<0.000000e+00> : vector<1xf32>
      %56 = vector.multi_reduction <add>, %55, %cst_15 [1, 2] : vector<1x512x1xf32> to vector<1xf32>
      %57 = vector.shape_cast %56 : vector<1xf32> to vector<1x1x1xf32>
      %58 = vector.extract %57[0, 0, 0] : f32 from vector<1x1x1xf32>
      %59 = vector.broadcast %58 : f32 to vector<1x1xf32>
      %60 = tpu.iota {dimensions = array<i32: 1>} : vector<1x128xi32>
      %c0_16 = arith.constant 0 : index
      %c0_17 = arith.constant 0 : index
      %61 = vector.load %arg4[%c0_16, %c0_17] : memref<1x128xf32, #tpu.memory_space<vmem>>, vector<1x128xf32>
      %c0_i32_18 = arith.constant 0 : i32
      %62 = vector.broadcast %c0_i32_18 : i32 to vector<1x128xi32>
      %63 = arith.cmpi eq, %60, %62 : vector<1x128xi32>
      %cst_19 = arith.constant 0.000000e+00 : f32
      %64 = vector.shape_cast %47 : vector<1x1xf32> to vector<1x1xf32>
      %65 = vector.broadcast %64 : vector<1x1xf32> to vector<1x128xf32>
      %66 = vector.broadcast %cst_19 : f32 to vector<1x128xf32>
      %67 = arith.select %63, %65, %66 : vector<1x128xi1>, vector<1x128xf32>
      %c1_i32_20 = arith.constant 1 : i32
      %68 = vector.broadcast %c1_i32_20 : i32 to vector<1x128xi32>
      %69 = arith.cmpi eq, %60, %68 : vector<1x128xi32>
      %cst_21 = arith.constant 0.000000e+00 : f32
      %70 = vector.shape_cast %52 : vector<1x1xf32> to vector<1x1xf32>
      %71 = vector.broadcast %70 : vector<1x1xf32> to vector<1x128xf32>
      %72 = vector.broadcast %cst_21 : f32 to vector<1x128xf32>
      %73 = arith.select %69, %71, %72 : vector<1x128xi1>, vector<1x128xf32>
      %74 = arith.addf %67, %73 : vector<1x128xf32>
      %c2_i32 = arith.constant 2 : i32
      %75 = vector.broadcast %c2_i32 : i32 to vector<1x128xi32>
      %76 = arith.cmpi eq, %60, %75 : vector<1x128xi32>
      %cst_22 = arith.constant 0.000000e+00 : f32
      %77 = vector.shape_cast %59 : vector<1x1xf32> to vector<1x1xf32>
      %78 = vector.broadcast %77 : vector<1x1xf32> to vector<1x128xf32>
      %79 = vector.broadcast %cst_22 : f32 to vector<1x128xf32>
      %80 = arith.select %76, %78, %79 : vector<1x128xi1>, vector<1x128xf32>
      %81 = arith.addf %74, %80 : vector<1x128xf32>
      %82 = arith.addf %61, %81 : vector<1x128xf32>
      %c0_23 = arith.constant 0 : index
      %c0_24 = arith.constant 0 : index
      %83 = vector.load %arg4[%c0_23, %c0_24] : memref<1x128xf32, #tpu.memory_space<vmem>>, vector<1x128xf32>
      tpu.vector_store %arg4[%c0_23, %c0_24], %82 {strides = array<i32>} : memref<1x128xf32, #tpu.memory_space<vmem>>, vector<1x128xf32>,
    } else {
    }
    return
  }
  func.func @transform_0(%arg0: i32, %arg1: i32) -> (i32, i32) {
    %c1_i32 = arith.constant 1 : i32
    %0 = arith.muli %arg0, %c1_i32 : i32
    %1 = arith.addi %0, %arg1 : i32
    %c0_i32 = arith.constant 0 : i32
    %2 = arith.minsi %1, %c0_i32 : i32
    %c0_i32_0 = arith.constant 0 : i32
    %c0_i32_1 = arith.constant 0 : i32
    return %2, %c0_i32_0 : i32, i32
  }
  func.func @transform_1(%arg0: i32, %arg1: i32) -> (i32, i32) {
    %c1_i32 = arith.constant 1 : i32
    %0 = arith.muli %arg0, %c1_i32 : i32
    %1 = arith.addi %0, %arg1 : i32
    %c0_i32 = arith.constant 0 : i32
    %2 = arith.minsi %1, %c0_i32 : i32
    %c0_i32_0 = arith.constant 0 : i32
    %c0_i32_1 = arith.constant 0 : i32
    return %2, %c0_i32_0 : i32, i32
  }
  func.func @transform_2(%arg0: i32, %arg1: i32) -> (i32, i32) {
    %c0_i32 = arith.constant 0 : i32
    %c0_i32_0 = arith.constant 0 : i32
    return %c0_i32, %arg0 : i32, i32
  }
}

module attributes {stable_mosaic.version = 11 : i64} {
  func.func @_seg_ce_kernel(%arg0: i32, %arg1: i32, %arg2: i32, %arg3: memref<1x4x8x128xbf16, #tpu.memory_space<vmem>>, %arg4: memref<1x16x16xi32, #tpu.memory_space<vmem>>, %arg5: memref<16x8xbf16, #tpu.memory_space<vmem>>, %arg6: memref<128x16xbf16, #tpu.memory_space<vmem>>, %arg7: memref<1x128xf32, #tpu.memory_space<vmem>>, %arg8: memref<64x128xbf16, #tpu.memory_space<vmem>>, %arg9: memref<64x16xf32, #tpu.memory_space<vmem>>) attributes {dimension_semantics = [#tpu.dimension_semantics<parallel>, #tpu.dimension_semantics<parallel>, #tpu.dimension_semantics<arbitrary>], iteration_bounds = array<i64: 1, 2, 1>, scalar_prefetch = 0 : i64, scratch_operands = 2 : i64, tpu.core_type = #tpu.core_type<tc>, window_params = [{transform_indices = @transform_0, window_bounds = array<i64: 1, 4, 8, 128>}, {transform_indices = @transform_1, window_bounds = array<i64: 1, 16, 16>}, {transform_indices = @transform_2, window_bounds = array<i64: 16, 8>}, {pipeline_mode = #tpu.pipeline_mode<synchronous>, transform_indices = @transform_3, window_bounds = array<i64: 128, 16>}, {transform_indices = @transform_4, window_bounds = array<i64: 1, 128>}]} {
    %c0_i32 = arith.constant 0 : i32
    %0 = arith.cmpi eq, %arg2, %c0_i32 : i32
    %1 = arith.extui %0 : i1 to i32
    %c0_i32_0 = arith.constant 0 : i32
    %2 = arith.cmpi ne, %1, %c0_i32_0 : i32
    scf.if %2 {
      %cst = arith.constant 0.000000e+00 : f32
      %8 = vector.broadcast %cst : f32 to vector<1x128xf32>
      %c0 = arith.constant 0 : index
      %c0_3 = arith.constant 0 : index
      %9 = vector.load %arg7[%c0, %c0_3] : memref<1x128xf32, #tpu.memory_space<vmem>>, vector<1x128xf32>
      tpu.vector_store %arg7[%c0, %c0_3], %8 {strides = array<i32>} : memref<1x128xf32, #tpu.memory_space<vmem>>, vector<1x128xf32>,
    } else {
    }
    %c1_i32 = arith.constant 1 : i32
    %3 = arith.muli %arg0, %c1_i32 : i32
    %4 = arith.addi %3, %arg2 : i32
    %c1_i32_1 = arith.constant 1 : i32
    %5 = arith.cmpi slt, %4, %c1_i32_1 : i32
    %6 = arith.extui %5 : i1 to i32
    %c0_i32_2 = arith.constant 0 : i32
    %7 = arith.cmpi ne, %6, %c0_i32_2 : i32
    scf.if %7 {
      %c0 = arith.constant 0 : index
      %c0_3 = arith.constant 0 : index
      %8 = vector.load %arg5[%c0, %c0_3] : memref<16x8xbf16, #tpu.memory_space<vmem>>, vector<16x8xbf16>
      %c0_4 = arith.constant 0 : index
      %c0_5 = arith.constant 0 : index
      %c0_6 = arith.constant 0 : index
      %9 = vector.load %arg4[%c0_4, %c0_5, %c0_6] : memref<1x16x16xi32, #tpu.memory_space<vmem>>, vector<1x16x16xi32>
      %10 = vector.shape_cast %9 : vector<1x16x16xi32> to vector<16x16xi32>
      %c-1_i32 = arith.constant -1 : i32
      %11 = vector.broadcast %c-1_i32 : i32 to vector<16x16xi32>
      %12 = arith.cmpi ne, %10, %11 : vector<16x16xi32>
      %c0_7 = arith.constant 0 : index
      %c0_8 = arith.constant 0 : index
      %c0_9 = arith.constant 0 : index
      %c0_10 = arith.constant 0 : index
      %13 = vector.load %arg3[%c0_7, %c0_8, %c0_9, %c0_10] : memref<1x4x8x128xbf16, #tpu.memory_space<vmem>>, vector<1x1x8x128xbf16>
      %14 = vector.shape_cast %13 : vector<1x1x8x128xbf16> to vector<8x128xbf16>
      %cst = arith.constant dense<0.000000e+00> : vector<16x128xf32>
      %15 = tpu.matmul %8, %14, %cst {dimension_numbers = #tpu.dot_dimension_numbers<[1], [0], [0], [1], [0, 0, 1, 1], [], []>} : vector<16x8xbf16>, vector<8x128xbf16>, vector<16x128xf32> -> vector<16x128xf32>
      %16 = arith.truncf %15 : vector<16x128xf32> to vector<16x128xbf16>
      %c0_11 = arith.constant 0 : index
      %c0_12 = arith.constant 0 : index
      %17 = vector.load %arg8[%c0_11, %c0_12] : memref<64x128xbf16, #tpu.memory_space<vmem>>, vector<16x128xbf16>
      tpu.vector_store %arg8[%c0_11, %c0_12], %16 {strides = array<i32>} : memref<64x128xbf16, #tpu.memory_space<vmem>>, vector<16x128xbf16>,
      %c0_13 = arith.constant 0 : index
      %c1 = arith.constant 1 : index
      %c0_14 = arith.constant 0 : index
      %c0_15 = arith.constant 0 : index
      %18 = vector.load %arg3[%c0_13, %c1, %c0_14, %c0_15] : memref<1x4x8x128xbf16, #tpu.memory_space<vmem>>, vector<1x1x8x128xbf16>
      %19 = vector.shape_cast %18 : vector<1x1x8x128xbf16> to vector<8x128xbf16>
      %cst_16 = arith.constant dense<0.000000e+00> : vector<16x128xf32>
      %20 = tpu.matmul %8, %19, %cst_16 {dimension_numbers = #tpu.dot_dimension_numbers<[1], [0], [0], [1], [0, 0, 1, 1], [], []>} : vector<16x8xbf16>, vector<8x128xbf16>, vector<16x128xf32> -> vector<16x128xf32>
      %21 = arith.truncf %20 : vector<16x128xf32> to vector<16x128xbf16>
      %c16 = arith.constant 16 : index
      %c0_17 = arith.constant 0 : index
      %22 = vector.load %arg8[%c16, %c0_17] : memref<64x128xbf16, #tpu.memory_space<vmem>>, vector<16x128xbf16>
      tpu.vector_store %arg8[%c16, %c0_17], %21 {strides = array<i32>} : memref<64x128xbf16, #tpu.memory_space<vmem>>, vector<16x128xbf16>,
      %c0_18 = arith.constant 0 : index
      %c2 = arith.constant 2 : index
      %c0_19 = arith.constant 0 : index
      %c0_20 = arith.constant 0 : index
      %23 = vector.load %arg3[%c0_18, %c2, %c0_19, %c0_20] : memref<1x4x8x128xbf16, #tpu.memory_space<vmem>>, vector<1x1x8x128xbf16>
      %24 = vector.shape_cast %23 : vector<1x1x8x128xbf16> to vector<8x128xbf16>
      %cst_21 = arith.constant dense<0.000000e+00> : vector<16x128xf32>
      %25 = tpu.matmul %8, %24, %cst_21 {dimension_numbers = #tpu.dot_dimension_numbers<[1], [0], [0], [1], [0, 0, 1, 1], [], []>} : vector<16x8xbf16>, vector<8x128xbf16>, vector<16x128xf32> -> vector<16x128xf32>
      %26 = arith.truncf %25 : vector<16x128xf32> to vector<16x128xbf16>
      %c32 = arith.constant 32 : index
      %c0_22 = arith.constant 0 : index
      %27 = vector.load %arg8[%c32, %c0_22] : memref<64x128xbf16, #tpu.memory_space<vmem>>, vector<16x128xbf16>
      tpu.vector_store %arg8[%c32, %c0_22], %26 {strides = array<i32>} : memref<64x128xbf16, #tpu.memory_space<vmem>>, vector<16x128xbf16>,
      %c0_23 = arith.constant 0 : index
      %c3 = arith.constant 3 : index
      %c0_24 = arith.constant 0 : index
      %c0_25 = arith.constant 0 : index
      %28 = vector.load %arg3[%c0_23, %c3, %c0_24, %c0_25] : memref<1x4x8x128xbf16, #tpu.memory_space<vmem>>, vector<1x1x8x128xbf16>
      %29 = vector.shape_cast %28 : vector<1x1x8x128xbf16> to vector<8x128xbf16>
      %cst_26 = arith.constant dense<0.000000e+00> : vector<16x128xf32>
      %30 = tpu.matmul %8, %29, %cst_26 {dimension_numbers = #tpu.dot_dimension_numbers<[1], [0], [0], [1], [0, 0, 1, 1], [], []>} : vector<16x8xbf16>, vector<8x128xbf16>, vector<16x128xf32> -> vector<16x128xf32>
      %31 = arith.truncf %30 : vector<16x128xf32> to vector<16x128xbf16>
      %c48 = arith.constant 48 : index
      %c0_27 = arith.constant 0 : index
      %32 = vector.load %arg8[%c48, %c0_27] : memref<64x128xbf16, #tpu.memory_space<vmem>>, vector<16x128xbf16>
      tpu.vector_store %arg8[%c48, %c0_27], %31 {strides = array<i32>} : memref<64x128xbf16, #tpu.memory_space<vmem>>, vector<16x128xbf16>,
      %c0_28 = arith.constant 0 : index
      %c0_29 = arith.constant 0 : index
      %33 = vector.load %arg8[%c0_28, %c0_29] : memref<64x128xbf16, #tpu.memory_space<vmem>>, vector<64x128xbf16>
      %c0_30 = arith.constant 0 : index
      %c0_31 = arith.constant 0 : index
      %34 = vector.load %arg6[%c0_30, %c0_31] : memref<128x16xbf16, #tpu.memory_space<vmem>>, vector<128x16xbf16>
      %cst_32 = arith.constant dense<0.000000e+00> : vector<64x16xf32>
      %35 = tpu.matmul %33, %34, %cst_32 {dimension_numbers = #tpu.dot_dimension_numbers<[1], [0], [0], [1], [0, 0, 1, 1], [], []>} : vector<64x128xbf16>, vector<128x16xbf16>, vector<64x16xf32> -> vector<64x16xf32>
      %c0_33 = arith.constant 0 : index
      %c0_34 = arith.constant 0 : index
      %36 = vector.load %arg9[%c0_33, %c0_34] : memref<64x16xf32, #tpu.memory_space<vmem>>, vector<64x16xf32>
      tpu.vector_store %arg9[%c0_33, %c0_34], %35 {strides = array<i32>} : memref<64x16xf32, #tpu.memory_space<vmem>>, vector<64x16xf32>,
      %c0_35 = arith.constant 0 : index
      %c0_36 = arith.constant 0 : index
      %37 = vector.load %arg9[%c0_35, %c0_36] : memref<64x16xf32, #tpu.memory_space<vmem>>, vector<16x16xf32>
      %cst_37 = arith.constant 1.000000e+00 : f32
      %38 = vector.broadcast %cst_37 : f32 to vector<16x16xf32>
      %c0_i32_38 = arith.constant 0 : i32
      %39 = vector.broadcast %c0_i32_38 : i32 to vector<16x16xi32>
      %40 = arith.cmpi eq, %10, %39 : vector<16x16xi32>
      %cst_39 = arith.constant 0.000000e+00 : f32
      %41 = vector.broadcast %cst_39 : f32 to vector<16x16xf32>
      %42 = arith.select %40, %37, %41 : vector<16x16xi1>, vector<16x16xf32>
      %c16_40 = arith.constant 16 : index
      %c0_41 = arith.constant 0 : index
      %43 = vector.load %arg9[%c16_40, %c0_41] : memref<64x16xf32, #tpu.memory_space<vmem>>, vector<16x16xf32>
      %44 = arith.maximumf %37, %43 : vector<16x16xf32>
      %45 = arith.subf %37, %44 : vector<16x16xf32>
      %46 = math.exp %45 : vector<16x16xf32>
      %47 = arith.mulf %38, %46 : vector<16x16xf32>
      %48 = arith.subf %43, %44 : vector<16x16xf32>
      %49 = math.exp %48 : vector<16x16xf32>
      %50 = arith.addf %47, %49 : vector<16x16xf32>
      %c1_i32_42 = arith.constant 1 : i32
      %51 = vector.broadcast %c1_i32_42 : i32 to vector<16x16xi32>
      %52 = arith.cmpi eq, %10, %51 : vector<16x16xi32>
      %cst_43 = arith.constant 0.000000e+00 : f32
      %53 = vector.broadcast %cst_43 : f32 to vector<16x16xf32>
      %54 = arith.select %52, %43, %53 : vector<16x16xi1>, vector<16x16xf32>
      %55 = arith.addf %42, %54 : vector<16x16xf32>
      %c32_44 = arith.constant 32 : index
      %c0_45 = arith.constant 0 : index
      %56 = vector.load %arg9[%c32_44, %c0_45] : memref<64x16xf32, #tpu.memory_space<vmem>>, vector<16x16xf32>
      %57 = arith.maximumf %44, %56 : vector<16x16xf32>
      %58 = arith.subf %44, %57 : vector<16x16xf32>
      %59 = math.exp %58 : vector<16x16xf32>
      %60 = arith.mulf %50, %59 : vector<16x16xf32>
      %61 = arith.subf %56, %57 : vector<16x16xf32>
      %62 = math.exp %61 : vector<16x16xf32>
      %63 = arith.addf %60, %62 : vector<16x16xf32>
      %c2_i32 = arith.constant 2 : i32
      %64 = vector.broadcast %c2_i32 : i32 to vector<16x16xi32>
      %65 = arith.cmpi eq, %10, %64 : vector<16x16xi32>
      %cst_46 = arith.constant 0.000000e+00 : f32
      %66 = vector.broadcast %cst_46 : f32 to vector<16x16xf32>
      %67 = arith.select %65, %56, %66 : vector<16x16xi1>, vector<16x16xf32>
      %68 = arith.addf %55, %67 : vector<16x16xf32>
      %c48_47 = arith.constant 48 : index
      %c0_48 = arith.constant 0 : index
      %69 = vector.load %arg9[%c48_47, %c0_48] : memref<64x16xf32, #tpu.memory_space<vmem>>, vector<16x16xf32>
      %70 = arith.maximumf %57, %69 : vector<16x16xf32>
      %71 = arith.subf %57, %70 : vector<16x16xf32>
      %72 = math.exp %71 : vector<16x16xf32>
      %73 = arith.mulf %63, %72 : vector<16x16xf32>
      %74 = arith.subf %69, %70 : vector<16x16xf32>
      %75 = math.exp %74 : vector<16x16xf32>
      %76 = arith.addf %73, %75 : vector<16x16xf32>
      %c3_i32 = arith.constant 3 : i32
      %77 = vector.broadcast %c3_i32 : i32 to vector<16x16xi32>
      %78 = arith.cmpi eq, %10, %77 : vector<16x16xi32>
      %cst_49 = arith.constant 0.000000e+00 : f32
      %79 = vector.broadcast %cst_49 : f32 to vector<16x16xf32>
      %80 = arith.select %78, %69, %79 : vector<16x16xi1>, vector<16x16xf32>
      %81 = arith.addf %68, %80 : vector<16x16xf32>
      %82 = math.log %76 : vector<16x16xf32>
      %83 = arith.addf %70, %82 : vector<16x16xf32>
      %84 = arith.subf %83, %81 : vector<16x16xf32>
      %cst_50 = arith.constant 0.000000e+00 : f32
      %85 = vector.broadcast %cst_50 : f32 to vector<16x16xf32>
      %86 = arith.select %12, %84, %85 : vector<16x16xi1>, vector<16x16xf32>
      %87 = vector.shape_cast %86 : vector<16x16xf32> to vector<1x16x16xf32>
      %cst_51 = arith.constant dense<0.000000e+00> : vector<1xf32>
      %88 = vector.multi_reduction <add>, %87, %cst_51 [1, 2] : vector<1x16x16xf32> to vector<1xf32>
      %89 = vector.shape_cast %88 : vector<1xf32> to vector<1x1x1xf32>
      %90 = vector.extract %89[0, 0, 0] : f32 from vector<1x1x1xf32>
      %91 = vector.broadcast %90 : f32 to vector<1x1xf32>
      %92 = arith.extui %12 : vector<16x16xi1> to vector<16x16xi32>
      %93 = arith.sitofp %92 : vector<16x16xi32> to vector<16x16xf32>
      %94 = vector.shape_cast %93 : vector<16x16xf32> to vector<1x16x16xf32>
      %cst_52 = arith.constant dense<0.000000e+00> : vector<1xf32>
      %95 = vector.multi_reduction <add>, %94, %cst_52 [1, 2] : vector<1x16x16xf32> to vector<1xf32>
      %96 = vector.shape_cast %95 : vector<1xf32> to vector<1x1x1xf32>
      %97 = vector.extract %96[0, 0, 0] : f32 from vector<1x1x1xf32>
      %98 = vector.broadcast %97 : f32 to vector<1x1xf32>
      %99 = tpu.iota {dimensions = array<i32: 1>} : vector<1x128xi32>
      %c0_53 = arith.constant 0 : index
      %c0_54 = arith.constant 0 : index
      %100 = vector.load %arg7[%c0_53, %c0_54] : memref<1x128xf32, #tpu.memory_space<vmem>>, vector<1x128xf32>
      %c0_i32_55 = arith.constant 0 : i32
      %101 = vector.broadcast %c0_i32_55 : i32 to vector<1x128xi32>
      %102 = arith.cmpi eq, %99, %101 : vector<1x128xi32>
      %cst_56 = arith.constant 0.000000e+00 : f32
      %103 = vector.shape_cast %91 : vector<1x1xf32> to vector<1x1xf32>
      %104 = vector.broadcast %103 : vector<1x1xf32> to vector<1x128xf32>
      %105 = vector.broadcast %cst_56 : f32 to vector<1x128xf32>
      %106 = arith.select %102, %104, %105 : vector<1x128xi1>, vector<1x128xf32>
      %c1_i32_57 = arith.constant 1 : i32
      %107 = vector.broadcast %c1_i32_57 : i32 to vector<1x128xi32>
      %108 = arith.cmpi eq, %99, %107 : vector<1x128xi32>
      %cst_58 = arith.constant 0.000000e+00 : f32
      %109 = vector.shape_cast %98 : vector<1x1xf32> to vector<1x1xf32>
      %110 = vector.broadcast %109 : vector<1x1xf32> to vector<1x128xf32>
      %111 = vector.broadcast %cst_58 : f32 to vector<1x128xf32>
      %112 = arith.select %108, %110, %111 : vector<1x128xi1>, vector<1x128xf32>
      %113 = arith.addf %106, %112 : vector<1x128xf32>
      %114 = arith.addf %100, %113 : vector<1x128xf32>
      %c0_59 = arith.constant 0 : index
      %c0_60 = arith.constant 0 : index
      %115 = vector.load %arg7[%c0_59, %c0_60] : memref<1x128xf32, #tpu.memory_space<vmem>>, vector<1x128xf32>
      tpu.vector_store %arg7[%c0_59, %c0_60], %114 {strides = array<i32>} : memref<1x128xf32, #tpu.memory_space<vmem>>, vector<1x128xf32>,
    } else {
    }
    return
  }
  func.func @transform_0(%arg0: i32, %arg1: i32, %arg2: i32) -> (i32, i32, i32, i32) {
    %c0_i32 = arith.constant 0 : i32
    %c0_i32_0 = arith.constant 0 : i32
    %c0_i32_1 = arith.constant 0 : i32
    %c0_i32_2 = arith.constant 0 : i32
    return %arg1, %c0_i32, %c0_i32_0, %c0_i32_1 : i32, i32, i32, i32
  }
  func.func @transform_1(%arg0: i32, %arg1: i32, %arg2: i32) -> (i32, i32, i32) {
    %c1_i32 = arith.constant 1 : i32
    %0 = arith.muli %arg0, %c1_i32 : i32
    %1 = arith.addi %0, %arg2 : i32
    %c0_i32 = arith.constant 0 : i32
    %2 = arith.minsi %1, %c0_i32 : i32
    %c0_i32_0 = arith.constant 0 : i32
    %c0_i32_1 = arith.constant 0 : i32
    return %arg1, %2, %c0_i32_0 : i32, i32, i32
  }
  func.func @transform_2(%arg0: i32, %arg1: i32, %arg2: i32) -> (i32, i32) {
    %c1_i32 = arith.constant 1 : i32
    %0 = arith.muli %arg0, %c1_i32 : i32
    %1 = arith.addi %0, %arg2 : i32
    %c0_i32 = arith.constant 0 : i32
    %2 = arith.minsi %1, %c0_i32 : i32
    %c0_i32_0 = arith.constant 0 : i32
    %c0_i32_1 = arith.constant 0 : i32
    return %2, %c0_i32_0 : i32, i32
  }
  func.func @transform_3(%arg0: i32, %arg1: i32, %arg2: i32) -> (i32, i32) {
    %c0_i32 = arith.constant 0 : i32
    %c0_i32_0 = arith.constant 0 : i32
    %c0_i32_1 = arith.constant 0 : i32
    return %c0_i32, %c0_i32_0 : i32, i32
  }
  func.func @transform_4(%arg0: i32, %arg1: i32, %arg2: i32) -> (i32, i32) {
    %c2_i32 = arith.constant 2 : i32
    %0 = arith.muli %arg0, %c2_i32 : i32
    %1 = arith.addi %0, %arg1 : i32
    %c0_i32 = arith.constant 0 : i32
    %c0_i32_0 = arith.constant 0 : i32
    return %c0_i32, %1 : i32, i32
  }
}

</mosaic_0001>

<bundles_post_ra>
// kernel: pixel_prototype_ce_loss.2
= control target key start
LH: loop header
LB: loop body
LE: loop exit
PB: predicated region body
PF: predicated region fallthrough
CT: control target
= control target key end

     0   :  { %s1131_s15 = smov 0   ;;  %s1133_s16 = smov 0   ;;  %s1298_s0 = inlined_call_operand.vmem [shape: bf16[2,4,8,128], index: 0, kind: input, shape index: {}]   ;;  %s1299_s1 = inlined_call_operand.vmem [shape: s32[2,16,16], index: 1, kind: input, shape index: {}]   ;;  %s1300_s2 = inlined_call_operand.vmem [shape: bf16[16,8], index: 2, kind: input, shape index: {}]   ;;  %s1301_s3 = inlined_call_operand.vmem [shape: bf16[128,16], index: 3, kind: input, shape index: {}]   ;;  %s1302_s4 = inlined_call_operand.vmem [shape: f32[1,256], index: 4, kind: output, shape index: {}]  }
   0x1   :  { %s1135_s17 = smov 0  }
   0x2 LB: > { %s29_s18 = sadd.s32 1, %s1098_s16  ;;  %p918_p0 = scmp.ge.s32.totalorder %s1102_s17, 1  ;;  %s1102_s17 = sphi %s1135_s17, %s14_s17   ;;  %s1098_s16 = sphi %s1133_s16, %s1304_s16   ;;  %s1094_s15 = sphi %s1131_s15, %s1303_s15  }
   0x3   : > { %p31_p1 = scmp.ge.s32.totalorder %s29_s18, 2  ;;  %p237_p2 = scmp.lt.s32.totalorder %s1102_s17, 3 }
   0x5   : > { %s1306_s18 = smov (%p31_p1, %s29_s18), 0  ;;  %p238_p3 = pnand %p918_p0, %p237_p2 }
   0x6   : > { %p283_p4 = scmp.lt.s32.totalorder (!%p238_p3), %s1094_s15, 1  ;;  %v1104_v0 = vmov (!%p238_p3), 0.0   ;;  %vm1105_vm0 = vmmov (!%p238_p3), 0   ;;  %v1044_v1 = vld [vmem:[%s1301_s3] sm:$0xff] (!%p238_p3)   ;;  %v1045_v2 = vld [vmem:[%s1301_s3 + $0x8] sm:$0xff] (!%p238_p3)   ;;  %vm350_vm1 = vcmask (!%p238_p3), 1043456  }
   0x7   : > { %241 = sbr.rel (%p238_p3) target bundleno = 746 (0x2ea), region = 36  ;;  %965 = vmatprep.subr.bf16.mxu1 (!%p238_p3), %v1104_v0  ;;  %967 = vmatprep.mubr.msk.bf16.mxu1 (!%p238_p3), %vm1105_vm0, %v1104_v0  ;;  %v1046_v4 = vld [vmem:[%s1301_s3 + $0x10] sm:$0xff] (!%p238_p3)   ;;  %v1043_v6 = vld [vmem:[%s1300_s2] sm:$0xff] (!%p238_p3)   ;;  %vm346_vm2 = vcmask (!%p238_p3), 64512   ;;  %v1047_v9 = vld [vmem:[%s1301_s3 + $0x18] sm:$0xff] (!%p238_p3)   ;;  %vm674_vm3 = vcmask (!%p238_p3), 130048  }
   0x8   : > { %989 = vmatprep.subr.bf16.mxu0 (!%p238_p3), %v1044_v1  ;;  %v1048_v11 = vld [vmem:[%s1301_s3 + $0x20] sm:$0xff] (!%p238_p3)   ;;  %v1049_v15 = vld [vmem:[%s1301_s3 + $0x28] sm:$0xff] (!%p238_p3)   ;;  %v1050_v16 = vld [vmem:[%s1301_s3 + $0x30] sm:$0xff] (!%p238_p3)  }
   0x9   : > { %990 = vmatpush3.bf16.msra.mxu0 (!%p238_p3), %v1044_v1  ;;  %v1051_v17 = vld [vmem:[%s1301_s3 + $0x38] sm:$0xff] (!%p238_p3)  }
   0xa   : > { %991 = vmatprep.subr.bf16.mxu0 (!%p238_p3), %v1045_v2 }
   0xd   : > { %992 = vmatpush3.bf16.msra.mxu0 (!%p238_p3), %v1045_v2 }
   0xe   : > { %s1308_s15 = smov (!%p283_p4, %s1094_s15), 1  ;;  %993 = vmatprep.subr.bf16.mxu0 %v1046_v4 }
   0xf   : > { %s943_s23 = sshll.u32 %s1308_s15, 4  ;;  %s1283_s24 = scalar_lea.vmem %s1302_s4, %s1308_s15 }
  0x10   : > { %s1166_s26 = scalar_lea.vmem %s1298_s0, %s943_s23  ;;  %s299_s21 = scalar_lea.vmem %s1299_s1, %s943_s23  ;;  %328 = vst [vmem:[%s1283_s24] sm:$0x1] %v1104_v0 }
  0x11   : > { %v340_v3 = vld [vmem:[%s1166_s26] sm:$0xf]  ;;  %v925_v7 = vld [vmem:[%s1166_s26 + $0x4] sm:$0xf]  ;;  %994 = vmatpush3.bf16.msra.mxu0 %v1046_v4  ;;  %v927_v10 = vld [vmem:[%s1166_s26 + $0x8] sm:$0xf] }
  0x12   : > { %v352_v5 = vsel %vm350_vm1, %v340_v3, 0  ;;  %v400_v8 = vsel %vm350_vm1, %v925_v7, 0  ;;  %995 = vmatprep.subr.bf16.mxu0 %v1047_v9  ;;  %v448_v12 = vsel %vm350_vm1, %v927_v10, 0  ;;  %v929_v13 = vld [vmem:[%s1166_s26 + $0xc] sm:$0xf] }
  0x13   : > { %966 = vmatpush3.bf16.msra.mxu1 %v352_v5  ;;  %v496_v14 = vsel %vm350_vm1, %v929_v13, 0 }
  0x14   : > { %971 = vmatprep.subr.bf16.mxu1 %v1104_v0 }
  0x15   : > { %996 = vmatpush3.bf16.msra.mxu0 %v1047_v9 }
  0x16   : > { %968 = vmatmul.mubr.msk.bf16.vlgmr.msra.gmra.mrb[0].mxu1 %vm346_vm2, %v1043_v6  ;;  %997 = vmatprep.subr.bf16.mxu0 %v1048_v11 }
  0x17   : > { %972 = vmatpush3.bf16.msra.mxu1 %v400_v8  ;;  %973 = vmatprep.mubr.msk.bf16.mxu1 %vm1105_vm0, %v1104_v0 }
  0x18   : > { %977 = vmatprep.subr.bf16.mxu1 %v1104_v0 }
  0x19   : > { %998 = vmatpush3.bf16.msra.mxu0 %v1048_v11 }
  0x1a   : > { %999 = vmatprep.subr.bf16.mxu0 %v1049_v15 }
  0x1d   : > { %1000 = vmatpush3.bf16.msra.mxu0 %v1049_v15 }
  0x1e   : > { %974 = vmatmul.mubr.msk.bf16.vlgmr.msra.gmra.mrb[4].mxu1 %vm346_vm2, %v1043_v6  ;;  %1001 = vmatprep.subr.bf16.mxu0 %v1050_v16 }
  0x1f   : > { %978 = vmatpush3.bf16.msra.mxu1 %v448_v12  ;;  %979 = vmatprep.mubr.msk.bf16.mxu1 %vm1105_vm0, %v1104_v0 }
  0x20   : > { %983 = vmatprep.subr.bf16.mxu1 %v1104_v0 }
  0x21   : > { %1002 = vmatpush3.bf16.msra.mxu0 %v1050_v16 }
  0x22   : > { %1003 = vmatprep.subr.bf16.mxu0 %v1051_v17 }
  0x25   : > { %1004 = vmatpush3.bf16.msra.mxu0 %v1051_v17 }
  0x26   : > { %980 = vmatmul.mubr.msk.bf16.vlgmr.msra.gmra.mrb[8].mxu1 %vm346_vm2, %v1043_v6 }
  0x27   : > { %984 = vmatpush3.bf16.msra.mxu1 %v496_v14  ;;  %985 = vmatprep.mubr.msk.bf16.mxu1 %vm1105_vm0, %v1104_v0 }
  0x2e   : > { %986 = vmatmul.mubr.msk.bf16.vlgmr.msra.gmra.mrb[12].mxu1 %vm346_vm2, %v1043_v6 }
  0xe9   : > { %v388_v18 = vpop.f32.mrb[0].mxu1 }
  0xea   : > { %v969_v19 = vpop.f32.mrb[1].mxu1 }
  0xeb   : > { %v391_v20 = vpop.f32.mrb[2].mxu1 }
  0xec   : > { %v970_v21 = vpop.f32.mrb[3].mxu1  ;;  %v395_v22 = vpack.c.bf16 %v391_v20, %v388_v18 }
  0xee   : > { %1005 = vmatprep.mubr.bf16.mxu0 %v395_v22 }
  0xf1   : > { %v436_v23 = vpop.f32.mrb[4].mxu1 }
  0xf2   : > { %v975_v24 = vpop.f32.mrb[5].mxu1 }
  0xf3   : > { %v439_v25 = vpop.f32.mrb[6].mxu1 }
  0xf4   : > { %v443_v26 = vpack.c.bf16 %v439_v25, %v436_v23  ;;  %v976_v27 = vpop.f32.mrb[7].mxu1 }
  0xf6   : > { %1006 = vmatmul.mubr.bf16.vlgmr.msra.gmra.mrb[0].mxu0 %v443_v26 }
  0xf9   : > { %v484_v28 = vpop.f32.mrb[8].mxu1 }
  0xfa   : > { %v981_v29 = vpop.f32.mrb[9].mxu1 }
  0xfb   : > { %v487_v30 = vpop.f32.mrb[10].mxu1 }
  0xfc   : > { %v491_v31 = vpack.c.bf16 %v487_v30, %v484_v28  ;;  %v982_v32 = vpop.f32.mrb[11].mxu1 }
  0xfe   : > { %1009 = vmatprep.mubr.bf16.mxu0 %v491_v31 }
 0x101   : > { %v532_v33 = vpop.f32.mrb[12].mxu1 }
 0x102   : > { %v987_v34 = vpop.f32.mrb[13].mxu1 }
 0x103   : > { %v535_v35 = vpop.f32.mrb[14].mxu1 }
 0x104   : > { %v539_v36 = vpack.c.bf16 %v535_v35, %v532_v33  ;;  %v988_v37 = vpop.f32.mrb[15].mxu1 }
 0x106   : > { %1010 = vmatmul.mubr.bf16.gmra.mrb[4].mxu0 %v539_v36 }
 0x1c9   : > { %v1007_v38 = vpop.f32.mrb[0].mxu0 }
 0x1ca   : > { %677 = vst.msk [vmem:[#allocation3 + $0x10] sm:$0xff] %vm674_vm3, %v1007_v38  ;;  %v643_v39 = vpop.f32.mrb[1].mxu0 }
 0x1cb   : > { %675 = vst.msk [vmem:[#allocation3] sm:$0xff] %vm674_vm3, %v643_v39  ;;  %v1008_v40 = vpop.f32.mrb[2].mxu0  ;;  %v336_v39 = vld [vmem:[%s299_s21] sm:$0xff] }
 0x1cc   : > { %678 = vst.msk [vmem:[#allocation3 + $0x18] sm:$0xff] %vm674_vm3, %v1008_v40  ;;  %v646_v41 = vpop.f32.mrb[3].mxu0  ;;  %vm685_vm4 = vcmp.eq.s32.totalorder %v336_v39, 0  ;;  %vm707_vm5 = vcmp.eq.s32.totalorder %v336_v39, 1  ;;  %vm733_vm8 = vcmp.eq.s32.totalorder %v336_v39, 2  ;;  %vm759_vm10 = vcmp.eq.s32.totalorder %v336_v39, 3 }
 0x1cd   : > { %676 = vst.msk [vmem:[#allocation3 + $0x8] sm:$0xff] %vm674_vm3, %v646_v41  ;;  %vm338_vm12 = vcmp.ne.s32.totalorder %v336_v39, 4294967295 }
 0x1d1   : > { %v1216_v43 = vld [vmem:[#allocation3 + $0x10] sm:$0xff] }
 0x1d2   : > { %v1214_v42 = vld [vmem:[#allocation3] sm:$0xff] }
 0x1d3   : > { %v1220_v45 = vld [vmem:[#allocation3 + $0x18] sm:$0xff]  ;;  %v691_v46 = vmax.f32 %v1214_v42, %v1216_v43 }
 0x1d4   : > { %v1218_v44 = vld [vmem:[#allocation3 + $0x8] sm:$0xff] }
 0x1d5   : > { %v692_v49 = vmax.f32 %v1218_v44, %v1220_v45  ;;  %v693_v52 = vsub.f32 %v1214_v42, %v691_v46  ;;  %v699_v53 = vsub.f32 %v1216_v43, %v691_v46 }
 0x1d7   : > { %v694_v54 = vsub.f32 %v1218_v44, %v692_v49  ;;  %v700_v55 = vsub.f32 %v1220_v45, %v692_v49  ;;  %v695_v56 = vmul.f32 1.442695, %v693_v52  ;;  %v701_v57 = vmul.f32 1.442695, %v699_v53 }
 0x1d9   : > { %v1011_v47 = vpop.f32.mrb[4].mxu0  ;;  %v697_v58 = vmul.f32 1.442695, %v694_v54  ;;  %v703_v60 = vmul.f32 1.442695, %v700_v55  ;;  %1052 = vpow2.f32 %v695_v56 }
 0x1da   : > { %681 = vst.msk [vmem:[#allocation3 + $0x30] sm:$0xff] %vm674_vm3, %v1011_v47  ;;  %v659_v48 = vpop.f32.mrb[5].mxu0  ;;  %1054 = vpow2.f32 %v701_v57  ;;  %v337_v47 = vld [vmem:[%s299_s21 + $0x8] sm:$0xff] }
 0x1db   : > { %679 = vst.msk [vmem:[#allocation3 + $0x20] sm:$0xff] %vm674_vm3, %v659_v48  ;;  %v1012_v50 = vpop.f32.mrb[6].mxu0  ;;  %1056 = vpow2.f32 %v697_v58  ;;  %vm686_vm6 = vcmp.eq.s32.totalorder %v337_v47, 0  ;;  %vm708_vm7 = vcmp.eq.s32.totalorder %v337_v47, 1  ;;  %vm734_vm9 = vcmp.eq.s32.totalorder %v337_v47, 2 }
 0x1dc   : > { %682 = vst.msk [vmem:[#allocation3 + $0x38] sm:$0xff] %vm674_vm3, %v1012_v50  ;;  %v662_v51 = vpop.f32.mrb[7].mxu0  ;;  %1058 = vpow2.f32 %v703_v60  ;;  %v709_v50 = vsel %vm707_vm5, %v1216_v43, 0.0  ;;  %v710_v52 = vsel %vm708_vm7, %v1220_v45, 0.0  ;;  %vm760_vm11 = vcmp.eq.s32.totalorder %v337_v47, 3 }
 0x1dd   : > { %680 = vst.msk [vmem:[#allocation3 + $0x28] sm:$0xff] %vm674_vm3, %v662_v51  ;;  %v688_v51 = vsel %vm686_vm6, %v1218_v44, 0.0  ;;  %vm339_vm13 = vcmp.ne.s32.totalorder %v337_v47, 4294967295 }
 0x1de   : > { %v712_v56 = vadd.f32 %v710_v52, %v688_v51 }
 0x1e1   : > { %v1241_v3 = vld [vmem:[#allocation3 + $0x30] sm:$0xff] }
 0x1e2   : > { %v1234_v59 = vld [vmem:[#allocation3 + $0x20] sm:$0xff]  ;;  %v761_v43 = vsel %vm759_vm10, %v1241_v3, 0.0 }
 0x1e3   : > { %v715_v61 = vmax.f32 %v691_v46, %v1234_v59  ;;  %v1247_v8 = vld [vmem:[#allocation3 + $0x38] sm:$0xff]  ;;  %v1053_v21 = vpop.eup %1052  ;;  %v735_v53 = vsel %vm733_vm8, %v1234_v59, 0.0 }
 0x1e4   : > { %v1237_v62 = vld [vmem:[#allocation3 + $0x28] sm:$0xff]  ;;  %v1055_v22 = vpop.eup %1054  ;;  %v762_v45 = vsel %vm760_vm11, %v1247_v8, 0.0 }
 0x1e5   : > { %v716_v63 = vmax.f32 %v692_v49, %v1237_v62  ;;  %v717_v1 = vsub.f32 %v691_v46, %v715_v61  ;;  %v725_v2 = vsub.f32 %v1234_v59, %v715_v61  ;;  %v1244_v4 = vmax.f32 %v715_v61, %v1241_v3  ;;  %v1057_v23 = vpop.eup %1056 }
 0x1e6   : > { %v1059_v24 = vpop.eup %1058  ;;  %v705_v25 = vadd.f32 %v1055_v22, %v1053_v21  ;;  %v736_v55 = vsel %vm734_vm9, %v1237_v62, 0.0 }
 0x1e7   : > { %v718_v5 = vsub.f32 %v692_v49, %v716_v63  ;;  %v719_v6 = vmul.f32 1.442695, %v717_v1  ;;  %v726_v7 = vsub.f32 %v1237_v62, %v716_v63  ;;  %v727_v9 = vmul.f32 1.442695, %v725_v2 }
 0x1e8   : > { %v1250_v10 = vmax.f32 %v716_v63, %v1247_v8  ;;  %v743_v11 = vsub.f32 %v715_v61, %v1244_v4  ;;  %v751_v14 = vsub.f32 %v1241_v3, %v1244_v4  ;;  %v706_v28 = vadd.f32 %v1059_v24, %v1057_v23 }
 0x1e9   : > { %1060 = vpow2.f32 %v719_v6  ;;  %v721_v12 = vmul.f32 1.442695, %v718_v5  ;;  %v729_v13 = vmul.f32 1.442695, %v726_v7  ;;  %v687_v49 = vsel %vm685_vm4, %v1214_v42, 0.0 }
 0x1ea   : > { %1062 = vpow2.f32 %v727_v9  ;;  %v744_v15 = vsub.f32 %v716_v63, %v1250_v10  ;;  %v745_v16 = vmul.f32 1.442695, %v743_v11  ;;  %v752_v17 = vsub.f32 %v1247_v8, %v1250_v10 }
 0x1eb   : > { %1064 = vpow2.f32 %v721_v12  ;;  %v753_v18 = vmul.f32 1.442695, %v751_v14  ;;  %v711_v54 = vadd.f32 %v709_v50, %v687_v49  ;;  %v738_v60 = vadd.f32 %v736_v55, %v712_v56 }
 0x1ec   : > { %1066 = vpow2.f32 %v729_v13  ;;  %v747_v19 = vmul.f32 1.442695, %v744_v15  ;;  %v755_v20 = vmul.f32 1.442695, %v752_v17  ;;  %v939_v7 = vsel %vm338_vm12, 1.0, %v1104_v0 }
 0x1ed   : > { %1068 = vpow2.f32 %v745_v16  ;;  %v737_v57 = vadd.f32 %v735_v53, %v711_v54  ;;  %v764_v59 = vadd.f32 %v762_v45, %v738_v60  ;;  %v940_v9 = vsel %vm339_vm13, 1.0, %v1104_v0 }
 0x1ee   : > { %1070 = vpow2.f32 %v747_v19  ;;  %v791_v12 = vsel %vm674_vm3, %v939_v7, 0.0  ;;  %v792_v8 = vsel %vm674_vm3, %v940_v9, 0.0 }
 0x1ef   : > { %1072 = vpow2.f32 %v753_v18  ;;  %v763_v63 = vadd.f32 %v761_v43, %v737_v57 }
 0x1f0   : > { %1074 = vpow2.f32 %v755_v20 }
 0x1f3   : > { %v1061_v26 = vpop.eup %1060 }
 0x1f4   : > { %v1063_v27 = vpop.eup %1062  ;;  %v723_v29 = vmul.f32 %v1061_v26, %v705_v25 }
 0x1f5   : > { %v1065_v30 = vpop.eup %1064 }
 0x1f6   : > { %v1067_v31 = vpop.eup %1066  ;;  %v724_v32 = vmul.f32 %v1065_v30, %v706_v28  ;;  %v731_v33 = vadd.f32 %v1063_v27, %v723_v29  ;;  %v803_v28 = vlaneseq }
 0x1f7   : > { %v1069_v34 = vpop.eup %1068 }
 0x1f8   : > { %v1071_v35 = vpop.eup %1070  ;;  %v732_v36 = vadd.f32 %v1067_v31, %v724_v32  ;;  %v749_v37 = vmul.f32 %v1069_v34, %v731_v33  ;;  %v804_v0 = vand.u32 127, %v803_v28  ;;  %v805_v32 = vld [vmem:[%s1283_s24] sm:$0x1] }
 0x1f9   : > { %v1073_v38 = vpop.eup %1072 }
 0x1fa   : > { %v750_v40 = vmul.f32 %v1071_v35, %v732_v36  ;;  %v757_v41 = vadd.f32 %v1073_v38, %v749_v37  ;;  %v1075_v46 = vpop.eup %1074  ;;  %vm806_vm14 = vcmp.eq.s32.totalorder %v804_v0, 0  ;;  %vm809_vm15 = vcmp.eq.s32.totalorder %v804_v0, 1 }
 0x1fc   : > { %v758_v48 = vadd.f32 %v1075_v46, %v750_v40  ;;  %1076 = vlog2.f32 %v757_v41 }
 0x1fe   : > { %1078 = vlog2.f32 %v758_v48 }
 0x206   : > { %v1077_v58 = vpop.eup %1076 }
 0x207   : > { %v766_v61 = vmul.f32 0.6931472, %v1077_v58 }
 0x208   : > { %v1079_v42 = vpop.eup %1078 }
 0x209   : > { %v768_v1 = vmul.f32 0.6931472, %v1079_v42  ;;  %v769_v44 = vadd.f32 %v766_v61, %v1244_v4 }
 0x20b   : > { %v770_v62 = vadd.f32 %v768_v1, %v1250_v10  ;;  %v771_v2 = vsub.f32 %v769_v44, %v763_v63  ;;  %v793_v10 = vadd.f32 %v792_v8, %v791_v12 }
 0x20d   : > { %v772_v5 = vsub.f32 %v770_v62, %v764_v59  ;;  %v773_v6 = vsel %vm338_vm12, %v771_v2, 0.0 }
 0x20e   : > { %v775_v11 = vsel %vm674_vm3, %v773_v6, 0.0 }
 0x20f   : > { %v774_v3 = vsel %vm339_vm13, %v772_v5, 0.0 }
 0x210   : > { %v776_v4 = vsel %vm674_vm3, %v774_v3, 0.0 }
 0x211   : > { %v777_v13 = vadd.f32 %v776_v4, %v775_v11 }
 0x213   : > { %778 = vadd.xlane.f32.xlu0 %v777_v13 }
 0x217   : > { %794 = vadd.xlane.f32.xlu0 %v793_v10 }
 0x2a0   : > { %v779_v14 = vpop.xlane.xlu0 %778 }
 0x2a1   : > { %v780_v15 = vrot.slane %v779_v14, 4 }
 0x2a3   : > { %v781_v16 = vadd.f32 %v780_v15, %v779_v14 }
 0x2a4   : > { %v795_v17 = vpop.xlane.xlu0 %794 }
 0x2a5   : > { %v782_v18 = vrot.slane %v781_v16, 2  ;;  %v796_v19 = vrot.slane %v795_v17, 4 }
 0x2a7   : > { %v797_v20 = vadd.f32 %v796_v19, %v795_v17  ;;  %v783_v21 = vadd.f32 %v782_v18, %v781_v16 }
 0x2a9   : > { %v798_v22 = vrot.slane %v797_v20, 2  ;;  %v784_v23 = vrot.slane %v783_v21, 1 }
 0x2ab   : > { %v799_v24 = vadd.f32 %v798_v22, %v797_v20  ;;  %v785_v25 = vadd.f32 %v784_v23, %v783_v21 }
 0x2ad   : > { %1013 = vpush %v785_v25  ;;  %v800_v26 = vrot.slane %v799_v24, 1 }
 0x2af   : > { %v801_v27 = vadd.f32 %v800_v26, %v799_v24 }
 0x2b1   : > { %1015 = vpush %v801_v27 }
 0x2de   : > { %s1014_s15 = spop %1013 }
 0x2df   : > { %v807_v29 = vstv %s1014_s15 }
 0x2e0   : > { %v808_v31 = vsel %vm806_vm14, %v807_v29, 0.0 }
 0x2e2   : > { %s1016_s25 = spop %1015 }
 0x2e3   : > { %v810_v30 = vstv %s1016_s25 }
 0x2e4   : > { %v811_v33 = vsel %vm809_vm15, %v810_v30, 0.0 }
 0x2e5   : > { %v812_v34 = vadd.f32 %v811_v33, %v808_v31 }
 0x2e7   : > { %v813_v35 = vadd.f32 %v812_v34, %v805_v32 }
 0x2e9   : > { %814 = vst [vmem:[%s1283_s24] sm:$0x1] %v813_v35 }
 0x2ea PF: > { %s14_s17 = sadd.s32 1, %s1102_s17   ;;  %s1303_s15 = smov %s1098_s16 }
 0x2eb   : > { %p11_p5 = scmp.ge.s32.totalorder %s14_s17, 4   ;;  %s1304_s16 = smov %s1306_s18 }
 0x2ed   :  { %13 = sbr.rel (!%p11_p5) target bundleno = 2 (0x2), region = 83 }

// kernel: pixel_prototype_ce_loss.3
= control target key start
LH: loop header
LB: loop body
LE: loop exit
PB: predicated region body
PF: predicated region fallthrough
CT: control target
= control target key end

     0   :  { %vm536_vm0 = vcmask 130048   ;;  %vm2139_vm12 = vcmask 7168   ;;  %s6172_s0 = inlined_call_operand.vmem [shape: f32[512,16], index: 0, kind: input, shape index: {}]   ;;  %s6173_s1 = inlined_call_operand.vmem [shape: s32[512,1], index: 1, kind: input, shape index: {}]   ;;  %s6174_s2 = inlined_call_operand.vmem [shape: f32[1,128], index: 2, kind: output, shape index: {}]  }
   0x1   :  { %v3146_v0 = vld [vmem:[%s6172_s0] sm:$0xff]  ;;  %v3151_v1 = vld [vmem:[%s6172_s0 + $0x10] sm:$0xff]  ;;  %v3156_v2 = vld [vmem:[%s6172_s0 + $0x8] sm:$0xff] }
   0x2   :  { %v537_v3 = vsel %vm536_vm0, %v3146_v0, -inf  ;;  %v543_v4 = vsel %vm536_vm0, %v3151_v1, -inf  ;;  %v3165_v5 = vld [vmem:[%s6172_s0 + $0x18] sm:$0xff]  ;;  %v540_v6 = vsel %vm536_vm0, %v3156_v2, -inf  ;;  %v3174_v8 = vld [vmem:[%s6172_s0 + $0x20] sm:$0xff]  ;;  %v3179_v9 = vld [vmem:[%s6172_s0 + $0x28] sm:$0xff] }
   0x3   :  { %538 = vmax.xlane.f32.xlu0 %v537_v3  ;;  %544 = vmax.xlane.f32.xlu1 %v543_v4  ;;  %v546_v7 = vsel %vm536_vm0, %v3165_v5, -inf  ;;  %v549_v10 = vsel %vm536_vm0, %v3174_v8, -inf  ;;  %v552_v11 = vsel %vm536_vm0, %v3179_v9, -inf  ;;  %v3188_v12 = vld [vmem:[%s6172_s0 + $0x30] sm:$0xff]  ;;  %v3193_v13 = vld [vmem:[%s6172_s0 + $0x38] sm:$0xff]  ;;  %v3202_v16 = vld [vmem:[%s6172_s0 + $0x40] sm:$0xff] }
   0x4   :  { %v555_v14 = vsel %vm536_vm0, %v3188_v12, -inf  ;;  %v558_v15 = vsel %vm536_vm0, %v3193_v13, -inf  ;;  %v3207_v17 = vld [vmem:[%s6172_s0 + $0x48] sm:$0xff]  ;;  %v561_v18 = vsel %vm536_vm0, %v3202_v16, -inf  ;;  %v3216_v20 = vld [vmem:[%s6172_s0 + $0x50] sm:$0xff]  ;;  %v3221_v21 = vld [vmem:[%s6172_s0 + $0x58] sm:$0xff] }
   0x5   :  { %v564_v19 = vsel %vm536_vm0, %v3207_v17, -inf  ;;  %v567_v22 = vsel %vm536_vm0, %v3216_v20, -inf  ;;  %v570_v23 = vsel %vm536_vm0, %v3221_v21, -inf  ;;  %v3230_v24 = vld [vmem:[%s6172_s0 + $0x60] sm:$0xff]  ;;  %v3235_v25 = vld [vmem:[%s6172_s0 + $0x68] sm:$0xff]  ;;  %v3244_v28 = vld [vmem:[%s6172_s0 + $0x70] sm:$0xff] }
   0x6   :  { %v573_v26 = vsel %vm536_vm0, %v3230_v24, -inf  ;;  %v576_v27 = vsel %vm536_vm0, %v3235_v25, -inf  ;;  %v3249_v29 = vld [vmem:[%s6172_s0 + $0x78] sm:$0xff]  ;;  %v579_v30 = vsel %vm536_vm0, %v3244_v28, -inf  ;;  %v3258_v32 = vld [vmem:[%s6172_s0 + $0x80] sm:$0xff]  ;;  %v3263_v33 = vld [vmem:[%s6172_s0 + $0x88] sm:$0xff] }
   0x7   :  { %541 = vmax.xlane.f32.xlu0 %v540_v6  ;;  %547 = vmax.xlane.f32.xlu1 %v546_v7  ;;  %v582_v31 = vsel %vm536_vm0, %v3249_v29, -inf  ;;  %v585_v34 = vsel %vm536_vm0, %v3258_v32, -inf  ;;  %v588_v35 = vsel %vm536_vm0, %v3263_v33, -inf  ;;  %v3272_v36 = vld [vmem:[%s6172_s0 + $0x90] sm:$0xff]  ;;  %v3277_v37 = vld [vmem:[%s6172_s0 + $0x98] sm:$0xff]  ;;  %v3286_v40 = vld [vmem:[%s6172_s0 + $0xa0] sm:$0xff] }
   0x8   :  { %v591_v38 = vsel %vm536_vm0, %v3272_v36, -inf  ;;  %v594_v39 = vsel %vm536_vm0, %v3277_v37, -inf  ;;  %v3291_v41 = vld [vmem:[%s6172_s0 + $0xa8] sm:$0xff]  ;;  %v597_v42 = vsel %vm536_vm0, %v3286_v40, -inf  ;;  %v3300_v44 = vld [vmem:[%s6172_s0 + $0xb0] sm:$0xff]  ;;  %v3305_v45 = vld [vmem:[%s6172_s0 + $0xb8] sm:$0xff] }
   0x9   :  { %v600_v43 = vsel %vm536_vm0, %v3291_v41, -inf  ;;  %v603_v46 = vsel %vm536_vm0, %v3300_v44, -inf  ;;  %v606_v47 = vsel %vm536_vm0, %v3305_v45, -inf  ;;  %v3314_v48 = vld [vmem:[%s6172_s0 + $0xc0] sm:$0xff]  ;;  %v3319_v49 = vld [vmem:[%s6172_s0 + $0xc8] sm:$0xff]  ;;  %v3328_v52 = vld [vmem:[%s6172_s0 + $0xd0] sm:$0xff] }
   0xa   :  { %v609_v50 = vsel %vm536_vm0, %v3314_v48, -inf  ;;  %v612_v51 = vsel %vm536_vm0, %v3319_v49, -inf  ;;  %v3333_v53 = vld [vmem:[%s6172_s0 + $0xd8] sm:$0xff]  ;;  %v615_v54 = vsel %vm536_vm0, %v3328_v52, -inf  ;;  %v3342_v56 = vld [vmem:[%s6172_s0 + $0xe0] sm:$0xff]  ;;  %v3347_v57 = vld [vmem:[%s6172_s0 + $0xe8] sm:$0xff] }
   0xb   :  { %550 = vmax.xlane.f32.xlu0 %v549_v10  ;;  %553 = vmax.xlane.f32.xlu1 %v552_v11  ;;  %v618_v55 = vsel %vm536_vm0, %v3333_v53, -inf  ;;  %v621_v58 = vsel %vm536_vm0, %v3342_v56, -inf  ;;  %v624_v59 = vsel %vm536_vm0, %v3347_v57, -inf  ;;  %v3356_v60 = vld [vmem:[%s6172_s0 + $0xf0] sm:$0xff]  ;;  %v3361_v61 = vld [vmem:[%s6172_s0 + $0xf8] sm:$0xff]  ;;  %v3370_v3 = vld [vmem:[%s6172_s0 + $0x100] sm:$0xff] }
   0xc   :  { %v627_v62 = vsel %vm536_vm0, %v3356_v60, -inf  ;;  %v630_v63 = vsel %vm536_vm0, %v3361_v61, -inf  ;;  %v3375_v4 = vld [vmem:[%s6172_s0 + $0x108] sm:$0xff]  ;;  %v633_v6 = vsel %vm536_vm0, %v3370_v3, -inf  ;;  %v3384_v10 = vld [vmem:[%s6172_s0 + $0x110] sm:$0xff]  ;;  %v3389_v11 = vld [vmem:[%s6172_s0 + $0x118] sm:$0xff] }
   0xd   :  { %v636_v7 = vsel %vm536_vm0, %v3375_v4, -inf }
   0xf   :  { %556 = vmax.xlane.f32.xlu0 %v555_v14  ;;  %559 = vmax.xlane.f32.xlu1 %v558_v15  ;;  %v639_v14 = vsel %vm536_vm0, %v3384_v10, -inf  ;;  %v642_v15 = vsel %vm536_vm0, %v3389_v11, -inf }
  0x13   :  { %562 = vmax.xlane.f32.xlu0 %v561_v18  ;;  %565 = vmax.xlane.f32.xlu1 %v564_v19  ;;  %v3398_v18 = vld [vmem:[%s6172_s0 + $0x120] sm:$0xff]  ;;  %v3403_v19 = vld [vmem:[%s6172_s0 + $0x128] sm:$0xff] }
  0x17   :  { %568 = vmax.xlane.f32.xlu0 %v567_v22  ;;  %571 = vmax.xlane.f32.xlu1 %v570_v23  ;;  %v645_v22 = vsel %vm536_vm0, %v3398_v18, -inf  ;;  %v648_v23 = vsel %vm536_vm0, %v3403_v19, -inf }
  0x1b   :  { %574 = vmax.xlane.f32.xlu0 %v573_v26  ;;  %577 = vmax.xlane.f32.xlu1 %v576_v27  ;;  %v3412_v26 = vld [vmem:[%s6172_s0 + $0x130] sm:$0xff]  ;;  %v3417_v27 = vld [vmem:[%s6172_s0 + $0x138] sm:$0xff] }
  0x1f   :  { %580 = vmax.xlane.f32.xlu0 %v579_v30  ;;  %583 = vmax.xlane.f32.xlu1 %v582_v31  ;;  %v651_v30 = vsel %vm536_vm0, %v3412_v26, -inf  ;;  %v654_v31 = vsel %vm536_vm0, %v3417_v27, -inf }
  0x23   :  { %586 = vmax.xlane.f32.xlu0 %v585_v34  ;;  %589 = vmax.xlane.f32.xlu1 %v588_v35  ;;  %v3426_v34 = vld [vmem:[%s6172_s0 + $0x140] sm:$0xff]  ;;  %v3431_v35 = vld [vmem:[%s6172_s0 + $0x148] sm:$0xff] }
  0x27   :  { %592 = vmax.xlane.f32.xlu0 %v591_v38  ;;  %595 = vmax.xlane.f32.xlu1 %v594_v39  ;;  %v657_v38 = vsel %vm536_vm0, %v3426_v34, -inf  ;;  %v660_v39 = vsel %vm536_vm0, %v3431_v35, -inf }
  0x2b   :  { %598 = vmax.xlane.f32.xlu0 %v597_v42  ;;  %601 = vmax.xlane.f32.xlu1 %v600_v43  ;;  %v3440_v42 = vld [vmem:[%s6172_s0 + $0x150] sm:$0xff]  ;;  %v3445_v43 = vld [vmem:[%s6172_s0 + $0x158] sm:$0xff] }
  0x2f   :  { %604 = vmax.xlane.f32.xlu0 %v603_v46  ;;  %607 = vmax.xlane.f32.xlu1 %v606_v47  ;;  %v663_v46 = vsel %vm536_vm0, %v3440_v42, -inf  ;;  %v666_v47 = vsel %vm536_vm0, %v3445_v43, -inf }
  0x33   :  { %610 = vmax.xlane.f32.xlu0 %v609_v50  ;;  %613 = vmax.xlane.f32.xlu1 %v612_v51  ;;  %v3454_v50 = vld [vmem:[%s6172_s0 + $0x160] sm:$0xff]  ;;  %v3459_v51 = vld [vmem:[%s6172_s0 + $0x168] sm:$0xff] }
  0x37   :  { %616 = vmax.xlane.f32.xlu0 %v615_v54  ;;  %619 = vmax.xlane.f32.xlu1 %v618_v55  ;;  %v669_v54 = vsel %vm536_vm0, %v3454_v50, -inf  ;;  %v672_v55 = vsel %vm536_vm0, %v3459_v51, -inf }
  0x3b   :  { %622 = vmax.xlane.f32.xlu0 %v621_v58  ;;  %625 = vmax.xlane.f32.xlu1 %v624_v59  ;;  %v3468_v58 = vld [vmem:[%s6172_s0 + $0x170] sm:$0xff]  ;;  %v3473_v59 = vld [vmem:[%s6172_s0 + $0x178] sm:$0xff] }
  0x3f   :  { %628 = vmax.xlane.f32.xlu0 %v627_v62  ;;  %631 = vmax.xlane.f32.xlu1 %v630_v63  ;;  %v675_v62 = vsel %vm536_vm0, %v3468_v58, -inf  ;;  %v678_v63 = vsel %vm536_vm0, %v3473_v59, -inf }
  0x43   :  { %634 = vmax.xlane.f32.xlu0 %v633_v6  ;;  %637 = vmax.xlane.f32.xlu1 %v636_v7  ;;  %v3482_v6 = vld [vmem:[%s6172_s0 + $0x180] sm:$0xff]  ;;  %v3487_v7 = vld [vmem:[%s6172_s0 + $0x188] sm:$0xff] }
  0x47   :  { %640 = vmax.xlane.f32.xlu0 %v639_v14  ;;  %643 = vmax.xlane.f32.xlu1 %v642_v15  ;;  %v681_v14 = vsel %vm536_vm0, %v3482_v6, -inf  ;;  %v684_v15 = vsel %vm536_vm0, %v3487_v7, -inf }
  0x4b   :  { %646 = vmax.xlane.f32.xlu0 %v645_v22  ;;  %649 = vmax.xlane.f32.xlu1 %v648_v23  ;;  %v3496_v22 = vld [vmem:[%s6172_s0 + $0x190] sm:$0xff]  ;;  %v3501_v23 = vld [vmem:[%s6172_s0 + $0x198] sm:$0xff] }
  0x4f   :  { %652 = vmax.xlane.f32.xlu0 %v651_v30  ;;  %655 = vmax.xlane.f32.xlu1 %v654_v31  ;;  %v687_v30 = vsel %vm536_vm0, %v3496_v22, -inf  ;;  %v690_v31 = vsel %vm536_vm0, %v3501_v23, -inf }
  0x53   :  { %658 = vmax.xlane.f32.xlu0 %v657_v38  ;;  %661 = vmax.xlane.f32.xlu1 %v660_v39  ;;  %v3510_v38 = vld [vmem:[%s6172_s0 + $0x1a0] sm:$0xff]  ;;  %v3515_v39 = vld [vmem:[%s6172_s0 + $0x1a8] sm:$0xff] }
  0x54   :  { %6408 = vst [vmem:[#allocation2_spill] sm:$0xff] %v3510_v38  ;;  %6409 = vst [vmem:[#allocation3_spill] sm:$0xff] %v3515_v39 }
  0x57   :  { %664 = vmax.xlane.f32.xlu0 %v663_v46  ;;  %667 = vmax.xlane.f32.xlu1 %v666_v47  ;;  %v693_v46 = vsel %vm536_vm0, %v3510_v38, -inf  ;;  %v696_v47 = vsel %vm536_vm0, %v3515_v39, -inf }
  0x5b   :  { %670 = vmax.xlane.f32.xlu0 %v669_v54  ;;  %673 = vmax.xlane.f32.xlu1 %v672_v55  ;;  %v3524_v54 = vld [vmem:[%s6172_s0 + $0x1b0] sm:$0xff]  ;;  %v3529_v55 = vld [vmem:[%s6172_s0 + $0x1b8] sm:$0xff] }
  0x5c   :  { %6410 = vst [vmem:[#allocation4_spill] sm:$0xff] %v3524_v54  ;;  %6411 = vst [vmem:[#allocation5_spill] sm:$0xff] %v3529_v55 }
  0x5f   :  { %676 = vmax.xlane.f32.xlu0 %v675_v62  ;;  %679 = vmax.xlane.f32.xlu1 %v678_v63  ;;  %v699_v62 = vsel %vm536_vm0, %v3524_v54, -inf  ;;  %v702_v63 = vsel %vm536_vm0, %v3529_v55, -inf }
  0x63   :  { %682 = vmax.xlane.f32.xlu0 %v681_v14  ;;  %685 = vmax.xlane.f32.xlu1 %v684_v15  ;;  %v3538_v14 = vld [vmem:[%s6172_s0 + $0x1c0] sm:$0xff]  ;;  %v3543_v15 = vld [vmem:[%s6172_s0 + $0x1c8] sm:$0xff] }
  0x64   :  { %6412 = vst [vmem:[#allocation6_spill] sm:$0xff] %v3538_v14  ;;  %6413 = vst [vmem:[#allocation7_spill] sm:$0xff] %v3543_v15 }
  0x67   :  { %688 = vmax.xlane.f32.xlu0 %v687_v30  ;;  %691 = vmax.xlane.f32.xlu1 %v690_v31  ;;  %v705_v30 = vsel %vm536_vm0, %v3538_v14, -inf  ;;  %v708_v31 = vsel %vm536_vm0, %v3543_v15, -inf  ;;  %v3566_v15 = vld [vmem:[%s6172_s0 + $0x1e0] sm:$0xff]  ;;  %v3571_v14 = vld [vmem:[%s6172_s0 + $0x1e8] sm:$0xff] }
  0x68   :  { %6416 = vst [vmem:[#allocation10_spill] sm:$0xff] %v3566_v15  ;;  %6417 = vst [vmem:[#allocation11_spill] sm:$0xff] %v3571_v14 }
  0x6b   :  { %694 = vmax.xlane.f32.xlu0 %v693_v46  ;;  %697 = vmax.xlane.f32.xlu1 %v696_v47  ;;  %v3552_v46 = vld [vmem:[%s6172_s0 + $0x1d0] sm:$0xff]  ;;  %v3557_v47 = vld [vmem:[%s6172_s0 + $0x1d8] sm:$0xff] }
  0x6c   :  { %6414 = vst [vmem:[#allocation8_spill] sm:$0xff] %v3552_v46  ;;  %6415 = vst [vmem:[#allocation9_spill] sm:$0xff] %v3557_v47 }
  0x6f   :  { %700 = vmax.xlane.f32.xlu0 %v699_v62  ;;  %703 = vmax.xlane.f32.xlu1 %v702_v63  ;;  %v711_v62 = vsel %vm536_vm0, %v3552_v46, -inf  ;;  %v714_v63 = vsel %vm536_vm0, %v3557_v47, -inf  ;;  %v3580_v47 = vld [vmem:[%s6172_s0 + $0x1f0] sm:$0xff]  ;;  %v3585_v46 = vld [vmem:[%s6172_s0 + $0x1f8] sm:$0xff] }
  0x70   :  { %6418 = vst [vmem:[#allocation12_spill] sm:$0xff] %v3580_v47  ;;  %6419 = vst [vmem:[#allocation13_spill] sm:$0xff] %v3585_v46 }
  0x73   :  { %706 = vmax.xlane.f32.xlu0 %v705_v30  ;;  %709 = vmax.xlane.f32.xlu1 %v708_v31  ;;  %v717_v30 = vsel %vm536_vm0, %v3566_v15, -inf  ;;  %v720_v31 = vsel %vm536_vm0, %v3571_v14, -inf }
  0x77   :  { %712 = vmax.xlane.f32.xlu0 %v711_v62  ;;  %715 = vmax.xlane.f32.xlu1 %v714_v63  ;;  %v723_v62 = vsel %vm536_vm0, %v3580_v47, -inf  ;;  %v726_v63 = vsel %vm536_vm0, %v3585_v46, -inf }
  0x7b   :  { %718 = vmax.xlane.f32.xlu0 %v717_v30  ;;  %721 = vmax.xlane.f32.xlu1 %v720_v31 }
  0x7f   :  { %724 = vmax.xlane.f32.xlu0 %v723_v62  ;;  %727 = vmax.xlane.f32.xlu1 %v726_v63 }
  0x90   :  { %v3591_v14 = vpop.xlane.xlu0 %538  ;;  %v3593_v15 = vpop.xlane.xlu1 %544 }
  0x91   :  { %6420 = vst [vmem:[#allocation14_spill] sm:$0xff] %v3591_v14  ;;  %v729_v55 = vsub.f32 %v3146_v0, %v3591_v14  ;;  %v731_v54 = vsub.f32 %v3151_v1, %v3593_v15 }
  0x93   :  { %v793_v30 = vmul.f32 1.442695, %v729_v55  ;;  %v797_v31 = vmul.f32 1.442695, %v731_v54 }
  0x94   :  { %v3599_v39 = vpop.xlane.xlu0 %541  ;;  %v3601_v47 = vpop.xlane.xlu1 %547 }
  0x95   :  { %2780 = vpow2.f32 %v793_v30  ;;  %v730_v62 = vsub.f32 %v3156_v2, %v3599_v39  ;;  %v732_v63 = vsub.f32 %v3165_v5, %v3601_v47 }
  0x96   :  { %2782 = vpow2.f32 %v797_v31 }
  0x97   :  { %v795_v46 = vmul.f32 1.442695, %v730_v62  ;;  %v799_v38 = vmul.f32 1.442695, %v732_v63 }
  0x98   :  { %v3607_v0 = vpop.xlane.xlu0 %550  ;;  %v3609_v14 = vpop.xlane.xlu1 %553 }
  0x99   :  { %6421 = vst [vmem:[#allocation15_spill] sm:$0xff] %v3607_v0  ;;  %2784 = vpow2.f32 %v795_v46  ;;  %v733_v1 = vsub.f32 %v3174_v8, %v3607_v0  ;;  %v734_v54 = vsub.f32 %v3179_v9, %v3609_v14 }
  0x9a   :  { %2786 = vpow2.f32 %v799_v38 }
  0x9b   :  { %v801_v55 = vmul.f32 1.442695, %v733_v1  ;;  %v803_v2 = vmul.f32 1.442695, %v734_v54 }
  0x9c   :  { %v3615_v30 = vpop.xlane.xlu0 %556  ;;  %v3617_v5 = vpop.xlane.xlu1 %559 }
  0x9d   :  { %6422 = vst [vmem:[#allocation16_spill] sm:$0xff] %v3615_v30  ;;  %6423 = vst [vmem:[#allocation17_spill] sm:$0xff] %v3617_v5  ;;  %2788 = vpow2.f32 %v801_v55  ;;  %v735_v31 = vsub.f32 %v3188_v12, %v3615_v30  ;;  %v736_v46 = vsub.f32 %v3193_v13, %v3617_v5 }
  0x9e   :  { %2790 = vpow2.f32 %v803_v2 }
  0x9f   :  { %v2781_v62 = vpop.eup %2780  ;;  %v805_v8 = vmul.f32 1.442695, %v735_v31  ;;  %v807_v63 = vmul.f32 1.442695, %v736_v46 }
  0xa0   :  { %v2783_v0 = vpop.eup %2782  ;;  %v3623_v9 = vpop.xlane.xlu0 %562  ;;  %v921_v38 = vsel %vm536_vm0, %v2781_v62, 0.0 }
  0xa1   :  { %v3626_v1 = vpop.xlane.xlu1 %565  ;;  %2792 = vpow2.f32 %v805_v8  ;;  %v737_v54 = vsub.f32 %v3202_v16, %v3623_v9  ;;  %922 = vadd.xlane.f32.xlu0 %v921_v38  ;;  %v927_v13 = vsel %vm536_vm0, %v2783_v0, 0.0 }
  0xa2   :  { %6424 = vst [vmem:[#allocation18_spill] sm:$0xff] %v3626_v1  ;;  %v738_v12 = vsub.f32 %v3207_v17, %v3626_v1  ;;  %2794 = vpow2.f32 %v807_v63  ;;  %v4325_v1 = vld [vmem:[%s6173_s1 + $0x120] sm:$0xff] }
  0xa3   :  { %v2785_v55 = vpop.eup %2784  ;;  %v809_v2 = vmul.f32 1.442695, %v737_v54  ;;  %6576 = vst [vmem:[#allocation146_spill] sm:$0xff] %v4325_v1 }
  0xa4   :  { %v811_v31 = vmul.f32 1.442695, %v738_v12  ;;  %v2787_v46 = vpop.eup %2786  ;;  %v3633_v5 = vpop.xlane.xlu0 %568  ;;  %v924_v62 = vsel %vm536_vm0, %v2785_v55, 0.0 }
  0xa5   :  { %6425 = vst [vmem:[#allocation19_spill] sm:$0xff] %v3633_v5  ;;  %v3636_v30 = vpop.xlane.xlu1 %571  ;;  %2796 = vpow2.f32 %v809_v2  ;;  %v739_v16 = vsub.f32 %v3216_v20, %v3633_v5  ;;  %928 = vadd.xlane.f32.xlu0 %v927_v13  ;;  %925 = vadd.xlane.f32.xlu1 %v924_v62  ;;  %v930_v0 = vsel %vm536_vm0, %v2787_v46, 0.0  ;;  %v4319_v5 = vld [vmem:[%s6173_s1 + $0x118] sm:$0xff] }
  0xa6   :  { %6426 = vst [vmem:[#allocation20_spill] sm:$0xff] %v3636_v30  ;;  %v740_v17 = vsub.f32 %v3221_v21, %v3636_v30  ;;  %2798 = vpow2.f32 %v811_v31  ;;  %v4313_v30 = vld [vmem:[%s6173_s1 + $0x108] sm:$0xff]  ;;  %6575 = vst [vmem:[#allocation145_spill] sm:$0xff] %v4319_v5 }
  0xa7   :  { %v2789_v8 = vpop.eup %2788  ;;  %v813_v63 = vmul.f32 1.442695, %v739_v16  ;;  %6574 = vst [vmem:[#allocation144_spill] sm:$0xff] %v4313_v30 }
  0xa8   :  { %v815_v38 = vmul.f32 1.442695, %v740_v17  ;;  %v2791_v54 = vpop.eup %2790  ;;  %v3643_v12 = vpop.xlane.xlu0 %574  ;;  %v933_v55 = vsel %vm536_vm0, %v2789_v8, 0.0 }
  0xa9   :  { %6427 = vst [vmem:[#allocation21_spill] sm:$0xff] %v3643_v12  ;;  %v3646_v2 = vpop.xlane.xlu1 %577  ;;  %2800 = vpow2.f32 %v813_v63  ;;  %v741_v20 = vsub.f32 %v3230_v24, %v3643_v12  ;;  %931 = vadd.xlane.f32.xlu1 %v930_v0  ;;  %934 = vadd.xlane.f32.xlu0 %v933_v55  ;;  %v936_v13 = vsel %vm536_vm0, %v2791_v54, 0.0  ;;  %v4307_v12 = vld [vmem:[%s6173_s1 + $0xf8] sm:$0xff] }
  0xaa   :  { %6428 = vst [vmem:[#allocation22_spill] sm:$0xff] %v3646_v2  ;;  %v742_v21 = vsub.f32 %v3235_v25, %v3646_v2  ;;  %2802 = vpow2.f32 %v815_v38  ;;  %6573 = vst [vmem:[#allocation143_spill] sm:$0xff] %v4307_v12 }
  0xab   :  { %v2793_v31 = vpop.eup %2792  ;;  %v817_v46 = vmul.f32 1.442695, %v741_v20 }
  0xac   :  { %v819_v62 = vmul.f32 1.442695, %v742_v21  ;;  %v2795_v16 = vpop.eup %2794  ;;  %v3653_v17 = vpop.xlane.xlu0 %580  ;;  %v939_v8 = vsel %vm536_vm0, %v2793_v31, 0.0 }
  0xad   :  { %6429 = vst [vmem:[#allocation23_spill] sm:$0xff] %v3653_v17  ;;  %v3656_v63 = vpop.xlane.xlu1 %583  ;;  %2804 = vpow2.f32 %v817_v46  ;;  %v743_v24 = vsub.f32 %v3244_v28, %v3653_v17  ;;  %937 = vadd.xlane.f32.xlu1 %v936_v13  ;;  %940 = vadd.xlane.f32.xlu0 %v939_v8  ;;  %v942_v0 = vsel %vm536_vm0, %v2795_v16, 0.0  ;;  %v187_v17 = vld [vmem:[%s6173_s1 + $0x130] sm:$0xff] }
  0xae   :  { %6430 = vst [vmem:[#allocation24_spill] sm:$0xff] %v3656_v63  ;;  %v744_v25 = vsub.f32 %v3249_v29, %v3656_v63  ;;  %2806 = vpow2.f32 %v819_v62  ;;  %v3126_v62 = vmov 0   ;;  %v186_v63 = vld [vmem:[%s6173_s1 + $0x128] sm:$0xff] }
  0xaf   :  { %v2797_v38 = vpop.eup %2796  ;;  %v821_v54 = vmul.f32 1.442695, %v743_v24  ;;  %2779 = vset.pattern.permute.xlu1 %v3126_v62  ;;  %2778 = vset.pattern.permute.xlu0 %v3126_v62 }
  0xb0   :  { %v823_v55 = vmul.f32 1.442695, %v744_v25  ;;  %v2799_v20 = vpop.eup %2798  ;;  %v3663_v21 = vpop.xlane.xlu0 %586  ;;  %v945_v31 = vsel %vm536_vm0, %v2797_v38, 0.0 }
  0xb1   :  { %6431 = vst [vmem:[#allocation25_spill] sm:$0xff] %v3663_v21  ;;  %v3666_v46 = vpop.xlane.xlu1 %589  ;;  %2808 = vpow2.f32 %v821_v54  ;;  %v745_v28 = vsub.f32 %v3258_v32, %v3663_v21  ;;  %943 = vadd.xlane.f32.xlu1 %v942_v0  ;;  %946 = vadd.xlane.f32.xlu0 %v945_v31  ;;  %v948_v13 = vsel %vm536_vm0, %v2799_v20, 0.0  ;;  %v4200_v21 = vld [vmem:[%s6173_s1 + $0x110] sm:$0xff] }
  0xb2   :  { %6432 = vst [vmem:[#allocation26_spill] sm:$0xff] %v3666_v46  ;;  %v746_v29 = vsub.f32 %v3263_v33, %v3666_v46  ;;  %2810 = vpow2.f32 %v823_v55  ;;  %v4182_v46 = vld [vmem:[%s6173_s1 + $0xe0] sm:$0xff]  ;;  %6558 = vst [vmem:[#allocation128_spill] sm:$0xff] %v4200_v21 }
  0xb3   :  { %v2801_v16 = vpop.eup %2800  ;;  %v825_v8 = vmul.f32 1.442695, %v745_v28  ;;  %6555 = vst [vmem:[#allocation125_spill] sm:$0xff] %v4182_v46 }
  0xb4   :  { %v827_v24 = vmul.f32 1.442695, %v746_v29  ;;  %v2803_v25 = vpop.eup %2802  ;;  %v3673_v38 = vpop.xlane.xlu0 %592  ;;  %v951_v54 = vsel %vm536_vm0, %v2801_v16, 0.0 }
  0xb5   :  { %6433 = vst [vmem:[#allocation27_spill] sm:$0xff] %v3673_v38  ;;  %v3676_v32 = vpop.xlane.xlu1 %595  ;;  %2812 = vpow2.f32 %v825_v8  ;;  %v747_v33 = vsub.f32 %v3272_v36, %v3673_v38  ;;  %949 = vadd.xlane.f32.xlu1 %v948_v13  ;;  %952 = vadd.xlane.f32.xlu0 %v951_v54  ;;  %v954_v55 = vsel %vm536_vm0, %v2803_v25, 0.0  ;;  %v4176_v38 = vld [vmem:[%s6173_s1 + $0xd0] sm:$0xff] }
  0xb6   :  { %6434 = vst [vmem:[#allocation28_spill] sm:$0xff] %v3676_v32  ;;  %v748_v0 = vsub.f32 %v3277_v37, %v3676_v32  ;;  %2814 = vpow2.f32 %v827_v24  ;;  %6554 = vst [vmem:[#allocation124_spill] sm:$0xff] %v4176_v38 }
  0xb7   :  { %v2805_v20 = vpop.eup %2804  ;;  %v829_v31 = vmul.f32 1.442695, %v747_v33 }
  0xb8   :  { %v831_v28 = vmul.f32 1.442695, %v748_v0  ;;  %v2807_v29 = vpop.eup %2806  ;;  %v3683_v62 = vpop.xlane.xlu0 %598  ;;  %v957_v16 = vsel %vm536_vm0, %v2805_v20, 0.0 }
  0xb9   :  { %6435 = vst [vmem:[#allocation29_spill] sm:$0xff] %v3683_v62  ;;  %v3686_v8 = vpop.xlane.xlu1 %601  ;;  %2816 = vpow2.f32 %v829_v31  ;;  %v749_v36 = vsub.f32 %v3286_v40, %v3683_v62  ;;  %955 = vadd.xlane.f32.xlu1 %v954_v55  ;;  %958 = vadd.xlane.f32.xlu0 %v957_v16  ;;  %v960_v13 = vsel %vm536_vm0, %v2807_v29, 0.0 }
  0xba   :  { %6436 = vst [vmem:[#allocation30_spill] sm:$0xff] %v3686_v8  ;;  %v750_v37 = vsub.f32 %v3291_v41, %v3686_v8  ;;  %2818 = vpow2.f32 %v831_v28 }
  0xbb   :  { %v2809_v24 = vpop.eup %2808  ;;  %v833_v25 = vmul.f32 1.442695, %v749_v36 }
  0xbc   :  { %v835_v54 = vmul.f32 1.442695, %v750_v37  ;;  %v2811_v33 = vpop.eup %2810  ;;  %v3693_v0 = vpop.xlane.xlu0 %604  ;;  %v963_v20 = vsel %vm536_vm0, %v2809_v24, 0.0 }
  0xbd   :  { %6437 = vst [vmem:[#allocation31_spill] sm:$0xff] %v3693_v0  ;;  %v3696_v31 = vpop.xlane.xlu1 %607  ;;  %2820 = vpow2.f32 %v833_v25  ;;  %v751_v40 = vsub.f32 %v3300_v44, %v3693_v0  ;;  %961 = vadd.xlane.f32.xlu1 %v960_v13  ;;  %964 = vadd.xlane.f32.xlu0 %v963_v20  ;;  %v966_v55 = vsel %vm536_vm0, %v2811_v33, 0.0 }
  0xbe   :  { %6438 = vst [vmem:[#allocation32_spill] sm:$0xff] %v3696_v31  ;;  %v752_v41 = vsub.f32 %v3305_v45, %v3696_v31  ;;  %2822 = vpow2.f32 %v835_v54 }
  0xbf   :  { %v2813_v28 = vpop.eup %2812  ;;  %v837_v29 = vmul.f32 1.442695, %v751_v40 }
  0xc0   :  { %v839_v16 = vmul.f32 1.442695, %v752_v41  ;;  %v2815_v36 = vpop.eup %2814  ;;  %v3703_v37 = vpop.xlane.xlu0 %610  ;;  %v969_v24 = vsel %vm536_vm0, %v2813_v28, 0.0 }
  0xc1   :  { %6439 = vst [vmem:[#allocation33_spill] sm:$0xff] %v3703_v37  ;;  %v3706_v25 = vpop.xlane.xlu1 %613  ;;  %2824 = vpow2.f32 %v837_v29  ;;  %v753_v44 = vsub.f32 %v3314_v48, %v3703_v37  ;;  %967 = vadd.xlane.f32.xlu1 %v966_v55  ;;  %970 = vadd.xlane.f32.xlu0 %v969_v24  ;;  %v972_v13 = vsel %vm536_vm0, %v2815_v36, 0.0 }
  0xc2   :  { %6440 = vst [vmem:[#allocation34_spill] sm:$0xff] %v3706_v25  ;;  %v754_v45 = vsub.f32 %v3319_v49, %v3706_v25  ;;  %2826 = vpow2.f32 %v839_v16 }
  0xc3   :  { %v2817_v54 = vpop.eup %2816  ;;  %v841_v33 = vmul.f32 1.442695, %v753_v44 }
  0xc4   :  { %v843_v20 = vmul.f32 1.442695, %v754_v45  ;;  %v2819_v40 = vpop.eup %2818  ;;  %v3713_v41 = vpop.xlane.xlu0 %616  ;;  %v975_v28 = vsel %vm536_vm0, %v2817_v54, 0.0 }
  0xc5   :  { %6441 = vst [vmem:[#allocation35_spill] sm:$0xff] %v3713_v41  ;;  %v3716_v29 = vpop.xlane.xlu1 %619  ;;  %2828 = vpow2.f32 %v841_v33  ;;  %v755_v48 = vsub.f32 %v3328_v52, %v3713_v41  ;;  %973 = vadd.xlane.f32.xlu1 %v972_v13  ;;  %976 = vadd.xlane.f32.xlu0 %v975_v28  ;;  %v978_v55 = vsel %vm536_vm0, %v2819_v40, 0.0 }
  0xc6   :  { %6442 = vst [vmem:[#allocation36_spill] sm:$0xff] %v3716_v29  ;;  %v756_v49 = vsub.f32 %v3333_v53, %v3716_v29  ;;  %2830 = vpow2.f32 %v843_v20 }
  0xc7   :  { %v2821_v16 = vpop.eup %2820  ;;  %v845_v36 = vmul.f32 1.442695, %v755_v48 }
  0xc8   :  { %v847_v24 = vmul.f32 1.442695, %v756_v49  ;;  %v2823_v44 = vpop.eup %2822  ;;  %v3723_v45 = vpop.xlane.xlu0 %622  ;;  %v981_v54 = vsel %vm536_vm0, %v2821_v16, 0.0 }
  0xc9   :  { %6443 = vst [vmem:[#allocation37_spill] sm:$0xff] %v3723_v45  ;;  %v3726_v33 = vpop.xlane.xlu1 %625  ;;  %2832 = vpow2.f32 %v845_v36  ;;  %v757_v52 = vsub.f32 %v3342_v56, %v3723_v45  ;;  %979 = vadd.xlane.f32.xlu1 %v978_v55  ;;  %982 = vadd.xlane.f32.xlu0 %v981_v54  ;;  %v984_v13 = vsel %vm536_vm0, %v2823_v44, 0.0 }
  0xca   :  { %6444 = vst [vmem:[#allocation38_spill] sm:$0xff] %v3726_v33  ;;  %v758_v53 = vsub.f32 %v3347_v57, %v3726_v33  ;;  %2834 = vpow2.f32 %v847_v24 }
  0xcb   :  { %v2825_v20 = vpop.eup %2824  ;;  %v849_v40 = vmul.f32 1.442695, %v757_v52 }
  0xcc   :  { %v851_v28 = vmul.f32 1.442695, %v758_v53  ;;  %v2827_v48 = vpop.eup %2826  ;;  %v3733_v49 = vpop.xlane.xlu0 %628  ;;  %v987_v16 = vsel %vm536_vm0, %v2825_v20, 0.0 }
  0xcd   :  { %6445 = vst [vmem:[#allocation39_spill] sm:$0xff] %v3733_v49  ;;  %v3736_v36 = vpop.xlane.xlu1 %631  ;;  %2836 = vpow2.f32 %v849_v40  ;;  %v759_v56 = vsub.f32 %v3356_v60, %v3733_v49  ;;  %985 = vadd.xlane.f32.xlu1 %v984_v13  ;;  %988 = vadd.xlane.f32.xlu0 %v987_v16  ;;  %v990_v55 = vsel %vm536_vm0, %v2827_v48, 0.0 }
  0xce   :  { %6446 = vst [vmem:[#allocation40_spill] sm:$0xff] %v3736_v36  ;;  %v760_v57 = vsub.f32 %v3361_v61, %v3736_v36  ;;  %2838 = vpow2.f32 %v851_v28 }
  0xcf   :  { %v2829_v24 = vpop.eup %2828  ;;  %v853_v44 = vmul.f32 1.442695, %v759_v56 }
  0xd0   :  { %v855_v54 = vmul.f32 1.442695, %v760_v57  ;;  %v2831_v52 = vpop.eup %2830  ;;  %v3743_v53 = vpop.xlane.xlu0 %634  ;;  %v993_v20 = vsel %vm536_vm0, %v2829_v24, 0.0 }
  0xd1   :  { %6447 = vst [vmem:[#allocation41_spill] sm:$0xff] %v3743_v53  ;;  %v3746_v40 = vpop.xlane.xlu1 %637  ;;  %2840 = vpow2.f32 %v853_v44  ;;  %v761_v60 = vsub.f32 %v3370_v3, %v3743_v53  ;;  %991 = vadd.xlane.f32.xlu1 %v990_v55  ;;  %994 = vadd.xlane.f32.xlu0 %v993_v20  ;;  %v996_v13 = vsel %vm536_vm0, %v2831_v52, 0.0 }
  0xd2   :  { %6448 = vst [vmem:[#allocation42_spill] sm:$0xff] %v3746_v40  ;;  %v762_v61 = vsub.f32 %v3375_v4, %v3746_v40  ;;  %2842 = vpow2.f32 %v855_v54 }
  0xd3   :  { %v2833_v28 = vpop.eup %2832  ;;  %v857_v48 = vmul.f32 1.442695, %v761_v60 }
  0xd4   :  { %v859_v16 = vmul.f32 1.442695, %v762_v61  ;;  %v2835_v56 = vpop.eup %2834  ;;  %v3753_v57 = vpop.xlane.xlu0 %640  ;;  %v999_v24 = vsel %vm536_vm0, %v2833_v28, 0.0 }
  0xd5   :  { %6449 = vst [vmem:[#allocation43_spill] sm:$0xff] %v3753_v57  ;;  %v3756_v44 = vpop.xlane.xlu1 %643  ;;  %2844 = vpow2.f32 %v857_v48  ;;  %v763_v3 = vsub.f32 %v3384_v10, %v3753_v57  ;;  %997 = vadd.xlane.f32.xlu1 %v996_v13  ;;  %1000 = vadd.xlane.f32.xlu0 %v999_v24  ;;  %v1002_v55 = vsel %vm536_vm0, %v2835_v56, 0.0 }
  0xd6   :  { %6450 = vst [vmem:[#allocation44_spill] sm:$0xff] %v3756_v44  ;;  %v764_v4 = vsub.f32 %v3389_v11, %v3756_v44  ;;  %2846 = vpow2.f32 %v859_v16 }
  0xd7   :  { %v2837_v54 = vpop.eup %2836  ;;  %v861_v52 = vmul.f32 1.442695, %v763_v3 }
  0xd8   :  { %v863_v20 = vmul.f32 1.442695, %v764_v4  ;;  %v2839_v60 = vpop.eup %2838  ;;  %v3763_v61 = vpop.xlane.xlu0 %646  ;;  %v1005_v28 = vsel %vm536_vm0, %v2837_v54, 0.0 }
  0xd9   :  { %6451 = vst [vmem:[#allocation45_spill] sm:$0xff] %v3763_v61  ;;  %v3766_v48 = vpop.xlane.xlu1 %649  ;;  %2848 = vpow2.f32 %v861_v52  ;;  %v765_v10 = vsub.f32 %v3398_v18, %v3763_v61  ;;  %1003 = vadd.xlane.f32.xlu1 %v1002_v55  ;;  %1006 = vadd.xlane.f32.xlu0 %v1005_v28  ;;  %v1008_v13 = vsel %vm536_vm0, %v2839_v60, 0.0 }
  0xda   :  { %6452 = vst [vmem:[#allocation46_spill] sm:$0xff] %v3766_v48  ;;  %v766_v11 = vsub.f32 %v3403_v19, %v3766_v48  ;;  %2850 = vpow2.f32 %v863_v20 }
  0xdb   :  { %v2841_v16 = vpop.eup %2840  ;;  %v865_v56 = vmul.f32 1.442695, %v765_v10 }
  0xdc   :  { %v867_v24 = vmul.f32 1.442695, %v766_v11  ;;  %v2843_v3 = vpop.eup %2842  ;;  %v3773_v4 = vpop.xlane.xlu0 %652  ;;  %v1011_v54 = vsel %vm536_vm0, %v2841_v16, 0.0 }
  0xdd   :  { %6453 = vst [vmem:[#allocation47_spill] sm:$0xff] %v3773_v4  ;;  %v3776_v52 = vpop.xlane.xlu1 %655  ;;  %2852 = vpow2.f32 %v865_v56  ;;  %v767_v18 = vsub.f32 %v3412_v26, %v3773_v4  ;;  %1009 = vadd.xlane.f32.xlu1 %v1008_v13  ;;  %1012 = vadd.xlane.f32.xlu0 %v1011_v54  ;;  %v1014_v55 = vsel %vm536_vm0, %v2843_v3, 0.0 }
  0xde   :  { %6454 = vst [vmem:[#allocation48_spill] sm:$0xff] %v3776_v52  ;;  %v768_v19 = vsub.f32 %v3417_v27, %v3776_v52  ;;  %2854 = vpow2.f32 %v867_v24 }
  0xdf   :  { %v2845_v20 = vpop.eup %2844  ;;  %v869_v60 = vmul.f32 1.442695, %v767_v18 }
  0xe0   :  { %v871_v28 = vmul.f32 1.442695, %v768_v19  ;;  %v2847_v10 = vpop.eup %2846  ;;  %v3783_v11 = vpop.xlane.xlu0 %658  ;;  %v1017_v16 = vsel %vm536_vm0, %v2845_v20, 0.0 }
  0xe1   :  { %6455 = vst [vmem:[#allocation49_spill] sm:$0xff] %v3783_v11  ;;  %v3786_v56 = vpop.xlane.xlu1 %661  ;;  %2856 = vpow2.f32 %v869_v60  ;;  %v769_v26 = vsub.f32 %v3426_v34, %v3783_v11  ;;  %1015 = vadd.xlane.f32.xlu1 %v1014_v55  ;;  %1018 = vadd.xlane.f32.xlu0 %v1017_v16  ;;  %v1020_v13 = vsel %vm536_vm0, %v2847_v10, 0.0 }
  0xe2   :  { %6456 = vst [vmem:[#allocation50_spill] sm:$0xff] %v3786_v56  ;;  %v770_v27 = vsub.f32 %v3431_v35, %v3786_v56  ;;  %2858 = vpow2.f32 %v871_v28 }
  0xe3   :  { %v2849_v24 = vpop.eup %2848  ;;  %v873_v3 = vmul.f32 1.442695, %v769_v26 }
  0xe4   :  { %v875_v54 = vmul.f32 1.442695, %v770_v27  ;;  %v2851_v18 = vpop.eup %2850  ;;  %v3793_v19 = vpop.xlane.xlu0 %664  ;;  %v1023_v20 = vsel %vm536_vm0, %v2849_v24, 0.0 }
  0xe5   :  { %6457 = vst [vmem:[#allocation51_spill] sm:$0xff] %v3793_v19  ;;  %v3796_v60 = vpop.xlane.xlu1 %667  ;;  %2860 = vpow2.f32 %v873_v3  ;;  %v771_v34 = vsub.f32 %v3440_v42, %v3793_v19  ;;  %1021 = vadd.xlane.f32.xlu1 %v1020_v13  ;;  %1024 = vadd.xlane.f32.xlu0 %v1023_v20  ;;  %v1026_v55 = vsel %vm536_vm0, %v2851_v18, 0.0 }
  0xe6   :  { %6458 = vst [vmem:[#allocation52_spill] sm:$0xff] %v3796_v60  ;;  %v772_v35 = vsub.f32 %v3445_v43, %v3796_v60  ;;  %2862 = vpow2.f32 %v875_v54 }
  0xe7   :  { %v2853_v28 = vpop.eup %2852  ;;  %v877_v10 = vmul.f32 1.442695, %v771_v34 }
  0xe8   :  { %v879_v16 = vmul.f32 1.442695, %v772_v35  ;;  %v2855_v26 = vpop.eup %2854  ;;  %v3803_v27 = vpop.xlane.xlu0 %670  ;;  %v1029_v24 = vsel %vm536_vm0, %v2853_v28, 0.0 }
  0xe9   :  { %6459 = vst [vmem:[#allocation53_spill] sm:$0xff] %v3803_v27  ;;  %v3806_v3 = vpop.xlane.xlu1 %673  ;;  %2864 = vpow2.f32 %v877_v10  ;;  %v773_v42 = vsub.f32 %v3454_v50, %v3803_v27  ;;  %1027 = vadd.xlane.f32.xlu1 %v1026_v55  ;;  %1030 = vadd.xlane.f32.xlu0 %v1029_v24  ;;  %v1032_v13 = vsel %vm536_vm0, %v2855_v26, 0.0 }
  0xea   :  { %6460 = vst [vmem:[#allocation54_spill] sm:$0xff] %v3806_v3  ;;  %v774_v43 = vsub.f32 %v3459_v51, %v3806_v3  ;;  %2866 = vpow2.f32 %v879_v16 }
  0xeb   :  { %v2857_v54 = vpop.eup %2856  ;;  %v881_v18 = vmul.f32 1.442695, %v773_v42 }
  0xec   :  { %v883_v20 = vmul.f32 1.442695, %v774_v43  ;;  %v2859_v34 = vpop.eup %2858  ;;  %v3813_v35 = vpop.xlane.xlu0 %676  ;;  %v1035_v28 = vsel %vm536_vm0, %v2857_v54, 0.0 }
  0xed   :  { %6461 = vst [vmem:[#allocation55_spill] sm:$0xff] %v3813_v35  ;;  %v3816_v10 = vpop.xlane.xlu1 %679  ;;  %2868 = vpow2.f32 %v881_v18  ;;  %v775_v50 = vsub.f32 %v3468_v58, %v3813_v35  ;;  %1033 = vadd.xlane.f32.xlu1 %v1032_v13  ;;  %1036 = vadd.xlane.f32.xlu0 %v1035_v28  ;;  %v1038_v55 = vsel %vm536_vm0, %v2859_v34, 0.0 }
  0xee   :  { %6462 = vst [vmem:[#allocation56_spill] sm:$0xff] %v3816_v10  ;;  %v776_v51 = vsub.f32 %v3473_v59, %v3816_v10  ;;  %2870 = vpow2.f32 %v883_v20 }
  0xef   :  { %v2861_v16 = vpop.eup %2860  ;;  %v885_v26 = vmul.f32 1.442695, %v775_v50 }
  0xf0   :  { %v887_v24 = vmul.f32 1.442695, %v776_v51  ;;  %v2863_v42 = vpop.eup %2862  ;;  %v3823_v43 = vpop.xlane.xlu0 %682  ;;  %v1041_v54 = vsel %vm536_vm0, %v2861_v16, 0.0 }
  0xf1   :  { %6463 = vst [vmem:[#allocation57_spill] sm:$0xff] %v3823_v43  ;;  %v3826_v18 = vpop.xlane.xlu1 %685  ;;  %2872 = vpow2.f32 %v885_v26  ;;  %v777_v58 = vsub.f32 %v3482_v6, %v3823_v43  ;;  %1039 = vadd.xlane.f32.xlu1 %v1038_v55  ;;  %1042 = vadd.xlane.f32.xlu0 %v1041_v54  ;;  %v1044_v13 = vsel %vm536_vm0, %v2863_v42, 0.0 }
  0xf2   :  { %6464 = vst [vmem:[#allocation58_spill] sm:$0xff] %v3826_v18  ;;  %v778_v59 = vsub.f32 %v3487_v7, %v3826_v18  ;;  %2874 = vpow2.f32 %v887_v24 }
  0xf3   :  { %v2865_v20 = vpop.eup %2864  ;;  %v889_v34 = vmul.f32 1.442695, %v777_v58 }
  0xf4   :  { %v891_v28 = vmul.f32 1.442695, %v778_v59  ;;  %v2867_v50 = vpop.eup %2866  ;;  %v3833_v51 = vpop.xlane.xlu0 %688  ;;  %v1047_v16 = vsel %vm536_vm0, %v2865_v20, 0.0 }
  0xf5   :  { %6465 = vst [vmem:[#allocation59_spill] sm:$0xff] %v3833_v51  ;;  %v3836_v26 = vpop.xlane.xlu1 %691  ;;  %2876 = vpow2.f32 %v889_v34  ;;  %v779_v6 = vsub.f32 %v3496_v22, %v3833_v51  ;;  %1045 = vadd.xlane.f32.xlu1 %v1044_v13  ;;  %1048 = vadd.xlane.f32.xlu0 %v1047_v16  ;;  %v1050_v55 = vsel %vm536_vm0, %v2867_v50, 0.0  ;;  %v6469_v22 = vld [vmem:[#allocation2_spill] sm:$0xff] }
  0xf6   :  { %6466 = vst [vmem:[#allocation60_spill] sm:$0xff] %v3836_v26  ;;  %v780_v7 = vsub.f32 %v3501_v23, %v3836_v26  ;;  %2878 = vpow2.f32 %v891_v28  ;;  %v6470_v23 = vld [vmem:[#allocation3_spill] sm:$0xff] }
  0xf7   :  { %v2869_v24 = vpop.eup %2868  ;;  %v893_v42 = vmul.f32 1.442695, %v779_v6 }
  0xf8   :  { %v895_v54 = vmul.f32 1.442695, %v780_v7  ;;  %v2871_v58 = vpop.eup %2870  ;;  %v3843_v59 = vpop.xlane.xlu0 %694  ;;  %v1053_v20 = vsel %vm536_vm0, %v2869_v24, 0.0 }
  0xf9   :  { %6467 = vst [vmem:[#allocation61_spill] sm:$0xff] %v3843_v59  ;;  %v3846_v34 = vpop.xlane.xlu1 %697  ;;  %2880 = vpow2.f32 %v893_v42  ;;  %v781_v13 = vsub.f32 %v6469_v22, %v3843_v59  ;;  %1051 = vadd.xlane.f32.xlu1 %v1050_v55  ;;  %1054 = vadd.xlane.f32.xlu0 %v1053_v20  ;;  %v1056_v50 = vsel %vm536_vm0, %v2871_v58, 0.0  ;;  %v6473_v55 = vld [vmem:[#allocation4_spill] sm:$0xff] }
  0xfa   :  { %6468 = vst [vmem:[#allocation62_spill] sm:$0xff] %v3846_v34  ;;  %v782_v28 = vsub.f32 %v6470_v23, %v3846_v34  ;;  %2882 = vpow2.f32 %v895_v54  ;;  %v6474_v54 = vld [vmem:[#allocation5_spill] sm:$0xff] }
  0xfb   :  { %v2873_v16 = vpop.eup %2872  ;;  %v897_v6 = vmul.f32 1.442695, %v781_v13 }
  0xfc   :  { %v899_v7 = vmul.f32 1.442695, %v782_v28  ;;  %v2875_v26 = vpop.eup %2874  ;;  %v3853_v51 = vpop.xlane.xlu0 %700  ;;  %v1059_v24 = vsel %vm536_vm0, %v2873_v16, 0.0 }
  0xfd   :  { %6471 = vst [vmem:[#allocation2_spill] sm:$0xff] %v3853_v51  ;;  %v3856_v42 = vpop.xlane.xlu1 %703  ;;  %2884 = vpow2.f32 %v897_v6  ;;  %v783_v20 = vsub.f32 %v6473_v55, %v3853_v51  ;;  %1057 = vadd.xlane.f32.xlu1 %v1056_v50  ;;  %1060 = vadd.xlane.f32.xlu0 %v1059_v24  ;;  %v1062_v58 = vsel %vm536_vm0, %v2875_v26, 0.0  ;;  %v6477_v50 = vld [vmem:[#allocation6_spill] sm:$0xff] }
  0xfe   :  { %6472 = vst [vmem:[#allocation3_spill] sm:$0xff] %v3856_v42  ;;  %v784_v22 = vsub.f32 %v6474_v54, %v3856_v42  ;;  %2886 = vpow2.f32 %v899_v7  ;;  %v6478_v7 = vld [vmem:[#allocation7_spill] sm:$0xff] }
  0xff   :  { %v2877_v13 = vpop.eup %2876  ;;  %v901_v23 = vmul.f32 1.442695, %v783_v20 }
 0x100   :  { %v903_v28 = vmul.f32 1.442695, %v784_v22  ;;  %v2879_v34 = vpop.eup %2878  ;;  %v3863_v59 = vpop.xlane.xlu0 %706  ;;  %v1065_v16 = vsel %vm536_vm0, %v2877_v13, 0.0 }
 0x101   :  { %6475 = vst [vmem:[#allocation4_spill] sm:$0xff] %v3863_v59  ;;  %v3866_v6 = vpop.xlane.xlu1 %709  ;;  %2888 = vpow2.f32 %v901_v23  ;;  %v785_v24 = vsub.f32 %v6477_v50, %v3863_v59  ;;  %1063 = vadd.xlane.f32.xlu1 %v1062_v58  ;;  %1066 = vadd.xlane.f32.xlu0 %v1065_v16  ;;  %v1068_v26 = vsel %vm536_vm0, %v2879_v34, 0.0  ;;  %v6481_v58 = vld [vmem:[#allocation8_spill] sm:$0xff] }
 0x102   :  { %6476 = vst [vmem:[#allocation5_spill] sm:$0xff] %v3866_v6  ;;  %v786_v55 = vsub.f32 %v6478_v7, %v3866_v6  ;;  %2890 = vpow2.f32 %v903_v28  ;;  %v6482_v28 = vld [vmem:[#allocation9_spill] sm:$0xff] }
 0x103   :  { %v2881_v20 = vpop.eup %2880  ;;  %v905_v54 = vmul.f32 1.442695, %v785_v24 }
 0x104   :  { %v907_v22 = vmul.f32 1.442695, %v786_v55  ;;  %v2883_v42 = vpop.eup %2882  ;;  %v3873_v51 = vpop.xlane.xlu0 %712  ;;  %v1071_v13 = vsel %vm536_vm0, %v2881_v20, 0.0 }
 0x105   :  { %6479 = vst [vmem:[#allocation6_spill] sm:$0xff] %v3873_v51  ;;  %v3876_v23 = vpop.xlane.xlu1 %715  ;;  %2892 = vpow2.f32 %v905_v54  ;;  %v787_v16 = vsub.f32 %v6481_v58, %v3873_v51  ;;  %1069 = vadd.xlane.f32.xlu1 %v1068_v26  ;;  %1072 = vadd.xlane.f32.xlu0 %v1071_v13  ;;  %v1074_v34 = vsel %vm536_vm0, %v2883_v42, 0.0  ;;  %v6485_v26 = vld [vmem:[#allocation10_spill] sm:$0xff] }
 0x106   :  { %6480 = vst [vmem:[#allocation7_spill] sm:$0xff] %v3876_v23  ;;  %v788_v50 = vsub.f32 %v6482_v28, %v3876_v23  ;;  %2894 = vpow2.f32 %v907_v22  ;;  %v6486_v22 = vld [vmem:[#allocation11_spill] sm:$0xff] }
 0x107   :  { %v2885_v24 = vpop.eup %2884  ;;  %v909_v7 = vmul.f32 1.442695, %v787_v16 }
 0x108   :  { %v911_v55 = vmul.f32 1.442695, %v788_v50  ;;  %v2887_v6 = vpop.eup %2886  ;;  %v3883_v59 = vpop.xlane.xlu0 %718  ;;  %v1077_v20 = vsel %vm536_vm0, %v2885_v24, 0.0 }
 0x109   :  { %6483 = vst [vmem:[#allocation8_spill] sm:$0xff] %v3883_v59  ;;  %v3886_v54 = vpop.xlane.xlu1 %721  ;;  %2896 = vpow2.f32 %v909_v7  ;;  %v789_v13 = vsub.f32 %v6485_v26, %v3883_v59  ;;  %1075 = vadd.xlane.f32.xlu1 %v1074_v34  ;;  %1078 = vadd.xlane.f32.xlu0 %v1077_v20  ;;  %v1080_v42 = vsel %vm536_vm0, %v2887_v6, 0.0  ;;  %v6489_v34 = vld [vmem:[#allocation12_spill] sm:$0xff] }
 0x10a   :  { %6484 = vst [vmem:[#allocation9_spill] sm:$0xff] %v3886_v54  ;;  %v790_v58 = vsub.f32 %v6486_v22, %v3886_v54  ;;  %2898 = vpow2.f32 %v911_v55  ;;  %v6490_v55 = vld [vmem:[#allocation13_spill] sm:$0xff] }
 0x10b   :  { %v2889_v16 = vpop.eup %2888  ;;  %v913_v28 = vmul.f32 1.442695, %v789_v13 }
 0x10c   :  { %v915_v50 = vmul.f32 1.442695, %v790_v58  ;;  %v2891_v23 = vpop.eup %2890  ;;  %v3893_v51 = vpop.xlane.xlu0 %724  ;;  %v1083_v24 = vsel %vm536_vm0, %v2889_v16, 0.0 }
 0x10d   :  { %6487 = vst [vmem:[#allocation10_spill] sm:$0xff] %v3893_v51  ;;  %v3896_v7 = vpop.xlane.xlu1 %727  ;;  %2900 = vpow2.f32 %v913_v28  ;;  %v791_v20 = vsub.f32 %v6489_v34, %v3893_v51  ;;  %1081 = vadd.xlane.f32.xlu1 %v1080_v42  ;;  %1084 = vadd.xlane.f32.xlu0 %v1083_v24  ;;  %v1086_v6 = vsel %vm536_vm0, %v2891_v23, 0.0 }
 0x10e   :  { %6488 = vst [vmem:[#allocation11_spill] sm:$0xff] %v3896_v7  ;;  %v792_v26 = vsub.f32 %v6490_v55, %v3896_v7  ;;  %2902 = vpow2.f32 %v915_v50 }
 0x10f   :  { %v2893_v13 = vpop.eup %2892  ;;  %v917_v22 = vmul.f32 1.442695, %v791_v20 }
 0x110   :  { %v919_v58 = vmul.f32 1.442695, %v792_v26  ;;  %v2895_v54 = vpop.eup %2894  ;;  %v1089_v16 = vsel %vm536_vm0, %v2893_v13, 0.0 }
 0x111   :  { %2904 = vpow2.f32 %v917_v22  ;;  %1087 = vadd.xlane.f32.xlu1 %v1086_v6  ;;  %1090 = vadd.xlane.f32.xlu0 %v1089_v16  ;;  %v1092_v28 = vsel %vm536_vm0, %v2895_v54, 0.0  ;;  %v3916_v16 = vld [vmem:[%s6173_s1 + $0x8] sm:$0xff] }
 0x112   :  { %2906 = vpow2.f32 %v919_v58  ;;  %6491 = vst [vmem:[#allocation12_spill] sm:$0xff] %v3916_v16  ;;  %vm345_vm10 = vcmp.ne.s32.totalorder %v3916_v16, 4294967295 }
 0x113   :  { %v2897_v42 = vpop.eup %2896 }
 0x114   :  { %v2899_v24 = vpop.eup %2898  ;;  %v1095_v34 = vsel %vm536_vm0, %v2897_v42, 0.0 }
 0x115   :  { %1093 = vadd.xlane.f32.xlu1 %v1092_v28  ;;  %1096 = vadd.xlane.f32.xlu0 %v1095_v34  ;;  %v1098_v23 = vsel %vm536_vm0, %v2899_v24, 0.0  ;;  %v3921_v28 = vld [vmem:[%s6173_s1] sm:$0xff]  ;;  %v3932_v34 = vld [vmem:[%s6173_s1 + $0x10] sm:$0xff] }
 0x116   :  { %6492 = vst [vmem:[#allocation13_spill] sm:$0xff] %v3921_v28  ;;  %vm344_vm11 = vcmp.ne.s32.totalorder %v3921_v28, 4294967295  ;;  %vm346_vm13 = vcmp.ne.s32.totalorder %v3932_v34, 4294967295 }
 0x117   :  { %v2901_v50 = vpop.eup %2900 }
 0x118   :  { %v2903_v20 = vpop.eup %2902  ;;  %v1101_v55 = vsel %vm536_vm0, %v2901_v50, 0.0 }
 0x119   :  { %1099 = vadd.xlane.f32.xlu1 %v1098_v23  ;;  %1102 = vadd.xlane.f32.xlu0 %v1101_v55  ;;  %v1104_v26 = vsel %vm536_vm0, %v2903_v20, 0.0  ;;  %v3942_v20 = vld [vmem:[%s6173_s1 + $0x18] sm:$0xff] }
 0x11a   :  { %6493 = vst [vmem:[#allocation63_spill] sm:$0xff] %v3942_v20  ;;  %vm347_vm14 = vcmp.ne.s32.totalorder %v3942_v20, 4294967295 }
 0x11b   :  { %v2905_v6 = vpop.eup %2904 }
 0x11c   :  { %v2907_v13 = vpop.eup %2906  ;;  %v1107_v54 = vsel %vm536_vm0, %v2905_v6, 0.0  ;;  %v3952_v6 = vld [vmem:[%s6173_s1 + $0x20] sm:$0xff] }
 0x11d   :  { %1105 = vadd.xlane.f32.xlu1 %v1104_v26  ;;  %1108 = vadd.xlane.f32.xlu0 %v1107_v54  ;;  %v1110_v22 = vsel %vm536_vm0, %v2907_v13, 0.0  ;;  %6494 = vst [vmem:[#allocation64_spill] sm:$0xff] %v3952_v6  ;;  %vm348_vm15 = vcmp.ne.s32.totalorder %v3952_v6, 4294967295 }
 0x121   :  { %1111 = vadd.xlane.f32.xlu1 %v1110_v22  ;;  %v3962_v22 = vld [vmem:[%s6173_s1 + $0x28] sm:$0xff] }
 0x122   :  { %6495 = vst [vmem:[#allocation65_spill] sm:$0xff] %v3962_v22 }
 0x12e   :  { %v3911_v58 = vpop.xlane.xlu0 %922 }
 0x12f   :  { %2908 = vlog2.f32 %v3911_v58 }
 0x132   :  { %1311 = vperm.xlu1 %2779, %v3916_v16   ;;  %v3924_v42 = vpop.xlane.xlu1 %925  ;;  %v3926_v24 = vpop.xlane.xlu0 %928 }
 0x133   :  { %1308 = vperm.xlu0 %2778, %v3921_v28   ;;  %2910 = vlog2.f32 %v3924_v42 }
 0x134   :  { %2912 = vlog2.f32 %v3926_v24  ;;  %v3057_v24 = vld [vmem:[%s6172_s0 + $0xf0] sm:$0xff] }
 0x136   :  { %1314 = vperm.xlu1 %2779, %v3932_v34   ;;  %v3935_v23 = vpop.xlane.xlu1 %931  ;;  %v3937_v50 = vpop.xlane.xlu0 %934  ;;  %v5498_v34 = vld [vmem:[%s6173_s1 + $0x1b0] sm:$0xff] }
 0x137   :  { %2914 = vlog2.f32 %v3935_v23  ;;  %v3058_v23 = vld [vmem:[%s6172_s0 + $0xa8] sm:$0xff] }
 0x138   :  { %2916 = vlog2.f32 %v3937_v50 }
 0x13a   :  { %1317 = vperm.xlu1 %2779, %v3942_v20   ;;  %v3945_v55 = vpop.xlane.xlu1 %937  ;;  %v3947_v26 = vpop.xlane.xlu0 %940 }
 0x13b   :  { %2918 = vlog2.f32 %v3945_v55 }
 0x13c   :  { %2920 = vlog2.f32 %v3947_v26  ;;  %v3060_v26 = vld [vmem:[%s6172_s0 + $0xb8] sm:$0xff] }
 0x13e   :  { %1320 = vperm.xlu1 %2779, %v3952_v6   ;;  %v3955_v13 = vpop.xlane.xlu1 %943  ;;  %v3957_v54 = vpop.xlane.xlu0 %946 }
 0x13f   :  { %2922 = vlog2.f32 %v3955_v13 }
 0x140   :  { %2924 = vlog2.f32 %v3957_v54 }
 0x142   :  { %1323 = vperm.xlu1 %2779, %v3962_v22   ;;  %v3965_v51 = vpop.xlane.xlu1 %949  ;;  %v3967_v7 = vpop.xlane.xlu0 %952 }
 0x143   :  { %2926 = vlog2.f32 %v3965_v51  ;;  %v3062_v51 = vld [vmem:[%s6172_s0 + $0x138] sm:$0xff] }
 0x144   :  { %2928 = vlog2.f32 %v3967_v7 }
 0x146   :  { %v3969_v59 = vpop.xlane.xlu1 %955  ;;  %v3971_v18 = vpop.xlane.xlu0 %958 }
 0x147   :  { %2930 = vlog2.f32 %v3969_v59 }
 0x148   :  { %2932 = vlog2.f32 %v3971_v18 }
 0x14a   :  { %v3973_v43 = vpop.xlane.xlu1 %961  ;;  %v3975_v10 = vpop.xlane.xlu0 %964 }
 0x14b   :  { %2934 = vlog2.f32 %v3973_v43 }
 0x14c   :  { %2936 = vlog2.f32 %v3975_v10  ;;  %v3066_v10 = vld [vmem:[%s6172_s0 + $0x158] sm:$0xff] }
 0x14e   :  { %v3977_v35 = vpop.xlane.xlu1 %967  ;;  %v3979_v27 = vpop.xlane.xlu0 %970 }
 0x14f   :  { %2938 = vlog2.f32 %v3977_v35 }
 0x152   :  { %v3981_v3 = vpop.xlane.xlu1 %973  ;;  %v3983_v19 = vpop.xlane.xlu0 %976 }
 0x153   :  { %6496 = vst [vmem:[#allocation66_spill] sm:$0xff] %v3981_v3  ;;  %6497 = vst [vmem:[#allocation67_spill] sm:$0xff] %v3983_v19 }
 0x156   :  { %v3985_v60 = vpop.xlane.xlu1 %979  ;;  %v3987_v56 = vpop.xlane.xlu0 %982 }
 0x157   :  { %6498 = vst [vmem:[#allocation68_spill] sm:$0xff] %v3985_v60  ;;  %6499 = vst [vmem:[#allocation69_spill] sm:$0xff] %v3987_v56  ;;  %v194_v56 = vld [vmem:[%s6173_s1 + $0x168] sm:$0xff] }
 0x15a   :  { %v3989_v11 = vpop.xlane.xlu1 %985  ;;  %v3991_v52 = vpop.xlane.xlu0 %988 }
 0x15b   :  { %6500 = vst [vmem:[#allocation70_spill] sm:$0xff] %v3989_v11  ;;  %6501 = vst [vmem:[#allocation71_spill] sm:$0xff] %v3991_v52  ;;  %v4301_v52 = vld [vmem:[%s6173_s1 + $0xe8] sm:$0xff]  ;;  %v4331_v11 = vld [vmem:[%s6173_s1 + $0x138] sm:$0xff] }
 0x15c   :  { %6572 = vst [vmem:[#allocation142_spill] sm:$0xff] %v4301_v52  ;;  %6577 = vst [vmem:[#allocation147_spill] sm:$0xff] %v4331_v11 }
 0x15e   :  { %v3993_v4 = vpop.xlane.xlu1 %991  ;;  %v3995_v48 = vpop.xlane.xlu0 %994 }
 0x15f   :  { %6502 = vst [vmem:[#allocation72_spill] sm:$0xff] %v3993_v4  ;;  %6503 = vst [vmem:[#allocation73_spill] sm:$0xff] %v3995_v48  ;;  %v4295_v4 = vld [vmem:[%s6173_s1 + $0xd8] sm:$0xff] }
 0x160   :  { %6571 = vst [vmem:[#allocation141_spill] sm:$0xff] %v4295_v4 }
 0x162   :  { %v3997_v61 = vpop.xlane.xlu1 %997  ;;  %v3999_v44 = vpop.xlane.xlu0 %1000 }
 0x163   :  { %6504 = vst [vmem:[#allocation74_spill] sm:$0xff] %v3997_v61  ;;  %6505 = vst [vmem:[#allocation75_spill] sm:$0xff] %v3999_v44 }
 0x166   :  { %v4001_v57 = vpop.xlane.xlu1 %1003  ;;  %v4003_v40 = vpop.xlane.xlu0 %1006 }
 0x167   :  { %6506 = vst [vmem:[#allocation76_spill] sm:$0xff] %v4001_v57  ;;  %6507 = vst [vmem:[#allocation77_spill] sm:$0xff] %v4003_v40  ;;  %v189_v40 = vld [vmem:[%s6173_s1 + $0x140] sm:$0xff]  ;;  %v190_v57 = vld [vmem:[%s6173_s1 + $0x148] sm:$0xff] }
 0x16a   :  { %v4005_v53 = vpop.xlane.xlu1 %1009  ;;  %v4007_v36 = vpop.xlane.xlu0 %1012 }
 0x16b   :  { %6508 = vst [vmem:[#allocation78_spill] sm:$0xff] %v4005_v53  ;;  %6509 = vst [vmem:[#allocation79_spill] sm:$0xff] %v4007_v36  ;;  %v4188_v36 = vld [vmem:[%s6173_s1 + $0xf0] sm:$0xff]  ;;  %v4194_v53 = vld [vmem:[%s6173_s1 + $0x100] sm:$0xff] }
 0x16c   :  { %6556 = vst [vmem:[#allocation126_spill] sm:$0xff] %v4188_v36  ;;  %6557 = vst [vmem:[#allocation127_spill] sm:$0xff] %v4194_v53 }
 0x16e   :  { %v4009_v49 = vpop.xlane.xlu1 %1015  ;;  %v4011_v33 = vpop.xlane.xlu0 %1018 }
 0x16f   :  { %6510 = vst [vmem:[#allocation80_spill] sm:$0xff] %v4009_v49  ;;  %6511 = vst [vmem:[#allocation81_spill] sm:$0xff] %v4011_v33 }
 0x172   :  { %v4013_v45 = vpop.xlane.xlu1 %1021  ;;  %v4015_v29 = vpop.xlane.xlu0 %1024 }
 0x173   :  { %6512 = vst [vmem:[#allocation82_spill] sm:$0xff] %v4013_v45  ;;  %6513 = vst [vmem:[#allocation83_spill] sm:$0xff] %v4015_v29 }
 0x176   :  { %v4017_v41 = vpop.xlane.xlu1 %1027  ;;  %v4019_v25 = vpop.xlane.xlu0 %1030 }
 0x177   :  { %6514 = vst [vmem:[#allocation84_spill] sm:$0xff] %v4017_v41  ;;  %6515 = vst [vmem:[#allocation85_spill] sm:$0xff] %v4019_v25 }
 0x17a   :  { %v4021_v37 = vpop.xlane.xlu1 %1033  ;;  %v4023_v31 = vpop.xlane.xlu0 %1036 }
 0x17b   :  { %6516 = vst [vmem:[#allocation86_spill] sm:$0xff] %v4021_v37  ;;  %6517 = vst [vmem:[#allocation87_spill] sm:$0xff] %v4023_v31 }
 0x17e   :  { %v4025_v0 = vpop.xlane.xlu1 %1039  ;;  %v4027_v8 = vpop.xlane.xlu0 %1042 }
 0x17f   :  { %6518 = vst [vmem:[#allocation88_spill] sm:$0xff] %v4025_v0  ;;  %6519 = vst [vmem:[#allocation89_spill] sm:$0xff] %v4027_v8 }
 0x182   :  { %v4029_v62 = vpop.xlane.xlu1 %1045  ;;  %v4031_v49 = vpop.xlane.xlu0 %1048 }
 0x183   :  { %6520 = vst [vmem:[#allocation90_spill] sm:$0xff] %v4029_v62  ;;  %6521 = vst [vmem:[#allocation91_spill] sm:$0xff] %v4031_v49 }
 0x186   :  { %v4033_v33 = vpop.xlane.xlu1 %1051  ;;  %v4035_v45 = vpop.xlane.xlu0 %1054 }
 0x187   :  { %6522 = vst [vmem:[#allocation92_spill] sm:$0xff] %v4033_v33  ;;  %6523 = vst [vmem:[#allocation93_spill] sm:$0xff] %v4035_v45 }
 0x18a   :  { %v4037_v29 = vpop.xlane.xlu1 %1057  ;;  %v4039_v41 = vpop.xlane.xlu0 %1060 }
 0x18b   :  { %6524 = vst [vmem:[#allocation94_spill] sm:$0xff] %v4037_v29  ;;  %6525 = vst [vmem:[#allocation95_spill] sm:$0xff] %v4039_v41 }
 0x18e   :  { %v4041_v25 = vpop.xlane.xlu1 %1063  ;;  %v4043_v37 = vpop.xlane.xlu0 %1066 }
 0x18f   :  { %6526 = vst [vmem:[#allocation96_spill] sm:$0xff] %v4041_v25  ;;  %6527 = vst [vmem:[#allocation97_spill] sm:$0xff] %v4043_v37 }
 0x192   :  { %v4045_v31 = vpop.xlane.xlu1 %1069  ;;  %v4047_v0 = vpop.xlane.xlu0 %1072 }
 0x193   :  { %6528 = vst [vmem:[#allocation98_spill] sm:$0xff] %v4045_v31  ;;  %6529 = vst [vmem:[#allocation99_spill] sm:$0xff] %v4047_v0 }
 0x196   :  { %v4049_v8 = vpop.xlane.xlu1 %1075  ;;  %v4051_v62 = vpop.xlane.xlu0 %1078 }
 0x197   :  { %6530 = vst [vmem:[#allocation100_spill] sm:$0xff] %v4049_v8  ;;  %6531 = vst [vmem:[#allocation101_spill] sm:$0xff] %v4051_v62  ;;  %v1305_v8 = vlaneseq }
 0x19a   :  { %v4053_v49 = vpop.xlane.xlu1 %1081  ;;  %v4055_v33 = vpop.xlane.xlu0 %1084 }
 0x19b   :  { %6532 = vst [vmem:[#allocation102_spill] sm:$0xff] %v4053_v49  ;;  %6533 = vst [vmem:[#allocation103_spill] sm:$0xff] %v4055_v33  ;;  %v4075_v33 = vand.u32 127, %v1305_v8 }
 0x19d   :  { %6543 = vst [vmem:[#allocation113_spill] sm:$0xff] %v4075_v33 }
 0x19e   :  { %v4057_v45 = vpop.xlane.xlu1 %1087  ;;  %v4059_v29 = vpop.xlane.xlu0 %1090 }
 0x19f   :  { %6534 = vst [vmem:[#allocation104_spill] sm:$0xff] %v4057_v45  ;;  %6535 = vst [vmem:[#allocation105_spill] sm:$0xff] %v4059_v29  ;;  %v4170_v29 = vld [vmem:[%s6173_s1 + $0xc0] sm:$0xff] }
 0x1a0   :  { %6553 = vst [vmem:[#allocation123_spill] sm:$0xff] %v4170_v29 }
 0x1a2   :  { %v4061_v41 = vpop.xlane.xlu1 %1093  ;;  %v4063_v25 = vpop.xlane.xlu0 %1096 }
 0x1a3   :  { %6536 = vst [vmem:[#allocation106_spill] sm:$0xff] %v4061_v41  ;;  %6537 = vst [vmem:[#allocation107_spill] sm:$0xff] %v4063_v25 }
 0x1a6   :  { %v4065_v37 = vpop.xlane.xlu1 %1099  ;;  %v4067_v31 = vpop.xlane.xlu0 %1102 }
 0x1a7   :  { %6538 = vst [vmem:[#allocation108_spill] sm:$0xff] %v4065_v37  ;;  %6539 = vst [vmem:[#allocation109_spill] sm:$0xff] %v4067_v31  ;;  %v3036_v37 = vld [vmem:[%s6172_s0 + $0x8] sm:$0xff] }
 0x1aa   :  { %v4069_v0 = vpop.xlane.xlu1 %1105  ;;  %v4071_v62 = vpop.xlane.xlu0 %1108 }
 0x1ab   :  { %6540 = vst [vmem:[#allocation110_spill] sm:$0xff] %v4069_v0  ;;  %6541 = vst [vmem:[#allocation111_spill] sm:$0xff] %v4071_v62  ;;  %v3037_v0 = vld [vmem:[%s6172_s0] sm:$0xff] }
 0x1ae   :  { %v4073_v49 = vpop.xlane.xlu1 %1111 }
 0x1af   :  { %6542 = vst [vmem:[#allocation112_spill] sm:$0xff] %v4073_v49 }
 0x1b2   :  { %v1312_v45 = vpop.permute.xlu1 %1311  ;;  %v1309_v32 = vpop.permute.xlu0 %1308 }
 0x1b3   :  { %vm1500_vm1 = vcmp.eq.s32.totalorder %v4075_v33, %v1312_v45  ;;  %vm1499_vm2 = vcmp.eq.s32.totalorder %v4075_v33, %v1309_v32  ;;  %v3038_v32 = vld [vmem:[%s6172_s0 + $0x10] sm:$0xff] }
 0x1b4   :  { %v1564_v31 = vsel %vm1500_vm1, %v3036_v37, 0.0  ;;  %v1563_v62 = vsel %vm1499_vm2, %v3037_v0, 0.0  ;;  %vm349_vm1 = vcmp.ne.s32.totalorder %v3962_v22, 4294967295 }
 0x1b5   :  { %v1630_v49 = vsel %vm536_vm0, %v1564_v31, 0.0  ;;  %v1627_v8 = vsel %vm536_vm0, %v1563_v62, 0.0  ;;  %v3039_v62 = vld [vmem:[%s6172_s0 + $0x18] sm:$0xff] }
 0x1b6   :  { %v1315_v25 = vpop.permute.xlu1 %1314  ;;  %1631 = vadd.xlane.f32.xlu0 %v1630_v49  ;;  %1628 = vadd.xlane.f32.xlu1 %v1627_v8 }
 0x1b7   :  { %vm1501_vm3 = vcmp.eq.s32.totalorder %v4075_v33, %v1315_v25  ;;  %v3040_v25 = vld [vmem:[%s6172_s0 + $0x20] sm:$0xff] }
 0x1b8   :  { %v1565_v45 = vsel %vm1501_vm3, %v3038_v32, 0.0 }
 0x1b9   :  { %v1633_v37 = vsel %vm536_vm0, %v1565_v45, 0.0 }
 0x1ba   :  { %v1318_v41 = vpop.permute.xlu1 %1317  ;;  %1634 = vadd.xlane.f32.xlu1 %v1633_v37 }
 0x1bb   :  { %vm1502_vm4 = vcmp.eq.s32.totalorder %v4075_v33, %v1318_v41  ;;  %v3041_v41 = vld [vmem:[%s6172_s0 + $0x28] sm:$0xff] }
 0x1bc   :  { %v1566_v0 = vsel %vm1502_vm4, %v3039_v62, 0.0 }
 0x1bd   :  { %v1636_v31 = vsel %vm536_vm0, %v1566_v0, 0.0  ;;  %v4110_v0 = vld [vmem:[%s6173_s1 + $0x30] sm:$0xff] }
 0x1be   :  { %v1321_v49 = vpop.permute.xlu1 %1320  ;;  %1637 = vadd.xlane.f32.xlu0 %v1636_v31  ;;  %6544 = vst [vmem:[#allocation114_spill] sm:$0xff] %v4110_v0  ;;  %v4116_v31 = vld [vmem:[%s6173_s1 + $0x38] sm:$0xff]  ;;  %vm350_vm2 = vcmp.ne.s32.totalorder %v4110_v0, 4294967295 }
 0x1bf   :  { %vm1503_vm5 = vcmp.eq.s32.totalorder %v4075_v33, %v1321_v49  ;;  %6545 = vst [vmem:[#allocation115_spill] sm:$0xff] %v4116_v31  ;;  %v4122_v49 = vld [vmem:[%s6173_s1 + $0x40] sm:$0xff]  ;;  %vm351_vm3 = vcmp.ne.s32.totalorder %v4116_v31, 4294967295 }
 0x1c0   :  { %v1567_v8 = vsel %vm1503_vm5, %v3040_v25, 0.0  ;;  %6546 = vst [vmem:[#allocation116_spill] sm:$0xff] %v4122_v49  ;;  %v4128_v25 = vld [vmem:[%s6173_s1 + $0x50] sm:$0xff]  ;;  %vm352_vm4 = vcmp.ne.s32.totalorder %v4122_v49, 4294967295 }
 0x1c1   :  { %v1639_v32 = vsel %vm536_vm0, %v1567_v8, 0.0  ;;  %6547 = vst [vmem:[#allocation117_spill] sm:$0xff] %v4128_v25  ;;  %v4134_v8 = vld [vmem:[%s6173_s1 + $0x60] sm:$0xff] }
 0x1c2   :  { %v1324_v45 = vpop.permute.xlu1 %1323  ;;  %1640 = vadd.xlane.f32.xlu1 %v1639_v32  ;;  %6548 = vst [vmem:[#allocation118_spill] sm:$0xff] %v4134_v8  ;;  %v4140_v32 = vld [vmem:[%s6173_s1 + $0x70] sm:$0xff] }
 0x1c3   :  { %vm1504_vm6 = vcmp.eq.s32.totalorder %v4075_v33, %v1324_v45  ;;  %6549 = vst [vmem:[#allocation119_spill] sm:$0xff] %v4140_v32  ;;  %v4146_v45 = vld [vmem:[%s6173_s1 + $0x80] sm:$0xff] }
 0x1c4   :  { %v1568_v37 = vsel %vm1504_vm6, %v3041_v41, 0.0  ;;  %6550 = vst [vmem:[#allocation120_spill] sm:$0xff] %v4146_v45  ;;  %v4152_v41 = vld [vmem:[%s6173_s1 + $0x90] sm:$0xff]  ;;  %vm6286_vm6 = vcmp.ne.s32.totalorder %v4128_v25, 4294967295 }
 0x1c5   :  { %v1642_v62 = vsel %vm536_vm0, %v1568_v37, 0.0  ;;  %v4158_v37 = vld [vmem:[%s6173_s1 + $0xa0] sm:$0xff] }
 0x1c6   :  { %1643 = vadd.xlane.f32.xlu1 %v1642_v62  ;;  %6551 = vst [vmem:[#allocation121_spill] sm:$0xff] %v4158_v37  ;;  %v4164_v62 = vld [vmem:[%s6173_s1 + $0xb0] sm:$0xff] }
 0x1c7   :  { %6552 = vst [vmem:[#allocation122_spill] sm:$0xff] %v4164_v62 }
 0x1d7   :  { %1326 = vperm.xlu1 %2779, %v4110_v0  }
 0x1db   :  { %1329 = vperm.xlu1 %2779, %v4116_v31  }
 0x1df   :  { %1332 = vperm.xlu1 %2779, %v4122_v49  }
 0x1e3   :  { %1338 = vperm.xlu1 %2779, %v4128_v25  }
 0x1e7   :  { %1344 = vperm.xlu1 %2779, %v4134_v8  }
 0x1eb   :  { %1350 = vperm.xlu1 %2779, %v4140_v32  }
 0x1ef   :  { %1356 = vperm.xlu1 %2779, %v4146_v45  }
 0x1f3   :  { %1362 = vperm.xlu1 %2779, %v4152_v41  }
 0x1f7   :  { %1368 = vperm.xlu1 %2779, %v4158_v37  }
 0x1fb   :  { %1374 = vperm.xlu1 %2779, %v4164_v62  }
 0x1ff   :  { %1380 = vperm.xlu1 %2779, %v4170_v29  }
 0x203   :  { %1386 = vperm.xlu1 %2779, %v4176_v38  }
 0x207   :  { %1392 = vperm.xlu1 %2779, %v4182_v46  }
 0x20b   :  { %1398 = vperm.xlu1 %2779, %v4188_v36  }
 0x20f   :  { %1404 = vperm.xlu1 %2779, %v4194_v53  }
 0x213   :  { %1410 = vperm.xlu1 %2779, %v4200_v21  }
 0x217   :  { %1419 = vperm.xlu1 %2779, %v186_v63  }
 0x21b   :  { %1422 = vperm.xlu1 %2779, %v187_v17   ;;  %v3042_v17 = vld [vmem:[%s6172_s0 + $0x30] sm:$0xff] }
 0x21f   :  { %1428 = vperm.xlu1 %2779, %v189_v40  }
 0x223   :  { %1431 = vperm.xlu1 %2779, %v190_v57  }
 0x243   :  { %v4215_v44 = vpop.xlane.xlu1 %1628 }
 0x244   :  { %6559 = vst [vmem:[#allocation129_spill] sm:$0xff] %v4215_v44  ;;  %v4289_v44 = vld [vmem:[%s6173_s1 + $0xc8] sm:$0xff] }
 0x245   :  { %6570 = vst [vmem:[#allocation140_spill] sm:$0xff] %v4289_v44 }
 0x247   :  { %v4217_v61 = vpop.xlane.xlu1 %1634 }
 0x248   :  { %6560 = vst [vmem:[#allocation130_spill] sm:$0xff] %v4217_v61 }
 0x24f   :  { %v4219_v63 = vpop.xlane.xlu1 %1640 }
 0x250   :  { %6561 = vst [vmem:[#allocation131_spill] sm:$0xff] %v4219_v63  ;;  %v3043_v63 = vld [vmem:[%s6172_s0 + $0x38] sm:$0xff] }
 0x253   :  { %v4221_v48 = vpop.xlane.xlu1 %1643 }
 0x254   :  { %6562 = vst [vmem:[#allocation132_spill] sm:$0xff] %v4221_v48 }
 0x257   :  { %v1327_v2 = vpop.permute.xlu1 %1326 }
 0x258   :  { %vm1505_vm7 = vcmp.eq.s32.totalorder %v4075_v33, %v1327_v2 }
 0x259   :  { %v1569_v40 = vsel %vm1505_vm7, %v3042_v17, 0.0  ;;  %v3044_v17 = vld [vmem:[%s6172_s0 + $0x40] sm:$0xff] }
 0x25a   :  { %v1645_v21 = vsel %vm536_vm0, %v1569_v40, 0.0 }
 0x25b   :  { %1646 = vadd.xlane.f32.xlu0 %v1645_v21  ;;  %v1330_v57 = vpop.permute.xlu1 %1329 }
 0x25c   :  { %vm1506_vm8 = vcmp.eq.s32.totalorder %v4075_v33, %v1330_v57  ;;  %v4241_v57 = vld [vmem:[%s6173_s1 + $0x48] sm:$0xff] }
 0x25d   :  { %v1570_v61 = vsel %vm1506_vm8, %v3043_v63, 0.0  ;;  %6563 = vst [vmem:[#allocation133_spill] sm:$0xff] %v4241_v57  ;;  %v4259_v63 = vld [vmem:[%s6173_s1 + $0x78] sm:$0xff]  ;;  %vm6323_vm5 = vcmp.ne.s32.totalorder %v4241_v57, 4294967295  ;;  %vm6284_vm8 = vcmp.ne.s32.totalorder %v4134_v8, 4294967295 }
 0x25e   :  { %v1648_v48 = vsel %vm536_vm0, %v1570_v61, 0.0  ;;  %v4247_v61 = vld [vmem:[%s6173_s1 + $0x58] sm:$0xff] }
 0x25f   :  { %1649 = vadd.xlane.f32.xlu1 %v1648_v48  ;;  %v1333_v2 = vpop.permute.xlu1 %1332  ;;  %6564 = vst [vmem:[#allocation134_spill] sm:$0xff] %v4247_v61  ;;  %v4253_v48 = vld [vmem:[%s6173_s1 + $0x68] sm:$0xff]  ;;  %vm6285_vm7 = vcmp.ne.s32.totalorder %v4247_v61, 4294967295 }
 0x260   :  { %vm1507_vm9 = vcmp.eq.s32.totalorder %v4075_v33, %v1333_v2  ;;  %6565 = vst [vmem:[#allocation135_spill] sm:$0xff] %v4253_v48  ;;  %v4265_v2 = vld [vmem:[%s6173_s1 + $0x88] sm:$0xff] }
 0x261   :  { %v1571_v40 = vsel %vm1507_vm9, %v3044_v17, 0.0  ;;  %6566 = vst [vmem:[#allocation136_spill] sm:$0xff] %v4265_v2  ;;  %v4271_v17 = vld [vmem:[%s6173_s1 + $0x98] sm:$0xff]  ;;  %vm6293_vm9 = vcmp.ne.s32.totalorder %v4253_v48, 4294967295 }
 0x262   :  { %v1651_v21 = vsel %vm536_vm0, %v1571_v40, 0.0  ;;  %6567 = vst [vmem:[#allocation137_spill] sm:$0xff] %v4271_v17  ;;  %v4277_v40 = vld [vmem:[%s6173_s1 + $0xa8] sm:$0xff] }
 0x263   :  { %1652 = vadd.xlane.f32.xlu1 %v1651_v21  ;;  %6568 = vst [vmem:[#allocation138_spill] sm:$0xff] %v4277_v40  ;;  %v4283_v21 = vld [vmem:[%s6173_s1 + $0xb8] sm:$0xff]  ;;  %v4374_v3 = vpop.permute.xlu1 %1338 }
 0x264   :  { %6569 = vst [vmem:[#allocation139_spill] sm:$0xff] %v4283_v21 }
 0x271   :  { %1335 = vperm.xlu0 %2778, %v4241_v57  }
 0x275   :  { %1341 = vperm.xlu0 %2778, %v4247_v61  }
 0x279   :  { %1347 = vperm.xlu0 %2778, %v4253_v48  }
 0x27d   :  { %1353 = vperm.xlu0 %2778, %v4259_v63  }
 0x281   :  { %1359 = vperm.xlu0 %2778, %v4265_v2  }
 0x285   :  { %1365 = vperm.xlu0 %2778, %v4271_v17  }
 0x289   :  { %1371 = vperm.xlu0 %2778, %v4277_v40  }
 0x28d   :  { %1377 = vperm.xlu0 %2778, %v4283_v21  }
 0x291   :  { %1383 = vperm.xlu0 %2778, %v4289_v44  }
 0x295   :  { %1389 = vperm.xlu0 %2778, %v4295_v4  }
 0x299   :  { %1395 = vperm.xlu0 %2778, %v4301_v52  }
 0x29d   :  { %1401 = vperm.xlu0 %2778, %v4307_v12  }
 0x2a1   :  { %1407 = vperm.xlu0 %2778, %v4313_v30   ;;  %v191_v30 = vld [vmem:[%s6173_s1 + $0x150] sm:$0xff] }
 0x2a5   :  { %1413 = vperm.xlu0 %2778, %v4319_v5   ;;  %v192_v5 = vld [vmem:[%s6173_s1 + $0x158] sm:$0xff] }
 0x2a9   :  { %1416 = vperm.xlu0 %2778, %v4325_v1   ;;  %v193_v1 = vld [vmem:[%s6173_s1 + $0x160] sm:$0xff] }
 0x2ad   :  { %1425 = vperm.xlu0 %2778, %v4331_v11   ;;  %v195_v11 = vld [vmem:[%s6173_s1 + $0x170] sm:$0xff] }
 0x2b1   :  { %1434 = vperm.xlu0 %2778, %v191_v30   ;;  %v6287_v30 = vmov 0.0  }
 0x2b2   :  { %v2708_v16 = vsel %vm346_vm13, 1.0, %v6287_v30 }
 0x2b3   :  { %v2543_v28 = vsel %vm2139_vm12, %v2708_v16, 0.0  ;;  %v2710_v16 = vsel %vm348_vm15, 1.0, %v6287_v30 }
 0x2b5   :  { %1437 = vperm.xlu0 %2778, %v192_v5   ;;  %v2707_v5 = vsel %vm345_vm10, 1.0, %v6287_v30 }
 0x2b6   :  { %v2541_v60 = vsel %vm2139_vm12, %v2707_v5, 0.0  ;;  %v2709_v5 = vsel %vm347_vm14, 1.0, %v6287_v30 }
 0x2b9   :  { %1440 = vperm.xlu0 %2778, %v193_v1   ;;  %v2706_v1 = vsel %vm344_vm11, 1.0, %v6287_v30 }
 0x2ba   :  { %v2540_v19 = vsel %vm2139_vm12, %v2706_v1, 0.0 }
 0x2bb   :  { %v2542_v53 = vadd.f32 %v2541_v60, %v2540_v19  ;;  %v198_v19 = vld [vmem:[%s6173_s1 + $0x188] sm:$0xff]  ;;  %v2545_v60 = vsel %vm2139_vm12, %v2709_v5, 0.0  ;;  %v4392_v5 = vpop.permute.xlu1 %1344 }
 0x2bd   :  { %1443 = vperm.xlu0 %2778, %v194_v56   ;;  %v196_v56 = vld [vmem:[%s6173_s1 + $0x178] sm:$0xff]  ;;  %v2544_v1 = vadd.f32 %v2543_v28, %v2542_v53  ;;  %v199_v53 = vld [vmem:[%s6173_s1 + $0x190] sm:$0xff]  ;;  %v2547_v28 = vsel %vm2139_vm12, %v2710_v16, 0.0 }
 0x2bf   :  { %v4402_v22 = vpop.permute.xlu1 %1350 }
 0x2c1   :  { %1446 = vperm.xlu0 %2778, %v195_v11   ;;  %v197_v11 = vld [vmem:[%s6173_s1 + $0x180] sm:$0xff] }
 0x2c5   :  { %1449 = vperm.xlu0 %2778, %v196_v56   ;;  %v2546_v56 = vadd.f32 %v2545_v60, %v2544_v1  ;;  %v200_v1 = vld [vmem:[%s6173_s1 + $0x198] sm:$0xff]  ;;  %v2712_v60 = vsel %vm350_vm2, 1.0, %v6287_v30 }
 0x2c7   :  { %v2548_v20 = vadd.f32 %v2547_v28, %v2546_v56  ;;  %v201_v56 = vld [vmem:[%s6173_s1 + $0x1a0] sm:$0xff]  ;;  %v2713_v28 = vsel %vm351_vm3, 1.0, %v6287_v30 }
 0x2c9   :  { %1452 = vperm.xlu0 %2778, %v197_v11   ;;  %v2711_v11 = vsel %vm349_vm1, 1.0, %v6287_v30 }
 0x2cd   :  { %1455 = vperm.xlu0 %2778, %v198_v19   ;;  %v2549_v19 = vsel %vm2139_vm12, %v2711_v11, 0.0 }
 0x2ce   :  { %v2550_v16 = vadd.f32 %v2549_v19, %v2548_v20  ;;  %v202_v20 = vld [vmem:[%s6173_s1 + $0x1a8] sm:$0xff]  ;;  %v2714_v19 = vsel %vm352_vm4, 1.0, %v6287_v30 }
 0x2d1   :  { %1458 = vperm.xlu0 %2778, %v199_v53   ;;  %v2551_v53 = vsel %vm2139_vm12, %v2712_v60, 0.0  ;;  %v4420_v60 = vpop.permute.xlu1 %1356 }
 0x2d2   :  { %v2552_v11 = vadd.f32 %v2551_v53, %v2550_v16  ;;  %v203_v16 = vld [vmem:[%s6173_s1 + $0x1b0] sm:$0xff]  ;;  %v2715_v53 = vsel %vm6323_vm5, 1.0, %v6287_v30  ;;  %vm6324_vm5 = vcmp.ne.s32.totalorder %v4301_v52, 4294967295  ;;  %v6607_v52 = vld [vmem:[#allocation78_spill] sm:$0xff] }
 0x2d5   :  { %1461 = vperm.xlu0 %2778, %v200_v1   ;;  %v2553_v1 = vsel %vm2139_vm12, %v2713_v28, 0.0  ;;  %v4430_v49 = vpop.permute.xlu1 %1362 }
 0x2d6   :  { %v2554_v0 = vadd.f32 %v2553_v1, %v2552_v11  ;;  %v204_v11 = vld [vmem:[%s6173_s1 + $0x1b8] sm:$0xff]  ;;  %v2716_v1 = vsel %vm6286_vm6, 1.0, %v6287_v30  ;;  %vm6303_vm6 = vcmp.ne.s32.totalorder %v4140_v32, 4294967295 }
 0x2d9   :  { %1464 = vperm.xlu0 %2778, %v201_v56   ;;  %v2555_v56 = vsel %vm2139_vm12, %v2714_v19, 0.0  ;;  %v4440_v19 = vpop.xlane.xlu0 %1631  ;;  %v4452_v25 = vpop.permute.xlu1 %1368 }
 0x2da   :  { %v2556_v28 = vadd.f32 %v2555_v56, %v2554_v0  ;;  %v205_v0 = vld [vmem:[%s6173_s1 + $0x1c0] sm:$0xff] }
 0x2dd   :  { %1467 = vperm.xlu0 %2778, %v202_v20   ;;  %v2557_v20 = vsel %vm2139_vm12, %v2715_v53, 0.0  ;;  %v4447_v56 = vpop.xlane.xlu0 %1637  ;;  %v2717_v53 = vsel %vm6285_vm7, 1.0, %v6287_v30  ;;  %v4464_v6 = vpop.permute.xlu1 %1374 }
 0x2de   :  { %v2558_v57 = vadd.f32 %v2557_v20, %v2556_v28  ;;  %v206_v28 = vld [vmem:[%s6173_s1 + $0x1c8] sm:$0xff]  ;;  %v2718_v20 = vsel %vm6284_vm8, 1.0, %v6287_v30  ;;  %vm1509_vm8 = vcmp.eq.s32.totalorder %v4075_v33, %v4374_v3 }
 0x2e1   :  { %1470 = vperm.xlu0 %2778, %v203_v16   ;;  %v2559_v16 = vsel %vm2139_vm12, %v2716_v1, 0.0 }
 0x2e2   :  { %v2560_v31 = vadd.f32 %v2559_v16, %v2558_v57  ;;  %v207_v57 = vld [vmem:[%s6173_s1 + $0x1d0] sm:$0xff]  ;;  %v2719_v16 = vsel %vm6293_vm9, 1.0, %v6287_v30 }
 0x2e5   :  { %1473 = vperm.xlu0 %2778, %v204_v11   ;;  %v2561_v11 = vsel %vm2139_vm12, %v2717_v53, 0.0 }
 0x2e6   :  { %v2562_v61 = vadd.f32 %v2561_v11, %v2560_v31  ;;  %v2565_v11 = vsel %vm2139_vm12, %v2719_v16, 0.0  ;;  %v3046_v16 = vld [vmem:[%s6172_s0 + $0x50] sm:$0xff] }
 0x2e7   :  { %v1573_v48 = vsel %vm1509_vm8, %v3046_v16, 0.0  ;;  %vm1511_vm8 = vcmp.eq.s32.totalorder %v4075_v33, %v4392_v5  ;;  %v210_v16 = vld [vmem:[%s6173_s1 + $0x1e8] sm:$0xff] }
 0x2e8   :  { %v4462_v1 = vpop.xlane.xlu0 %1646 }
 0x2e9   :  { %1476 = vperm.xlu0 %2778, %v205_v0   ;;  %v2563_v0 = vsel %vm2139_vm12, %v2718_v20, 0.0  ;;  %v3045_v20 = vld [vmem:[%s6172_s0 + $0x48] sm:$0xff] }
 0x2ea   :  { %v2564_v31 = vadd.f32 %v2563_v0, %v2562_v61  ;;  %v4488_v61 = vpop.permute.xlu1 %1380 }
 0x2ec   :  { %v2566_v8 = vadd.f32 %v2565_v11, %v2564_v31  ;;  %v3047_v31 = vld [vmem:[%s6172_s0 + $0x58] sm:$0xff] }
 0x2ed   :  { %1479 = vperm.xlu0 %2778, %v206_v28   ;;  %v208_v28 = vld [vmem:[%s6173_s1 + $0x1d8] sm:$0xff] }
 0x2f0   :  { %v1336_v53 = vpop.permute.xlu0 %1335 }
 0x2f1   :  { %1482 = vperm.xlu0 %2778, %v207_v57   ;;  %vm1508_vm7 = vcmp.eq.s32.totalorder %v4075_v33, %v1336_v53  ;;  %v6578_v57 = vmov 0.0  }
 0x2f2   :  { %v1572_v30 = vsel %vm1508_vm7, %v3045_v20, 0.0  ;;  %v2720_v3 = vsel %vm6303_vm6, 1.0, %v6578_v57  ;;  %v209_v20 = vld [vmem:[%s6173_s1 + $0x1e0] sm:$0xff]  ;;  %vm6296_vm7 = vcmp.ne.s32.totalorder %v4259_v63, 4294967295  ;;  %vm6307_vm6 = vcmp.ne.s32.totalorder %v4271_v17, 4294967295  ;;  %79 = vst [vmem:[%s6174_s2] sm:$0x1] %v6578_v57 }
 0x2f3   :  { %v1654_v0 = vsel %vm536_vm0, %v1572_v30, 0.0  ;;  %v2567_v32 = vsel %vm2139_vm12, %v2720_v3, 0.0  ;;  %v2721_v30 = vsel %vm6296_vm7, 1.0, %v6578_v57  ;;  %vm6299_vm7 = vcmp.ne.s32.totalorder %v4146_v45, 4294967295 }
 0x2f4   :  { %v1342_v53 = vpop.permute.xlu0 %1341  ;;  %1655 = vadd.xlane.f32.xlu1 %v1654_v0  ;;  %v2568_v3 = vadd.f32 %v2567_v32, %v2566_v8  ;;  %v3048_v8 = vld [vmem:[%s6172_s0 + $0x60] sm:$0xff]  ;;  %v2735_v7 = vsel %vm6324_vm5, 1.0, %v6578_v57  ;;  %vm6326_vm5 = vcmp.ne.s32.totalorder %v4307_v12, 4294967295 }
 0x2f5   :  { %1485 = vperm.xlu0 %2778, %v208_v28   ;;  %vm1510_vm9 = vcmp.eq.s32.totalorder %v4075_v33, %v1342_v53  ;;  %v1657_v28 = vsel %vm536_vm0, %v1573_v48, 0.0  ;;  %v4509_v53 = vpop.permute.xlu1 %1386  ;;  %v2569_v48 = vsel %vm2139_vm12, %v2721_v30, 0.0  ;;  %v1575_v32 = vsel %vm1511_vm8, %v3048_v8, 0.0  ;;  %v211_v30 = vld [vmem:[%s6173_s1 + $0x1f0] sm:$0xff] }
 0x2f6   :  { %v1574_v11 = vsel %vm1510_vm9, %v3047_v31, 0.0  ;;  %v2570_v5 = vadd.f32 %v2569_v48, %v2568_v3  ;;  %vm1513_vm8 = vcmp.eq.s32.totalorder %v4075_v33, %v4402_v22  ;;  %v3050_v22 = vld [vmem:[%s6172_s0 + $0x70] sm:$0xff] }
 0x2f8   :  { %v1348_v0 = vpop.permute.xlu0 %1347  ;;  %1658 = vadd.xlane.f32.xlu1 %v1657_v28  ;;  %v1660_v28 = vsel %vm536_vm0, %v1574_v11, 0.0 }
 0x2f9   :  { %1488 = vperm.xlu0 %2778, %v209_v20   ;;  %v2722_v20 = vsel %vm6299_vm7, 1.0, %v6578_v57  ;;  %vm1512_vm9 = vcmp.eq.s32.totalorder %v4075_v33, %v1348_v0  ;;  %vm6300_vm7 = vcmp.ne.s32.totalorder %v4265_v2, 4294967295  ;;  %v3049_v0 = vld [vmem:[%s6172_s0 + $0x68] sm:$0xff] }
 0x2fa   :  { %v2571_v45 = vsel %vm2139_vm12, %v2722_v20, 0.0  ;;  %v2723_v11 = vsel %vm6300_vm7, 1.0, %v6578_v57  ;;  %v1576_v3 = vsel %vm1512_vm9, %v3049_v0, 0.0  ;;  %v212_v20 = vld [vmem:[%s6173_s1 + $0x1f8] sm:$0xff]  ;;  %vm6304_vm7 = vcmp.ne.s32.totalorder %v4152_v41, 4294967295 }
 0x2fb   :  { %v2572_v48 = vadd.f32 %v2571_v45, %v2570_v5  ;;  %v1577_v45 = vsel %vm1513_vm8, %v3050_v22, 0.0  ;;  %vm1515_vm8 = vcmp.eq.s32.totalorder %v4075_v33, %v4420_v60  ;;  %v3052_v60 = vld [vmem:[%s6172_s0 + $0x80] sm:$0xff] }
 0x2fc   :  { %v1354_v31 = vpop.permute.xlu0 %1353  ;;  %1661 = vadd.xlane.f32.xlu1 %v1660_v28  ;;  %v1663_v28 = vsel %vm536_vm0, %v1575_v32, 0.0  ;;  %v2573_v32 = vsel %vm2139_vm12, %v2723_v11, 0.0 }
 0x2fd   :  { %1491 = vperm.xlu0 %2778, %v210_v16   ;;  %v4532_v16 = vpop.permute.xlu1 %1392  ;;  %v2574_v5 = vadd.f32 %v2573_v32, %v2572_v48  ;;  %vm1514_vm9 = vcmp.eq.s32.totalorder %v4075_v33, %v1354_v31  ;;  %v3051_v48 = vld [vmem:[%s6172_s0 + $0x78] sm:$0xff] }
 0x2fe   :  { %v1578_v32 = vsel %vm1514_vm9, %v3051_v48, 0.0 }
 0x300   :  { %v1360_v8 = vpop.permute.xlu0 %1359  ;;  %1664 = vadd.xlane.f32.xlu1 %v1663_v28  ;;  %v1666_v28 = vsel %vm536_vm0, %v1576_v3, 0.0  ;;  %v2725_v3 = vsel %vm6307_vm6, 1.0, %v6578_v57  ;;  %vm6313_vm6 = vcmp.ne.s32.totalorder %v4277_v40, 4294967295 }
 0x301   :  { %1494 = vperm.xlu0 %2778, %v211_v30   ;;  %v2724_v30 = vsel %vm6304_vm7, 1.0, %v6578_v57  ;;  %v4552_v0 = vpop.permute.xlu1 %1398  ;;  %vm6310_vm7 = vcmp.ne.s32.totalorder %v4158_v37, 4294967295  ;;  %vm1516_vm9 = vcmp.eq.s32.totalorder %v4075_v33, %v1360_v8  ;;  %v2727_v48 = vsel %vm6313_vm6, 1.0, %v6578_v57 }
 0x302   :  { %v2575_v11 = vsel %vm2139_vm12, %v2724_v30, 0.0  ;;  %v2577_v30 = vsel %vm2139_vm12, %v2725_v3, 0.0  ;;  %v2726_v22 = vsel %vm6310_vm7, 1.0, %v6578_v57  ;;  %vm6314_vm7 = vcmp.ne.s32.totalorder %v4164_v62, 4294967295 }
 0x303   :  { %v2576_v31 = vadd.f32 %v2575_v11, %v2574_v5  ;;  %v1579_v5 = vsel %vm1515_vm8, %v3052_v60, 0.0  ;;  %v2579_v3 = vsel %vm2139_vm12, %v2726_v22, 0.0  ;;  %vm1517_vm8 = vcmp.eq.s32.totalorder %v4075_v33, %v4430_v49  ;;  %v3054_v49 = vld [vmem:[%s6172_s0 + $0x90] sm:$0xff] }
 0x304   :  { %v1366_v2 = vpop.permute.xlu0 %1365  ;;  %1667 = vadd.xlane.f32.xlu1 %v1666_v28  ;;  %v2728_v22 = vsel %vm6314_vm7, 1.0, %v6578_v57  ;;  %vm6318_vm6 = vcmp.ne.s32.totalorder %v4283_v21, 4294967295  ;;  %vm6317_vm7 = vcmp.ne.s32.totalorder %v4170_v29, 4294967295  ;;  %v6625_v29 = vld [vmem:[#allocation87_spill] sm:$0xff] }
 0x305   :  { %1497 = vperm.xlu0 %2778, %v212_v20   ;;  %v1669_v20 = vsel %vm536_vm0, %v1577_v45, 0.0  ;;  %v4573_v45 = vpop.permute.xlu1 %1404  ;;  %v2578_v11 = vadd.f32 %v2577_v30, %v2576_v31  ;;  %v2581_v30 = vsel %vm2139_vm12, %v2727_v48, 0.0  ;;  %v2729_v48 = vsel %vm6318_vm6, 1.0, %v6578_v57 }
 0x306   :  { %vm6319_vm6 = vcmp.ne.s32.totalorder %v4289_v44, 4294967295 }
 0x307   :  { %v2580_v8 = vadd.f32 %v2579_v3, %v2578_v11  ;;  %v1581_v11 = vsel %vm1517_vm8, %v3054_v49, 0.0  ;;  %vm1519_vm8 = vcmp.eq.s32.totalorder %v4075_v33, %v4452_v25  ;;  %v2730_v49 = vsel %vm6317_vm7, 1.0, %v6578_v57  ;;  %v3056_v25 = vld [vmem:[%s6172_s0 + $0xa0] sm:$0xff] }
 0x308   :  { %v4561_v28 = vpop.permute.xlu0 %1371  ;;  %1670 = vadd.xlane.f32.xlu1 %v1669_v20  ;;  %v1672_v20 = vsel %vm536_vm0, %v1578_v32, 0.0  ;;  %v1675_v32 = vsel %vm536_vm0, %v1579_v5, 0.0  ;;  %v2587_v42 = vsel %vm2139_vm12, %v2730_v49, 0.0 }
 0x309   :  { %v4595_v31 = vpop.permute.xlu1 %1410  ;;  %v2582_v3 = vadd.f32 %v2581_v30, %v2580_v8  ;;  %v3055_v8 = vld [vmem:[%s6172_s0 + $0x98] sm:$0xff]  ;;  %vm1520_vm7 = vcmp.eq.s32.totalorder %v4075_v33, %v4561_v28 }
 0x30a   :  { %v1584_v28 = vsel %vm1520_vm7, %v3058_v23, 0.0 }
 0x30c   :  { %v4576_v17 = vpop.permute.xlu0 %1377  ;;  %1673 = vadd.xlane.f32.xlu1 %v1672_v20  ;;  %v3053_v20 = vld [vmem:[%s6172_s0 + $0x88] sm:$0xff] }
 0x30d   :  { %v1580_v60 = vsel %vm1516_vm9, %v3053_v20, 0.0  ;;  %vm1518_vm9 = vcmp.eq.s32.totalorder %v4075_v33, %v1366_v2  ;;  %v4614_v20 = vpop.permute.xlu1 %1419  ;;  %vm1522_vm7 = vcmp.eq.s32.totalorder %v4075_v33, %v4576_v17 }
 0x30e   :  { %v1678_v5 = vsel %vm536_vm0, %v1580_v60, 0.0  ;;  %v1681_v60 = vsel %vm536_vm0, %v1581_v11, 0.0  ;;  %v1582_v30 = vsel %vm1518_vm9, %v3055_v8, 0.0  ;;  %vm1529_vm9 = vcmp.eq.s32.totalorder %v4075_v33, %v4552_v0 }
 0x30f   :  { %v1684_v11 = vsel %vm536_vm0, %v1582_v30, 0.0  ;;  %v2731_v0 = vsel %vm6319_vm6, 1.0, %v6578_v57  ;;  %v1593_v8 = vsel %vm1529_vm9, %v3057_v24, 0.0  ;;  %vm6321_vm6 = vcmp.ne.s32.totalorder %v4176_v38, 4294967295 }
 0x310   :  { %v4588_v37 = vpop.permute.xlu0 %1383  ;;  %1676 = vadd.xlane.f32.xlu1 %v1675_v32  ;;  %v2583_v32 = vsel %vm2139_vm12, %v2728_v22, 0.0  ;;  %v2585_v22 = vsel %vm2139_vm12, %v2729_v48, 0.0  ;;  %v2732_v49 = vsel %vm6321_vm6, 1.0, %v6578_v57  ;;  %vm6320_vm9 = vcmp.ne.s32.totalorder %v4295_v4, 4294967295 }
 0x311   :  { %v2584_v2 = vadd.f32 %v2583_v32, %v2582_v3  ;;  %v1583_v3 = vsel %vm1519_vm8, %v3056_v25, 0.0  ;;  %v4640_v32 = vpop.permute.xlu1 %1422  ;;  %vm1521_vm8 = vcmp.eq.s32.totalorder %v4075_v33, %v4464_v6  ;;  %v1690_v25 = vsel %vm536_vm0, %v1584_v28, 0.0  ;;  %v3059_v6 = vld [vmem:[%s6172_s0 + $0xb0] sm:$0xff] }
 0x312   :  { %v1687_v48 = vsel %vm536_vm0, %v1583_v3, 0.0  ;;  %v2591_v24 = vsel %vm2139_vm12, %v2732_v49, 0.0  ;;  %v1586_v17 = vsel %vm1522_vm7, %v3060_v26, 0.0  ;;  %v3063_v26 = vld [vmem:[%s6172_s0 + $0x148] sm:$0xff] }
 0x313   :  { %v2586_v58 = vadd.f32 %v2585_v22, %v2584_v2  ;;  %v2589_v2 = vsel %vm2139_vm12, %v2731_v0, 0.0  ;;  %v1717_v22 = vsel %vm536_vm0, %v1593_v8, 0.0  ;;  %v2733_v8 = vsel %vm6320_vm9, 1.0, %v6578_v57 }
 0x314   :  { %v4603_v40 = vpop.permute.xlu0 %1389  ;;  %1679 = vadd.xlane.f32.xlu1 %v1678_v5  ;;  %vm6322_vm9 = vcmp.ne.s32.totalorder %v4182_v46, 4294967295  ;;  %v2593_v49 = vsel %vm2139_vm12, %v2733_v8, 0.0  ;;  %v6615_v46 = vld [vmem:[#allocation80_spill] sm:$0xff] }
 0x315   :  { %v2588_v30 = vadd.f32 %v2587_v42, %v2586_v58  ;;  %v1585_v58 = vsel %vm1521_vm8, %v3059_v6, 0.0  ;;  %v2909_v42 = vpop.eup %2908  ;;  %vm1523_vm8 = vcmp.eq.s32.totalorder %v4075_v33, %v4488_v61  ;;  %v2734_v54 = vsel %vm6322_vm9, 1.0, %v6578_v57 }
 0x316   :  { %v1693_v55 = vsel %vm536_vm0, %v1585_v58, 0.0  ;;  %v1696_v58 = vsel %vm536_vm0, %v1586_v17, 0.0  ;;  %vm1524_vm9 = vcmp.eq.s32.totalorder %v4075_v33, %v4588_v37  ;;  %v2595_v8 = vsel %vm2139_vm12, %v2734_v54, 0.0  ;;  %v6579_v54 = vld [vmem:[#allocation14_spill] sm:$0xff] }
 0x317   :  { %v2590_v0 = vadd.f32 %v2589_v2, %v2588_v30  ;;  %v1114_v2 = vmul.f32 0.6931472, %v2909_v42  ;;  %v3061_v42 = vld [vmem:[%s6172_s0 + $0xc0] sm:$0xff]  ;;  %2940 = vlog2.f32 %v3979_v27  ;;  %v6582_v27 = vld [vmem:[#allocation17_spill] sm:$0xff] }
 0x318   :  { %v4617_v5 = vpop.permute.xlu0 %1395  ;;  %1682 = vadd.xlane.f32.xlu1 %v1681_v60 }
 0x319   :  { %v2592_v13 = vadd.f32 %v2591_v24, %v2590_v0  ;;  %v1587_v0 = vsel %vm1523_vm8, %v3061_v42, 0.0  ;;  %vm374_vm8 = vcmp.ne.s32.totalorder %v4188_v36, 4294967295 }
 0x31a   :  { %v1699_v17 = vsel %vm536_vm0, %v1587_v0, 0.0  ;;  %v2736_v43 = vsel %vm374_vm8, 1.0, %v6578_v57 }
 0x31c   :  { %v4631_v21 = vpop.permute.xlu0 %1401  ;;  %1685 = vadd.xlane.f32.xlu1 %v1684_v11  ;;  %v4667_v11 = vpop.permute.xlu1 %1428 }
 0x320   :  { %v4651_v60 = vpop.permute.xlu0 %1407  ;;  %1688 = vadd.xlane.f32.xlu1 %v1687_v48  ;;  %v2911_v48 = vpop.eup %2910 }
 0x321   :  { %v2913_v50 = vpop.eup %2912  ;;  %v1432_v30 = vpop.permute.xlu1 %1431 }
 0x322   :  { %v2915_v28 = vpop.eup %2914  ;;  %vm1540_vm7 = vcmp.eq.s32.totalorder %v4075_v33, %v1432_v30  ;;  %v3064_v30 = vld [vmem:[%s6172_s0 + $0xc8] sm:$0xff] }
 0x323   :  { %v1120_v6 = vmul.f32 0.6931472, %v2915_v28  ;;  %v1604_v59 = vsel %vm1540_vm7, %v3063_v26, 0.0  ;;  %v1588_v42 = vsel %vm1524_vm9, %v3064_v30, 0.0  ;;  %vm1526_vm7 = vcmp.eq.s32.totalorder %v4075_v33, %v4603_v40 }
 0x324   :  { %1718 = vadd.xlane.f32.xlu0 %v1717_v22  ;;  %v4670_v3 = vpop.permute.xlu0 %1413  ;;  %1691 = vadd.xlane.f32.xlu1 %v1690_v25  ;;  %v1116_v22 = vmul.f32 0.6931472, %v2911_v48  ;;  %v1118_v25 = vmul.f32 0.6931472, %v2913_v50  ;;  %v2594_v48 = vadd.f32 %v2593_v49, %v2592_v13  ;;  %v2917_v50 = vpop.eup %2916  ;;  %v1750_v37 = vsel %vm536_vm0, %v1604_v59, 0.0 }
 0x325   :  { %v2919_v28 = vpop.eup %2918  ;;  %v2599_v59 = vsel %vm2139_vm12, %v2736_v43, 0.0  ;;  %v2737_v30 = vsel %vm6326_vm5, 1.0, %v6578_v57 }
 0x326   :  { %v2921_v49 = vpop.eup %2920  ;;  %v4736_v18 = vadd.f32 %v1116_v22, %v3599_v39  ;;  %v2596_v39 = vadd.f32 %v2595_v8, %v2594_v48  ;;  %v2597_v22 = vsel %vm2139_vm12, %v2735_v7, 0.0 }
 0x327   :  { %v2923_v0 = vpop.eup %2922 }
 0x328   :  { %v4687_v23 = vpop.permute.xlu0 %1416  ;;  %1694 = vadd.xlane.f32.xlu1 %v1693_v55  ;;  %v1128_v8 = vmul.f32 0.6931472, %v2923_v0 }
 0x32c   :  { %v1426_v55 = vpop.permute.xlu0 %1425  ;;  %1697 = vadd.xlane.f32.xlu1 %v1696_v58  ;;  %v4733_v58 = vadd.f32 %v1114_v2, %v6579_v54  ;;  %v2925_v2 = vpop.eup %2924 }
 0x32d   :  { %vm1538_vm6 = vcmp.eq.s32.totalorder %v4075_v33, %v1426_v55  ;;  %v4739_v55 = vadd.f32 %v1118_v25, %v3593_v15  ;;  %v4752_v15 = vadd.f32 %v1120_v6, %v3601_v47  ;;  %v1124_v25 = vmul.f32 0.6931472, %v2919_v28  ;;  %v3065_v47 = vld [vmem:[%s6172_s0 + $0xd0] sm:$0xff]  ;;  %v2927_v26 = vpop.eup %2926 }
 0x32e   :  { %v1602_v24 = vsel %vm1538_vm6, %v3062_v51, 0.0  ;;  %v1122_v51 = vmul.f32 0.6931472, %v2917_v50  ;;  %vm1525_vm6 = vcmp.eq.s32.totalorder %v4075_v33, %v4509_v53  ;;  %v1702_v50 = vsel %vm536_vm0, %v1588_v42, 0.0 }
 0x32f   :  { %v1744_v61 = vsel %vm536_vm0, %v1602_v24, 0.0  ;;  %v1126_v24 = vmul.f32 0.6931472, %v2921_v49  ;;  %v1589_v6 = vsel %vm1525_vm6, %v3065_v47, 0.0  ;;  %v2598_v28 = vadd.f32 %v2597_v22, %v2596_v39  ;;  %v6580_v49 = vld [vmem:[#allocation15_spill] sm:$0xff] }
 0x330   :  { %1745 = vadd.xlane.f32.xlu0 %v1744_v61  ;;  %v4730_v13 = vpop.permute.xlu0 %1434  ;;  %1700 = vadd.xlane.f32.xlu1 %v1699_v17  ;;  %v1130_v61 = vmul.f32 0.6931472, %v2925_v2  ;;  %v2929_v17 = vpop.eup %2928  ;;  %v4779_v54 = vadd.f32 %v1122_v51, %v6580_v49  ;;  %v1705_v42 = vsel %vm536_vm0, %v1589_v6, 0.0  ;;  %v4788_v39 = vadd.f32 %v1124_v25, %v3609_v14  ;;  %v6581_v2 = vld [vmem:[#allocation16_spill] sm:$0xff]  ;;  %v3067_v51 = vld [vmem:[%s6172_s0 + $0xd8] sm:$0xff]  ;;  %v6584_v47 = vld [vmem:[#allocation127_spill] sm:$0xff] }
 0x331   :  { %v2931_v0 = vpop.eup %2930  ;;  %v4791_v22 = vadd.f32 %v1126_v24, %v6581_v2  ;;  %v1590_v43 = vsel %vm1526_vm7, %v3067_v51, 0.0  ;;  %vm1527_vm6 = vcmp.eq.s32.totalorder %v4075_v33, %v4532_v16  ;;  %v2600_v14 = vadd.f32 %v2599_v59, %v2598_v28  ;;  %v6587_v49 = vld [vmem:[#allocation69_spill] sm:$0xff] }
 0x332   :  { %v4805_v25 = vadd.f32 %v1130_v61, %v3623_v9  ;;  %v1134_v24 = vmul.f32 0.6931472, %v2929_v17  ;;  %v2601_v6 = vsel %vm2139_vm12, %v2737_v30, 0.0  ;;  %v1136_v40 = vmul.f32 0.6931472, %v2931_v0  ;;  %v6586_v61 = vld [vmem:[#allocation68_spill] sm:$0xff] }
 0x333   :  { %v1708_v28 = vsel %vm536_vm0, %v1590_v43, 0.0  ;;  %v2602_v30 = vadd.f32 %v2601_v6, %v2600_v14  ;;  %v6588_v43 = vld [vmem:[#allocation144_spill] sm:$0xff] }
 0x334   :  { %1751 = vadd.xlane.f32.xlu0 %v1750_v37  ;;  %v1438_v48 = vpop.permute.xlu0 %1437  ;;  %1703 = vadd.xlane.f32.xlu1 %v1702_v50  ;;  %v4794_v37 = vadd.f32 %v1128_v8, %v6582_v27  ;;  %v2933_v50 = vpop.eup %2932  ;;  %v6583_v8 = vld [vmem:[#allocation66_spill] sm:$0xff]  ;;  %vm6361_vm5 = vcmp.ne.s32.totalorder %v6588_v43, 4294967295 }
 0x335   :  { %vm1542_vm9 = vcmp.eq.s32.totalorder %v4075_v33, %v1438_v48  ;;  %v1132_v48 = vmul.f32 0.6931472, %v2927_v26  ;;  %2942 = vlog2.f32 %v6583_v8  ;;  %v1138_v9 = vmul.f32 0.6931472, %v2933_v50  ;;  %v6589_v50 = vld [vmem:[#allocation70_spill] sm:$0xff] }
 0x336   :  { %v1606_v7 = vsel %vm1542_vm9, %v3066_v10, 0.0  ;;  %vm6325_vm9 = vcmp.ne.s32.totalorder %v6584_v47, 4294967295  ;;  %v2935_v10 = vpop.eup %2934  ;;  %v2739_v14 = vsel %vm6361_vm5, 1.0, %v6578_v57  ;;  %vm1537_vm5 = vcmp.eq.s32.totalorder %v4075_v33, %v4640_v32  ;;  %v5090_v32 = vld [vmem:[%s6173_s1 + $0x150] sm:$0xff] }
 0x337   :  { %v1756_v53 = vsel %vm536_vm0, %v1606_v7, 0.0  ;;  %v6585_v7 = vld [vmem:[#allocation67_spill] sm:$0xff]  ;;  %v2738_v26 = vsel %vm6325_vm9, 1.0, %v6578_v57  ;;  %vm1528_vm9 = vcmp.eq.s32.totalorder %v4075_v33, %v4617_v5  ;;  %v2937_v2 = vpop.eup %2936  ;;  %v1140_v27 = vmul.f32 0.6931472, %v2935_v10  ;;  %v6595_v5 = vld [vmem:[#allocation72_spill] sm:$0xff] }
 0x338   :  { %1757 = vadd.xlane.f32.xlu0 %v1756_v53  ;;  %v4785_v35 = vpop.permute.xlu0 %1440  ;;  %1706 = vadd.xlane.f32.xlu1 %v1705_v42  ;;  %2944 = vlog2.f32 %v6585_v7  ;;  %v3068_v53 = vld [vmem:[%s6172_s0 + $0xe0] sm:$0xff]  ;;  %v3069_v42 = vld [vmem:[%s6172_s0 + $0x168] sm:$0xff]  ;;  %v2603_v51 = vsel %vm2139_vm12, %v2738_v26, 0.0  ;;  %v2939_v10 = vpop.eup %2938 }
 0x339   :  { %2946 = vlog2.f32 %v6586_v61  ;;  %v1591_v17 = vsel %vm1527_vm6, %v3068_v53, 0.0  ;;  %v6590_v7 = vld [vmem:[#allocation18_spill] sm:$0xff]  ;;  %v3070_v26 = vld [vmem:[%s6172_s0 + $0xe8] sm:$0xff]  ;;  %vm1530_vm6 = vcmp.eq.s32.totalorder %v4075_v33, %v4631_v21 }
 0x33a   :  { %2948 = vlog2.f32 %v6587_v49  ;;  %v1711_v8 = vsel %vm536_vm0, %v1591_v17, 0.0  ;;  %v6591_v61 = vld [vmem:[#allocation19_spill] sm:$0xff]  ;;  %v6592_v17 = vld [vmem:[#allocation20_spill] sm:$0xff] }
 0x33b   :  { %2950 = vlog2.f32 %v6589_v50  ;;  %v4849_v53 = vadd.f32 %v1134_v24, %v6591_v61  ;;  %v4852_v49 = vadd.f32 %v1136_v40, %v6592_v17  ;;  %v6594_v50 = vld [vmem:[#allocation71_spill] sm:$0xff]  ;;  %v2605_v24 = vsel %vm2139_vm12, %v2739_v14, 0.0  ;;  %v3071_v14 = vld [vmem:[%s6172_s0 + $0xf8] sm:$0xff] }
 0x33c   :  { %v1444_v59 = vpop.permute.xlu0 %1443  ;;  %1709 = vadd.xlane.f32.xlu1 %v1708_v28  ;;  %v4840_v28 = vadd.f32 %v1132_v48, %v6590_v7  ;;  %v2941_v48 = vpop.eup %2940  ;;  %2952 = vlog2.f32 %v6594_v50  ;;  %v2604_v7 = vadd.f32 %v2603_v51, %v2602_v30  ;;  %v1144_v61 = vmul.f32 0.6931472, %v2939_v10  ;;  %v6600_v50 = vld [vmem:[#allocation75_spill] sm:$0xff] }
 0x33d   :  { %vm1544_vm7 = vcmp.eq.s32.totalorder %v4075_v33, %v1444_v59  ;;  %v1592_v59 = vsel %vm1528_vm9, %v3070_v26, 0.0  ;;  %2954 = vlog2.f32 %v6595_v5  ;;  %v6597_v26 = vld [vmem:[#allocation22_spill] sm:$0xff]  ;;  %v1146_v17 = vmul.f32 0.6931472, %v2941_v48  ;;  %v3072_v48 = vld [vmem:[%s6172_s0 + $0x178] sm:$0xff] }
 0x33e   :  { %v1608_v0 = vsel %vm1544_vm7, %v3069_v42, 0.0  ;;  %v6593_v42 = vld [vmem:[#allocation21_spill] sm:$0xff]  ;;  %v4864_v40 = vadd.f32 %v1140_v27, %v6597_v26  ;;  %v1714_v30 = vsel %vm536_vm0, %v1592_v59, 0.0  ;;  %v1594_v27 = vsel %vm1530_vm6, %v3071_v14, 0.0 }
 0x33f   :  { %v1762_v16 = vsel %vm536_vm0, %v1608_v0, 0.0  ;;  %v4855_v0 = vadd.f32 %v1138_v9, %v6593_v42  ;;  %v6598_v9 = vld [vmem:[#allocation73_spill] sm:$0xff]  ;;  %v2943_v21 = vpop.eup %2942  ;;  %v6599_v42 = vld [vmem:[#allocation74_spill] sm:$0xff]  ;;  %v2606_v59 = vadd.f32 %v2605_v24, %v2604_v7  ;;  %v1720_v24 = vsel %vm536_vm0, %v1594_v27, 0.0  ;;  %6651 = vst [vmem:[#allocation21_spill] sm:$0xff] %v5090_v32 }
 0x340   :  { %1763 = vadd.xlane.f32.xlu0 %v1762_v16  ;;  %v4837_v6 = vpop.permute.xlu0 %1446  ;;  %1712 = vadd.xlane.f32.xlu1 %v1711_v8  ;;  %v1142_v16 = vmul.f32 0.6931472, %v2937_v2  ;;  %v6596_v8 = vld [vmem:[#allocation128_spill] sm:$0xff]  ;;  %2956 = vlog2.f32 %v6598_v9 }
 0x341   :  { %vm6327_vm9 = vcmp.ne.s32.totalorder %v6596_v8, 4294967295  ;;  %2958 = vlog2.f32 %v6599_v42  ;;  %v6601_v9 = vld [vmem:[#allocation76_spill] sm:$0xff]  ;;  %v6603_v8 = vld [vmem:[#allocation77_spill] sm:$0xff] }
 0x342   :  { %v2740_v2 = vsel %vm6327_vm9, 1.0, %v6578_v57  ;;  %v2945_v10 = vpop.eup %2944  ;;  %2960 = vlog2.f32 %v6600_v50  ;;  %vm1531_vm9 = vcmp.eq.s32.totalorder %v4075_v33, %v4573_v45  ;;  %v1148_v50 = vmul.f32 0.6931472, %v2943_v21 }
 0x343   :  { %v2947_v26 = vpop.eup %2946  ;;  %2962 = vlog2.f32 %v6601_v9  ;;  %v2607_v42 = vsel %vm2139_vm12, %v2740_v2, 0.0  ;;  %v1150_v9 = vmul.f32 0.6931472, %v2945_v10  ;;  %v3073_v2 = vld [vmem:[%s6172_s0 + $0x100] sm:$0xff]  ;;  %v6606_v10 = vld [vmem:[#allocation25_spill] sm:$0xff] }
 0x344   :  { %v1450_v51 = vpop.permute.xlu0 %1449  ;;  %1715 = vadd.xlane.f32.xlu1 %v1714_v30  ;;  %v6602_v30 = vld [vmem:[#allocation145_spill] sm:$0xff]  ;;  %v2949_v14 = vpop.eup %2948  ;;  %2964 = vlog2.f32 %v6603_v8  ;;  %v1595_v21 = vsel %vm1531_vm9, %v3073_v2, 0.0  ;;  %v6604_v8 = vld [vmem:[#allocation23_spill] sm:$0xff]  ;;  %v2608_v47 = vadd.f32 %v2607_v42, %v2606_v59  ;;  %v6608_v2 = vld [vmem:[#allocation146_spill] sm:$0xff] }
 0x345   :  { %vm1546_vm7 = vcmp.eq.s32.totalorder %v4075_v33, %v1450_v51  ;;  %vm6336_vm6 = vcmp.ne.s32.totalorder %v6602_v30, 4294967295  ;;  %v6605_v30 = vld [vmem:[#allocation24_spill] sm:$0xff]  ;;  %v2951_v27 = vpop.eup %2950  ;;  %v1154_v12 = vmul.f32 0.6931472, %v2949_v14  ;;  %2966 = vlog2.f32 %v6607_v52  ;;  %v3074_v52 = vld [vmem:[%s6172_s0 + $0x108] sm:$0xff] }
 0x346   :  { %v1610_v5 = vsel %vm1546_vm7, %v3072_v48, 0.0  ;;  %v2741_v7 = vsel %vm6336_vm6, 1.0, %v6578_v57  ;;  %v4903_v43 = vadd.f32 %v1144_v61, %v6605_v30  ;;  %vm1532_vm7 = vcmp.eq.s32.totalorder %v4075_v33, %v4651_v60 }
 0x347   :  { %v1768_v51 = vsel %vm536_vm0, %v1610_v5, 0.0  ;;  %v4900_v5 = vadd.f32 %v1142_v16, %v6604_v8  ;;  %v2609_v45 = vsel %vm2139_vm12, %v2741_v7, 0.0  ;;  %vm6337_vm9 = vcmp.ne.s32.totalorder %v6608_v2, 4294967295  ;;  %v2953_v16 = vpop.eup %2952  ;;  %v6609_v8 = vld [vmem:[#allocation79_spill] sm:$0xff] }
 0x348   :  { %1769 = vadd.xlane.f32.xlu0 %v1768_v51  ;;  %v4891_v48 = vpop.permute.xlu0 %1452  ;;  %1721 = vadd.xlane.f32.xlu1 %v1720_v24  ;;  %v1152_v51 = vmul.f32 0.6931472, %v2947_v26  ;;  %v4908_v24 = vadd.f32 %v1146_v17, %v6606_v10  ;;  %2968 = vlog2.f32 %v6609_v8  ;;  %v2742_v61 = vsel %vm6337_vm9, 1.0, %v6578_v57  ;;  %v6610_v26 = vld [vmem:[#allocation26_spill] sm:$0xff]  ;;  %v2955_v42 = vpop.eup %2954  ;;  %v6611_v7 = vld [vmem:[#allocation27_spill] sm:$0xff] }
 0x349   :  { %v1723_v59 = vsel %vm536_vm0, %v1595_v21, 0.0  ;;  %v4919_v17 = vadd.f32 %v1148_v50, %v6610_v26  ;;  %v1156_v30 = vmul.f32 0.6931472, %v2951_v27  ;;  %v1596_v14 = vsel %vm1532_vm7, %v3074_v52, 0.0  ;;  %v3075_v50 = vld [vmem:[%s6172_s0 + $0x188] sm:$0xff]  ;;  %v6612_v26 = vld [vmem:[#allocation28_spill] sm:$0xff] }
 0x34a   :  { %v4926_v10 = vadd.f32 %v1150_v9, %v6611_v7  ;;  %v2957_v8 = vpop.eup %2956  ;;  %vm1533_vm9 = vcmp.eq.s32.totalorder %v4075_v33, %v4595_v31  ;;  %v2610_v21 = vadd.f32 %v2609_v45, %v2608_v47  ;;  %v4934_v2 = vadd.f32 %v1152_v51, %v6612_v26  ;;  %v6614_v45 = vld [vmem:[#allocation29_spill] sm:$0xff]  ;;  %v4971_v31 = vld [vmem:[%s6173_s1 + $0x130] sm:$0xff] }
 0x34b   :  { %v2959_v52 = vpop.eup %2958  ;;  %v2611_v9 = vsel %vm2139_vm12, %v2742_v61, 0.0  ;;  %2970 = vlog2.f32 %v6615_v46  ;;  %v1726_v26 = vsel %vm536_vm0, %v1596_v14, 0.0  ;;  %v1160_v61 = vmul.f32 0.6931472, %v2955_v42  ;;  %6619 = vst [vmem:[#allocation15_spill] sm:$0xff] %v4971_v31 }
 0x34c   :  { %v1456_v60 = vpop.permute.xlu0 %1455  ;;  %1724 = vadd.xlane.f32.xlu1 %v1723_v59  ;;  %v4939_v59 = vld [vmem:[%s6173_s1 + $0x128] sm:$0xff]  ;;  %v2961_v7 = vpop.eup %2960  ;;  %v1162_v44 = vmul.f32 0.6931472, %v2957_v8  ;;  %v1164_v14 = vmul.f32 0.6931472, %v2959_v52  ;;  %v6618_v8 = vld [vmem:[#allocation82_spill] sm:$0xff] }
 0x34d   :  { %vm1548_vm6 = vcmp.eq.s32.totalorder %v4075_v33, %v1456_v60  ;;  %6613 = vst [vmem:[#allocation14_spill] sm:$0xff] %v4939_v59  ;;  %vm6349_vm7 = vcmp.ne.s32.totalorder %v4939_v59, 4294967295  ;;  %v4945_v60 = vadd.f32 %v1154_v12, %v6614_v45  ;;  %v2963_v38 = vpop.eup %2962  ;;  %v3077_v12 = vld [vmem:[%s6172_s0 + $0x110] sm:$0xff]  ;;  %v2612_v59 = vadd.f32 %v2611_v9, %v2610_v21  ;;  %v6620_v52 = vld [vmem:[#allocation83_spill] sm:$0xff] }
 0x34e   :  { %v1612_v27 = vsel %vm1548_vm6, %v3075_v50, 0.0  ;;  %v1158_v50 = vmul.f32 0.6931472, %v2953_v16  ;;  %v2743_v51 = vsel %vm6349_vm7, 1.0, %v6578_v57  ;;  %v1597_v46 = vsel %vm1533_vm9, %v3077_v12, 0.0  ;;  %v6616_v16 = vld [vmem:[#allocation30_spill] sm:$0xff]  ;;  %v2965_v45 = vpop.eup %2964 }
 0x34f   :  { %v1774_v47 = vsel %vm536_vm0, %v1612_v27, 0.0  ;;  %v4961_v27 = vadd.f32 %v1156_v30, %v6616_v16  ;;  %vm1534_vm6 = vcmp.eq.s32.totalorder %v4075_v33, %v4670_v3  ;;  %v1166_v42 = vmul.f32 0.6931472, %v2961_v7  ;;  %v2967_v7 = vpop.eup %2966  ;;  %v3079_v16 = vld [vmem:[%s6172_s0 + $0x118] sm:$0xff] }
 0x350   :  { %1775 = vadd.xlane.f32.xlu0 %v1774_v47  ;;  %v4952_v4 = vpop.permute.xlu0 %1458  ;;  %1727 = vadd.xlane.f32.xlu1 %v1726_v26  ;;  %v6617_v47 = vld [vmem:[#allocation81_spill] sm:$0xff]  ;;  %v2613_v26 = vsel %vm2139_vm12, %v2743_v51, 0.0  ;;  %vm6350_vm9 = vcmp.ne.s32.totalorder %v4971_v31, 4294967295  ;;  %v1168_v30 = vmul.f32 0.6931472, %v2963_v38  ;;  %v1729_v3 = vsel %vm536_vm0, %v1597_v46, 0.0 }
 0x351   :  { %2972 = vlog2.f32 %v6617_v47  ;;  %v2744_v21 = vsel %vm6350_vm9, 1.0, %v6578_v57  ;;  %v1170_v12 = vmul.f32 0.6931472, %v2965_v45  ;;  %v6621_v51 = vld [vmem:[#allocation84_spill] sm:$0xff]  ;;  %v1598_v47 = vsel %vm1534_vm6, %v3079_v16, 0.0  ;;  %v3080_v46 = vld [vmem:[%s6172_s0 + $0x198] sm:$0xff] }
 0x352   :  { %2974 = vlog2.f32 %v6618_v8  ;;  %v2969_v38 = vpop.eup %2968  ;;  %v6622_v8 = vld [vmem:[#allocation85_spill] sm:$0xff]  ;;  %vm1535_vm9 = vcmp.eq.s32.totalorder %v4075_v33, %v4687_v23  ;;  %v2615_v31 = vsel %vm2139_vm12, %v2744_v21, 0.0  ;;  %v6624_v16 = vld [vmem:[#allocation147_spill] sm:$0xff]  ;;  %v3081_v21 = vld [vmem:[%s6172_s0 + $0x120] sm:$0xff] }
 0x353   :  { %2976 = vlog2.f32 %v6620_v52  ;;  %v2614_v52 = vadd.f32 %v2613_v26, %v2612_v59  ;;  %vm383_vm6 = vcmp.ne.s32.totalorder %v6624_v16, 4294967295  ;;  %v1732_v59 = vsel %vm536_vm0, %v1598_v47, 0.0 }
 0x354   :  { %v1462_v9 = vpop.permute.xlu0 %1461  ;;  %2978 = vlog2.f32 %v6621_v51  ;;  %1730 = vadd.xlane.f32.xlu1 %v1729_v3  ;;  %v6623_v51 = vld [vmem:[#allocation86_spill] sm:$0xff]  ;;  %v2745_v23 = vsel %vm383_vm6, 1.0, %v6578_v57 }
 0x355   :  { %vm1550_vm7 = vcmp.eq.s32.totalorder %v4075_v33, %v1462_v9  ;;  %2980 = vlog2.f32 %v6622_v8  ;;  %v1172_v9 = vmul.f32 0.6931472, %v2967_v7  ;;  %v1174_v8 = vmul.f32 0.6931472, %v2969_v38  ;;  %v2971_v16 = vpop.eup %2970  ;;  %v6631_v38 = vld [vmem:[#allocation34_spill] sm:$0xff] }
 0x356   :  { %v1614_v45 = vsel %vm1550_vm7, %v3080_v46, 0.0  ;;  %2982 = vlog2.f32 %v6623_v51  ;;  %v1599_v46 = vsel %vm1535_vm9, %v3081_v21, 0.0  ;;  %vm1536_vm7 = vcmp.eq.s32.totalorder %v4075_v33, %v4614_v20 }
 0x357   :  { %v1780_v3 = vsel %vm536_vm0, %v1614_v45, 0.0  ;;  %2984 = vlog2.f32 %v6625_v29  ;;  %v6626_v45 = vld [vmem:[#allocation31_spill] sm:$0xff]  ;;  %v6627_v29 = vld [vmem:[#allocation32_spill] sm:$0xff]  ;;  %v2616_v47 = vadd.f32 %v2615_v31, %v2614_v52  ;;  %v5016_v36 = vadd.f32 %v1164_v14, %v6631_v38 }
 0x358   :  { %1781 = vadd.xlane.f32.xlu0 %v1780_v3  ;;  %v4999_v26 = vpop.permute.xlu0 %1464  ;;  %1733 = vadd.xlane.f32.xlu1 %v1732_v59  ;;  %v5005_v7 = vadd.f32 %v1158_v50, %v6626_v45  ;;  %v5008_v51 = vadd.f32 %v1160_v61, %v6627_v29  ;;  %v6629_v3 = vld [vmem:[#allocation33_spill] sm:$0xff]  ;;  %v5021_v59 = vld [vmem:[%s6173_s1 + $0x140] sm:$0xff]  ;;  %v2617_v50 = vsel %vm2139_vm12, %v2745_v23, 0.0  ;;  %v6634_v61 = vld [vmem:[#allocation35_spill] sm:$0xff]  ;;  %v1735_v52 = vsel %vm536_vm0, %v1599_v46, 0.0 }
 0x359   :  { %v5013_v62 = vadd.f32 %v1162_v44, %v6629_v3  ;;  %6632 = vst [vmem:[#allocation66_spill] sm:$0xff] %v5016_v36  ;;  %6633 = vst [vmem:[#allocation67_spill] sm:$0xff] %v5021_v59  ;;  %vm6360_vm9 = vcmp.ne.s32.totalorder %v5021_v59, 4294967295  ;;  %v5026_v21 = vadd.f32 %v1166_v42, %v6634_v61  ;;  %v6636_v45 = vld [vmem:[#allocation36_spill] sm:$0xff]  ;;  %v6638_v3 = vld [vmem:[#allocation37_spill] sm:$0xff] }
 0x35a   :  { %6628 = vst [vmem:[#allocation16_spill] sm:$0xff] %v5008_v51  ;;  %v5029_v31 = vadd.f32 %v1168_v30, %v6636_v45  ;;  %v2746_v14 = vsel %vm6360_vm9, 1.0, %v6578_v57  ;;  %v5036_v38 = vadd.f32 %v1170_v12, %v6638_v3  ;;  %v6640_v36 = vld [vmem:[#allocation38_spill] sm:$0xff]  ;;  %v1176_v42 = vmul.f32 0.6931472, %v2971_v16  ;;  %v3083_v30 = vld [vmem:[%s6172_s0 + $0x128] sm:$0xff] }
 0x35b   :  { %6630 = vst [vmem:[#allocation17_spill] sm:$0xff] %v5013_v62  ;;  %6635 = vst [vmem:[#allocation68_spill] sm:$0xff] %v5026_v21  ;;  %v2973_v44 = vpop.eup %2972  ;;  %v5039_v62 = vadd.f32 %v1172_v9, %v6640_v36  ;;  %v1600_v61 = vsel %vm1536_vm7, %v3083_v30, 0.0  ;;  %v6642_v46 = vld [vmem:[#allocation39_spill] sm:$0xff]  ;;  %v6643_v3 = vld [vmem:[#allocation88_spill] sm:$0xff]  ;;  %v2618_v36 = vadd.f32 %v2617_v50, %v2616_v47 }
 0x35c   :  { %6637 = vst [vmem:[#allocation69_spill] sm:$0xff] %v5029_v31  ;;  %v1468_v29 = vpop.permute.xlu0 %1467  ;;  %6639 = vst [vmem:[#allocation70_spill] sm:$0xff] %v5036_v38  ;;  %v2975_v23 = vpop.eup %2974  ;;  %1736 = vadd.xlane.f32.xlu1 %v1735_v52  ;;  %v5049_v45 = vadd.f32 %v1174_v8, %v6642_v46  ;;  %2986 = vlog2.f32 %v6643_v3  ;;  %v3084_v16 = vld [vmem:[%s6172_s0 + $0x1a8] sm:$0xff]  ;;  %v6644_v30 = vld [vmem:[#allocation89_spill] sm:$0xff]  ;;  %v2619_v52 = vsel %vm2139_vm12, %v2746_v14, 0.0 }
 0x35d   :  { %6641 = vst [vmem:[#allocation18_spill] sm:$0xff] %v5039_v62  ;;  %vm1552_vm9 = vcmp.eq.s32.totalorder %v4075_v33, %v1468_v29  ;;  %v2977_v12 = vpop.eup %2976  ;;  %2988 = vlog2.f32 %v6644_v30  ;;  %v5062_v8 = vld [vmem:[%s6173_s1 + $0x148] sm:$0xff]  ;;  %v1178_v50 = vmul.f32 0.6931472, %v2973_v44  ;;  %v6646_v46 = vld [vmem:[#allocation90_spill] sm:$0xff]  ;;  %v6650_v31 = vld [vmem:[#allocation92_spill] sm:$0xff] }
 0x35e   :  { %v1616_v9 = vsel %vm1552_vm9, %v3084_v16, 0.0  ;;  %v2979_v20 = vpop.eup %2978  ;;  %6645 = vst [vmem:[#allocation19_spill] sm:$0xff] %v5062_v8  ;;  %vm6366_vm7 = vcmp.ne.s32.totalorder %v5062_v8, 4294967295  ;;  %2990 = vlog2.f32 %v6646_v46  ;;  %v1738_v16 = vsel %vm536_vm0, %v1600_v61, 0.0  ;;  %v6647_v46 = vld [vmem:[#allocation40_spill] sm:$0xff]  ;;  %v6667_v51 = vld [vmem:[#allocation45_spill] sm:$0xff] }
 0x35f   :  { %v1786_v29 = vsel %vm536_vm0, %v1616_v9, 0.0  ;;  %v2981_v47 = vpop.eup %2980  ;;  %v2747_v3 = vsel %vm6366_vm7, 1.0, %v6578_v57  ;;  %v1180_v59 = vmul.f32 0.6931472, %v2975_v23  ;;  %v1182_v62 = vmul.f32 0.6931472, %v2977_v12 }
 0x360   :  { %1787 = vadd.xlane.f32.xlu0 %v1786_v29  ;;  %v5071_v14 = vpop.permute.xlu0 %1470  ;;  %v2983_v30 = vpop.eup %2982  ;;  %v3086_v9 = vld [vmem:[%s6172_s0 + $0x130] sm:$0xff]  ;;  %1739 = vadd.xlane.f32.xlu1 %v1738_v16  ;;  %v5080_v8 = vadd.f32 %v1176_v42, %v6647_v46  ;;  %v1184_v61 = vmul.f32 0.6931472, %v2979_v20  ;;  %v6649_v29 = vld [vmem:[#allocation91_spill] sm:$0xff]  ;;  %vm1539_vm9 = vcmp.eq.s32.totalorder %v4075_v33, %v4667_v11  ;;  %v2620_v23 = vadd.f32 %v2619_v52, %v2618_v36  ;;  %v6652_v20 = vld [vmem:[#allocation93_spill] sm:$0xff] }
 0x361   :  { %v1601_v44 = vsel %vm1537_vm5, %v3086_v9, 0.0  ;;  %v2985_v38 = vpop.eup %2984  ;;  %2992 = vlog2.f32 %v6649_v29  ;;  %v1186_v12 = vmul.f32 0.6931472, %v2981_v47  ;;  %v2621_v21 = vsel %vm2139_vm12, %v2747_v3, 0.0  ;;  %v6653_v47 = vld [vmem:[#allocation94_spill] sm:$0xff]  ;;  %v6655_v46 = vld [vmem:[#allocation96_spill] sm:$0xff] }
 0x362   :  { %6648 = vst [vmem:[#allocation20_spill] sm:$0xff] %v5080_v8  ;;  %2994 = vlog2.f32 %v6650_v31  ;;  %vm6367_vm5 = vcmp.ne.s32.totalorder %v5090_v32, 4294967295  ;;  %v1188_v42 = vmul.f32 0.6931472, %v2983_v30  ;;  %v1741_v36 = vsel %vm536_vm0, %v1601_v44, 0.0  ;;  %v3088_v3 = vld [vmem:[%s6172_s0 + $0x140] sm:$0xff] }
 0x363   :  { %2996 = vlog2.f32 %v6652_v20  ;;  %v2748_v11 = vsel %vm6367_vm5, 1.0, %v6578_v57  ;;  %v1190_v31 = vmul.f32 0.6931472, %v2985_v38  ;;  %v1603_v16 = vsel %vm1539_vm9, %v3088_v3, 0.0  ;;  %v6654_v30 = vld [vmem:[#allocation95_spill] sm:$0xff]  ;;  %v3089_v38 = vld [vmem:[%s6172_s0 + $0x1b8] sm:$0xff] }
 0x364   :  { %v1474_v52 = vpop.permute.xlu0 %1473  ;;  %2998 = vlog2.f32 %v6653_v47  ;;  %1742 = vadd.xlane.f32.xlu1 %v1741_v36  ;;  %v2622_v9 = vadd.f32 %v2621_v21, %v2620_v23  ;;  %vm1541_vm5 = vcmp.eq.s32.totalorder %v4075_v33, %v4730_v13  ;;  %v2623_v29 = vsel %vm2139_vm12, %v2748_v11, 0.0  ;;  %v5114_v20 = vld [vmem:[%s6173_s1 + $0x158] sm:$0xff]  ;;  %6737 = vst [vmem:[#allocation88_spill] sm:$0xff] %v5498_v34 }
 0x365   :  { %vm1554_vm7 = vcmp.eq.s32.totalorder %v4075_v33, %v1474_v52  ;;  %3000 = vlog2.f32 %v6654_v30  ;;  %6656 = vst [vmem:[#allocation71_spill] sm:$0xff] %v5114_v20  ;;  %vm6372_vm9 = vcmp.ne.s32.totalorder %v5114_v20, 4294967295  ;;  %v6657_v36 = vld [vmem:[#allocation97_spill] sm:$0xff]  ;;  %v1747_v47 = vsel %vm536_vm0, %v1603_v16, 0.0  ;;  %v6662_v16 = vld [vmem:[#allocation43_spill] sm:$0xff]  ;;  %v6664_v20 = vld [vmem:[#allocation44_spill] sm:$0xff] }
 0x366   :  { %v1618_v44 = vsel %vm1554_vm7, %v3089_v38, 0.0  ;;  %3002 = vlog2.f32 %v6655_v46  ;;  %v2987_v23 = vpop.eup %2986  ;;  %v2749_v52 = vsel %vm6372_vm9, 1.0, %v6578_v57  ;;  %v6658_v3 = vld [vmem:[#allocation41_spill] sm:$0xff]  ;;  %v5141_v8 = vadd.f32 %v1184_v61, %v6664_v20  ;;  %v6672_v20 = vld [vmem:[#allocation47_spill] sm:$0xff] }
 0x367   :  { %v1792_v21 = vsel %vm536_vm0, %v1618_v44, 0.0  ;;  %3004 = vlog2.f32 %v6657_v36  ;;  %v5126_v30 = vadd.f32 %v1178_v50, %v6658_v3  ;;  %v2989_v38 = vpop.eup %2988  ;;  %v3091_v44 = vld [vmem:[%s6172_s0 + $0x150] sm:$0xff]  ;;  %v6660_v36 = vld [vmem:[#allocation42_spill] sm:$0xff]  ;;  %vm1543_vm7 = vcmp.eq.s32.totalorder %v4075_v33, %v4785_v35 }
 0x368   :  { %1793 = vadd.xlane.f32.xlu0 %v1792_v21  ;;  %v5123_v11 = vpop.permute.xlu0 %1476  ;;  %v1605_v46 = vsel %vm1541_vm5, %v3091_v44, 0.0  ;;  %1748 = vadd.xlane.f32.xlu1 %v1747_v47  ;;  %v5135_v32 = vadd.f32 %v1180_v59, %v6660_v36  ;;  %v5138_v21 = vadd.f32 %v1182_v62, %v6662_v16  ;;  %6665 = vst [vmem:[#allocation74_spill] sm:$0xff] %v5141_v8  ;;  %v2991_v50 = vpop.eup %2990  ;;  %v6666_v3 = vld [vmem:[#allocation98_spill] sm:$0xff]  ;;  %v2625_v47 = vsel %vm2139_vm12, %v2749_v52, 0.0 }
 0x369   :  { %6659 = vst [vmem:[#allocation72_spill] sm:$0xff] %v5126_v30  ;;  %3006 = vlog2.f32 %v6666_v3  ;;  %v2624_v30 = vadd.f32 %v2623_v29, %v2622_v9  ;;  %v5147_v13 = vadd.f32 %v1186_v12, %v6667_v51  ;;  %v5153_v62 = vld [vmem:[%s6173_s1 + $0x160] sm:$0xff]  ;;  %v5160_v9 = vadd.f32 %v1190_v31, %v6672_v20  ;;  %v6676_v20 = vld [vmem:[#allocation101_spill] sm:$0xff] }
 0x36a   :  { %6661 = vst [vmem:[#allocation22_spill] sm:$0xff] %v5135_v32  ;;  %6663 = vst [vmem:[#allocation73_spill] sm:$0xff] %v5138_v21  ;;  %vm6373_vm5 = vcmp.ne.s32.totalorder %v5153_v62, 4294967295  ;;  %v6670_v59 = vld [vmem:[#allocation46_spill] sm:$0xff]  ;;  %v1192_v44 = vmul.f32 0.6931472, %v2987_v23 }
 0x36b   :  { %6668 = vst [vmem:[#allocation75_spill] sm:$0xff] %v5147_v13  ;;  %6669 = vst [vmem:[#allocation76_spill] sm:$0xff] %v5153_v62  ;;  %v5157_v61 = vadd.f32 %v1188_v42, %v6670_v59  ;;  %v2993_v29 = vpop.eup %2992  ;;  %v1194_v36 = vmul.f32 0.6931472, %v2989_v38  ;;  %v2750_v51 = vsel %vm6373_vm5, 1.0, %v6578_v57  ;;  %v1753_v12 = vsel %vm536_vm0, %v1605_v46, 0.0 }
 0x36c   :  { %6673 = vst [vmem:[#allocation23_spill] sm:$0xff] %v5160_v9  ;;  %v1480_v52 = vpop.permute.xlu0 %1479  ;;  %v2995_v16 = vpop.eup %2994  ;;  %v1196_v3 = vmul.f32 0.6931472, %v2991_v50  ;;  %v6674_v13 = vld [vmem:[#allocation99_spill] sm:$0xff]  ;;  %v3093_v42 = vld [vmem:[%s6172_s0 + $0x160] sm:$0xff]  ;;  %1754 = vadd.xlane.f32.xlu1 %v1753_v12  ;;  %v6675_v38 = vld [vmem:[#allocation100_spill] sm:$0xff]  ;;  %v2626_v46 = vadd.f32 %v2625_v47, %v2624_v30  ;;  %vm1545_vm5 = vcmp.eq.s32.totalorder %v4075_v33, %v4837_v6 }
 0x36d   :  { %6671 = vst [vmem:[#allocation77_spill] sm:$0xff] %v5157_v61  ;;  %3008 = vlog2.f32 %v6674_v13  ;;  %v1607_v31 = vsel %vm1543_vm7, %v3093_v42, 0.0  ;;  %vm1556_vm9 = vcmp.eq.s32.totalorder %v4075_v33, %v1480_v52  ;;  %v2997_v23 = vpop.eup %2996  ;;  %v3094_v50 = vld [vmem:[%s6172_s0 + $0x1c8] sm:$0xff]  ;;  %v2627_v35 = vsel %vm2139_vm12, %v2750_v51, 0.0  ;;  %v6678_v52 = vld [vmem:[#allocation102_spill] sm:$0xff]  ;;  %v5218_v6 = vld [vmem:[%s6173_s1 + $0x170] sm:$0xff] }
 0x36e   :  { %3010 = vlog2.f32 %v6675_v38  ;;  %v1620_v13 = vsel %vm1556_vm9, %v3094_v50, 0.0  ;;  %v2999_v59 = vpop.eup %2998  ;;  %v5185_v12 = vld [vmem:[%s6173_s1 + $0x168] sm:$0xff]  ;;  %v1759_v38 = vsel %vm536_vm0, %v1607_v31, 0.0  ;;  %v6679_v50 = vld [vmem:[#allocation48_spill] sm:$0xff]  ;;  %v1198_v9 = vmul.f32 0.6931472, %v2993_v29 }
 0x36f   :  { %3012 = vlog2.f32 %v6676_v20  ;;  %6677 = vst [vmem:[#allocation24_spill] sm:$0xff] %v5185_v12  ;;  %vm6378_vm7 = vcmp.ne.s32.totalorder %v5185_v12, 4294967295  ;;  %v1798_v30 = vsel %vm536_vm0, %v1620_v13, 0.0  ;;  %v3001_v47 = vpop.eup %3000  ;;  %v5197_v20 = vadd.f32 %v1192_v44, %v6679_v50  ;;  %v6681_v61 = vld [vmem:[#allocation103_spill] sm:$0xff]  ;;  %v3096_v13 = vld [vmem:[%s6172_s0 + $0x170] sm:$0xff]  ;;  %v6682_v31 = vld [vmem:[#allocation49_spill] sm:$0xff] }
 0x370   :  { %3014 = vlog2.f32 %v6678_v52  ;;  %v2751_v42 = vsel %vm6378_vm7, 1.0, %v6578_v57  ;;  %1799 = vadd.xlane.f32.xlu0 %v1798_v30  ;;  %v5194_v51 = vpop.permute.xlu0 %1482  ;;  %v3003_v62 = vpop.eup %3002  ;;  %v1609_v52 = vsel %vm1545_vm5, %v3096_v13, 0.0  ;;  %1760 = vadd.xlane.f32.xlu1 %v1759_v38  ;;  %v5207_v30 = vadd.f32 %v1194_v36, %v6682_v31  ;;  %v6684_v29 = vld [vmem:[#allocation50_spill] sm:$0xff]  ;;  %6686 = vst [vmem:[#allocation26_spill] sm:$0xff] %v5218_v6  ;;  %v6687_v38 = vld [vmem:[#allocation104_spill] sm:$0xff] }
 0x371   :  { %6680 = vst [vmem:[#allocation25_spill] sm:$0xff] %v5197_v20  ;;  %3016 = vlog2.f32 %v6681_v61  ;;  %v3005_v12 = vpop.eup %3004  ;;  %v1200_v8 = vmul.f32 0.6931472, %v2995_v16  ;;  %v2628_v44 = vadd.f32 %v2627_v35, %v2626_v46  ;;  %vm1547_vm9 = vcmp.eq.s32.totalorder %v4075_v33, %v4891_v48  ;;  %v5243_v48 = vld [vmem:[%s6173_s1 + $0x178] sm:$0xff] }
 0x372   :  { %6683 = vst [vmem:[#allocation78_spill] sm:$0xff] %v5207_v30  ;;  %v5212_v61 = vadd.f32 %v1196_v3, %v6684_v29  ;;  %v1202_v50 = vmul.f32 0.6931472, %v2997_v23  ;;  %v1204_v21 = vmul.f32 0.6931472, %v2999_v59  ;;  %v2629_v32 = vsel %vm2139_vm12, %v2751_v42, 0.0 }
 0x373   :  { %vm6379_vm5 = vcmp.ne.s32.totalorder %v5218_v6, 4294967295  ;;  %v3007_v36 = vpop.eup %3006  ;;  %v1206_v16 = vmul.f32 0.6931472, %v3001_v47  ;;  %v1208_v46 = vmul.f32 0.6931472, %v3003_v62  ;;  %v1765_v3 = vsel %vm536_vm0, %v1609_v52, 0.0 }
 0x374   :  { %6685 = vst [vmem:[#allocation79_spill] sm:$0xff] %v5212_v61  ;;  %v2752_v35 = vsel %vm6379_vm5, 1.0, %v6578_v57  ;;  %v1486_v23 = vpop.permute.xlu0 %1485  ;;  %v1210_v59 = vmul.f32 0.6931472, %v3005_v12  ;;  %3018 = vlog2.f32 %v6687_v38  ;;  %v3098_v42 = vld [vmem:[%s6172_s0 + $0x180] sm:$0xff]  ;;  %1766 = vadd.xlane.f32.xlu1 %v1765_v3  ;;  %v6688_v62 = vld [vmem:[#allocation105_spill] sm:$0xff]  ;;  %v2630_v47 = vadd.f32 %v2629_v32, %v2628_v44 }
 0x375   :  { %v1611_v13 = vsel %vm1547_vm9, %v3098_v42, 0.0  ;;  %vm1558_vm7 = vcmp.eq.s32.totalorder %v4075_v33, %v1486_v23  ;;  %3020 = vlog2.f32 %v6688_v62  ;;  %vm1549_vm5 = vcmp.eq.s32.totalorder %v4075_v33, %v4952_v4  ;;  %v3099_v12 = vld [vmem:[%s6172_s0 + $0x1d8] sm:$0xff]  ;;  %6689 = vst [vmem:[#allocation27_spill] sm:$0xff] %v5243_v48  ;;  %v5250_v23 = vpop.xlane.xlu1 %1649  ;;  %v6690_v42 = vld [vmem:[#allocation52_spill] sm:$0xff] }
 0x376   :  { %v1622_v52 = vsel %vm1558_vm7, %v3099_v12, 0.0  ;;  %v1212_v29 = vmul.f32 0.6931472, %v3007_v36  ;;  %v2631_v38 = vsel %vm2139_vm12, %v2752_v35, 0.0  ;;  %vm6384_vm9 = vcmp.ne.s32.totalorder %v5243_v48, 4294967295  ;;  %v6692_v12 = vld [vmem:[#allocation51_spill] sm:$0xff] }
 0x377   :  { %v3009_v31 = vpop.eup %3008  ;;  %v1804_v32 = vsel %vm536_vm0, %v1622_v52, 0.0  ;;  %v2753_v3 = vsel %vm6384_vm9, 1.0, %v6578_v57  ;;  %v1771_v36 = vsel %vm536_vm0, %v1611_v13, 0.0  ;;  %v5256_v62 = vadd.f32 %v1200_v8, %v6690_v42  ;;  %v3101_v52 = vld [vmem:[%s6172_s0 + $0x190] sm:$0xff]  ;;  %v6694_v13 = vld [vmem:[#allocation54_spill] sm:$0xff]  ;;  %v6695_v61 = vld [vmem:[#allocation53_spill] sm:$0xff] }
 0x378   :  { %v3011_v44 = vpop.eup %3010  ;;  %1805 = vadd.xlane.f32.xlu0 %v1804_v32  ;;  %v5253_v35 = vpop.permute.xlu0 %1488  ;;  %v5259_v6 = vadd.f32 %v1198_v9, %v6692_v12  ;;  %v1613_v48 = vsel %vm1549_vm5, %v3101_v52, 0.0  ;;  %1772 = vadd.xlane.f32.xlu1 %v1771_v36  ;;  %v5268_v32 = vadd.f32 %v1204_v21, %v6694_v13  ;;  %v5271_v20 = vadd.f32 %v1202_v50, %v6695_v61  ;;  %v6697_v8 = vld [vmem:[#allocation55_spill] sm:$0xff]  ;;  %v6701_v4 = vld [vmem:[#allocation57_spill] sm:$0xff]  ;;  %v5288_v61 = vld [vmem:[%s6173_s1 + $0x180] sm:$0xff] }
 0x379   :  { %6691 = vst [vmem:[#allocation28_spill] sm:$0xff] %v5256_v62  ;;  %v3013_v30 = vpop.eup %3012  ;;  %v5274_v42 = vadd.f32 %v1206_v16, %v6697_v8  ;;  %v2632_v12 = vadd.f32 %v2631_v38, %v2630_v47  ;;  %vm1551_vm7 = vcmp.eq.s32.totalorder %v4075_v33, %v4999_v26  ;;  %v5282_v52 = vadd.f32 %v1210_v59, %v6701_v4  ;;  %v6704_v50 = vld [vmem:[#allocation58_spill] sm:$0xff]  ;;  %v5306_v4 = vpop.xlane.xlu1 %1652 }
 0x37a   :  { %6693 = vst [vmem:[#allocation29_spill] sm:$0xff] %v5259_v6  ;;  %6696 = vst [vmem:[#allocation80_spill] sm:$0xff] %v5271_v20  ;;  %v3015_v9 = vpop.eup %3014  ;;  %v6699_v6 = vld [vmem:[#allocation56_spill] sm:$0xff]  ;;  %v1214_v21 = vmul.f32 0.6931472, %v3009_v31  ;;  %v2633_v13 = vsel %vm2139_vm12, %v2753_v3, 0.0  ;;  %v5292_v16 = vadd.f32 %v1212_v29, %v6704_v50 }
 0x37b   :  { %6698 = vst [vmem:[#allocation30_spill] sm:$0xff] %v5274_v42  ;;  %v5279_v62 = vadd.f32 %v1208_v46, %v6699_v6  ;;  %6702 = vst [vmem:[#allocation82_spill] sm:$0xff] %v5282_v52  ;;  %v3017_v36 = vpop.eup %3016  ;;  %vm6385_vm5 = vcmp.ne.s32.totalorder %v5288_v61, 4294967295  ;;  %v1216_v47 = vmul.f32 0.6931472, %v3011_v44  ;;  %v1777_v59 = vsel %vm536_vm0, %v1613_v48, 0.0 }
 0x37c   :  { %6703 = vst [vmem:[#allocation83_spill] sm:$0xff] %v5288_v61  ;;  %6705 = vst [vmem:[#allocation84_spill] sm:$0xff] %v5292_v16  ;;  %v1218_v6 = vmul.f32 0.6931472, %v3013_v30  ;;  %v2754_v46 = vsel %vm6385_vm5, 1.0, %v6578_v57  ;;  %v1492_v31 = vpop.permute.xlu0 %1491  ;;  %v6706_v3 = vld [vmem:[#allocation106_spill] sm:$0xff]  ;;  %1778 = vadd.xlane.f32.xlu1 %v1777_v59  ;;  %v2634_v44 = vadd.f32 %v2633_v13, %v2632_v12  ;;  %vm1553_vm5 = vcmp.eq.s32.totalorder %v4075_v33, %v5071_v14 }
 0x37d   :  { %6700 = vst [vmem:[#allocation81_spill] sm:$0xff] %v5279_v62  ;;  %v1220_v38 = vmul.f32 0.6931472, %v3015_v9  ;;  %3022 = vlog2.f32 %v6706_v3  ;;  %v3103_v8 = vld [vmem:[%s6172_s0 + $0x1a0] sm:$0xff]  ;;  %vm1560_vm9 = vcmp.eq.s32.totalorder %v4075_v33, %v1492_v31  ;;  %v1222_v30 = vmul.f32 0.6931472, %v3017_v36 }
 0x37e   :  { %v1615_v29 = vsel %vm1551_vm7, %v3103_v8, 0.0  ;;  %v3104_v48 = vld [vmem:[%s6172_s0 + $0x1e8] sm:$0xff]  ;;  %v3019_v50 = vpop.eup %3018  ;;  %v2635_v26 = vsel %vm2139_vm12, %v2754_v46, 0.0  ;;  %v6709_v59 = vld [vmem:[#allocation108_spill] sm:$0xff]  ;;  %v6712_v61 = vld [vmem:[#allocation109_spill] sm:$0xff] }
 0x37f   :  { %v1624_v9 = vsel %vm1560_vm9, %v3104_v48, 0.0  ;;  %v6707_v3 = vld [vmem:[#allocation107_spill] sm:$0xff]  ;;  %v3021_v13 = vpop.eup %3020  ;;  %v1783_v8 = vsel %vm536_vm0, %v1615_v29, 0.0  ;;  %v6713_v52 = vld [vmem:[#allocation60_spill] sm:$0xff]  ;;  %v6715_v29 = vld [vmem:[#allocation61_spill] sm:$0xff]  ;;  %v2636_v20 = vadd.f32 %v2635_v26, %v2634_v44  ;;  %vm1555_vm9 = vcmp.eq.s32.totalorder %v4075_v33, %v5123_v11 }
 0x380   :  { %3024 = vlog2.f32 %v6707_v3  ;;  %v5318_v36 = vld [vmem:[%s6173_s1 + $0x188] sm:$0xff]  ;;  %v1810_v12 = vsel %vm536_vm0, %v1624_v9, 0.0  ;;  %v5327_v46 = vpop.permute.xlu0 %1494  ;;  %v3106_v9 = vld [vmem:[%s6172_s0 + $0x1b0] sm:$0xff]  ;;  %1784 = vadd.xlane.f32.xlu1 %v1783_v8  ;;  %v5340_v42 = vadd.f32 %v1216_v47, %v6713_v52  ;;  %v1224_v14 = vmul.f32 0.6931472, %v3019_v50  ;;  %v6723_v44 = vld [vmem:[#allocation129_spill] sm:$0xff] }
 0x381   :  { %6708 = vst [vmem:[#allocation85_spill] sm:$0xff] %v5318_v36  ;;  %vm6390_vm7 = vcmp.ne.s32.totalorder %v5318_v36, 4294967295  ;;  %3026 = vlog2.f32 %v6709_v59  ;;  %1811 = vadd.xlane.f32.xlu0 %v1810_v12  ;;  %v6710_v48 = vld [vmem:[#allocation59_spill] sm:$0xff]  ;;  %v1617_v59 = vsel %vm1553_vm5, %v3106_v9, 0.0  ;;  %v5343_v12 = vadd.f32 %v1218_v6, %v6715_v29  ;;  %v5359_v47 = vld [vmem:[%s6173_s1 + $0x190] sm:$0xff]  ;;  %v6722_v6 = vld [vmem:[#allocation110_spill] sm:$0xff] }
 0x382   :  { %v2755_v31 = vsel %vm6390_vm7, 1.0, %v6578_v57  ;;  %v5330_v3 = vadd.f32 %v1214_v21, %v6710_v48  ;;  %3028 = vlog2.f32 %v6712_v61  ;;  %6714 = vst [vmem:[#allocation87_spill] sm:$0xff] %v5340_v42  ;;  %v5347_v21 = vpop.xlane.xlu1 %1655  ;;  %v6717_v61 = vld [vmem:[#allocation62_spill] sm:$0xff]  ;;  %v1226_v8 = vmul.f32 0.6931472, %v3021_v13  ;;  %6721 = vst [vmem:[#allocation34_spill] sm:$0xff] %v5359_v47 }
 0x383   :  { %6716 = vst [vmem:[#allocation31_spill] sm:$0xff] %v5343_v12  ;;  %v5350_v48 = vadd.f32 %v1220_v38, %v6717_v61  ;;  %v2637_v52 = vsel %vm2139_vm12, %v2755_v31, 0.0  ;;  %vm6391_vm5 = vcmp.ne.s32.totalorder %v5359_v47, 4294967295  ;;  %3030 = vlog2.f32 %v6722_v6  ;;  %v3109_v29 = vld [vmem:[%s6172_s0 + $0x1f8] sm:$0xff]  ;;  %v6724_v11 = vld [vmem:[#allocation111_spill] sm:$0xff] }
 0x384   :  { %6711 = vst [vmem:[#allocation86_spill] sm:$0xff] %v5330_v3  ;;  %v6719_v3 = vld [vmem:[#allocation2_spill] sm:$0xff]  ;;  %v1819_v38 = vsub.f32 %v4733_v58, %v6723_v44  ;;  %v1789_v50 = vsel %vm536_vm0, %v1617_v59, 0.0  ;;  %v1498_v26 = vpop.permute.xlu0 %1497  ;;  %v1947_v13 = vsub.f32 1.0, %v6723_v44  ;;  %v1948_v31 = vsub.f32 1.0, %v4440_v19 }
 0x385   :  { %6718 = vst [vmem:[#allocation32_spill] sm:$0xff] %v5350_v48  ;;  %v5353_v36 = vadd.f32 %v1222_v30, %v6719_v3  ;;  %v2756_v30 = vsel %vm6391_vm5, 1.0, %v6578_v57  ;;  %v3108_v3 = vld [vmem:[%s6172_s0 + $0x1c0] sm:$0xff]  ;;  %1790 = vadd.xlane.f32.xlu1 %v1789_v50  ;;  %vm1562_vm7 = vcmp.eq.s32.totalorder %v4075_v33, %v1498_v26  ;;  %v1820_v58 = vsub.f32 %v4736_v18, %v4440_v19  ;;  %v5392_v19 = vld [vmem:[%s6173_s1 + $0x198] sm:$0xff]  ;;  %v6726_v18 = vld [vmem:[#allocation3_spill] sm:$0xff] }
 0x386   :  { %v1619_v9 = vsel %vm1555_vm9, %v3108_v3, 0.0  ;;  %v2638_v59 = vadd.f32 %v2637_v52, %v2636_v20  ;;  %vm1557_vm5 = vcmp.eq.s32.totalorder %v4075_v33, %v5194_v51  ;;  %v1626_v61 = vsel %vm1562_vm7, %v3109_v29, 0.0  ;;  %v5385_v6 = vpop.xlane.xlu1 %1658  ;;  %6725 = vst [vmem:[#allocation35_spill] sm:$0xff] %v5392_v19  ;;  %v6728_v29 = vld [vmem:[#allocation4_spill] sm:$0xff] }
 0x387   :  { %6720 = vst [vmem:[#allocation33_spill] sm:$0xff] %v5353_v36  ;;  %v3023_v44 = vpop.eup %3022  ;;  %3032 = vlog2.f32 %v6724_v11  ;;  %v2639_v50 = vsel %vm2139_vm12, %v2756_v30, 0.0  ;;  %vm395_vm9 = vcmp.ne.s32.totalorder %v5392_v19, 4294967295  ;;  %v5396_v20 = vadd.f32 %v1224_v14, %v6726_v18  ;;  %v3111_v14 = vld [vmem:[%s6172_s0 + $0x1d0] sm:$0xff] }
 0x388   :  { %v2757_v52 = vsel %vm395_vm9, 1.0, %v6578_v57  ;;  %v1795_v26 = vsel %vm536_vm0, %v1619_v9, 0.0  ;;  %v1816_v3 = vsel %vm536_vm0, %v1626_v61, 0.0  ;;  %v5404_v30 = vadd.f32 %v1226_v8, %v6728_v29  ;;  %v6732_v29 = vld [vmem:[#allocation130_spill] sm:$0xff]  ;;  %v3115_v19 = vld [vmem:[%s6172_s0 + $0x1f0] sm:$0xff] }
 0x389   :  { %6727 = vst [vmem:[#allocation36_spill] sm:$0xff] %v5396_v20  ;;  %v1883_v12 = vsel %vm344_vm11, %v1819_v38, 0.0  ;;  %v2011_v47 = vmul.f32 %v1947_v13, %v1947_v13  ;;  %v2012_v48 = vmul.f32 %v1948_v31, %v1948_v31  ;;  %v1621_v18 = vsel %vm1557_vm5, %v3111_v14, 0.0  ;;  %1796 = vadd.xlane.f32.xlu1 %v1795_v26  ;;  %1817 = vadd.xlane.f32.xlu0 %v1816_v3 }
 0x38a   :  { %6729 = vst [vmem:[#allocation37_spill] sm:$0xff] %v5404_v30  ;;  %v3025_v11 = vpop.eup %3024  ;;  %v1884_v61 = vsel %vm345_vm10, %v1820_v58, 0.0  ;;  %v1949_v30 = vsub.f32 1.0, %v6732_v29  ;;  %v2640_v38 = vadd.f32 %v2639_v50, %v2638_v59  ;;  %vm1559_vm7 = vcmp.eq.s32.totalorder %v4075_v33, %v5253_v35  ;;  %v5421_v13 = vpop.xlane.xlu1 %1661  ;;  %v5432_v58 = vld [vmem:[%s6173_s1 + $0x1a0] sm:$0xff] }
 0x38b   :  { %v5414_v9 = vpop.eup %3026  ;;  %v1821_v51 = vsub.f32 %v4739_v55, %v6732_v29  ;;  %v1950_v26 = vsub.f32 1.0, %v4447_v56  ;;  %v2641_v3 = vsel %vm2139_vm12, %v2757_v52, 0.0  ;;  %6733 = vst [vmem:[#allocation38_spill] sm:$0xff] %v5432_v58  ;;  %vm396_vm5 = vcmp.ne.s32.totalorder %v5432_v58, 4294967295 }
 0x38c   :  { %v5423_v31 = vpop.eup %3028  ;;  %v1228_v59 = vmul.f32 0.6931472, %v3023_v44  ;;  %v2140_v50 = vsel %vm2139_vm12, %v1883_v12, 0.0  ;;  %v2758_v14 = vsel %vm396_vm5, 1.0, %v6578_v57  ;;  %v1801_v55 = vsel %vm536_vm0, %v1621_v18, 0.0  ;;  %v3113_v44 = vld [vmem:[%s6172_s0 + $0x1e0] sm:$0xff] }
 0x38d   :  { %v2075_v29 = vsel %vm344_vm11, %v2011_v47, 0.0  ;;  %v2076_v52 = vsel %vm345_vm10, %v2012_v48, 0.0  ;;  %v2141_v20 = vsel %vm2139_vm12, %v1884_v61, 0.0  ;;  %v1623_v12 = vsel %vm1559_vm7, %v3113_v44, 0.0  ;;  %1802 = vadd.xlane.f32.xlu1 %v1801_v55  ;;  %v5451_v58 = vpop.eup %3030  ;;  %v5465_v55 = vld [vmem:[%s6173_s1 + $0x1a8] sm:$0xff] }
 0x38e   :  { %v2013_v18 = vmul.f32 %v1949_v30, %v1949_v30  ;;  %v1822_v36 = vsub.f32 %v4752_v15, %v4447_v56  ;;  %v2642_v47 = vadd.f32 %v2641_v3, %v2640_v38  ;;  %vm1561_vm10 = vcmp.eq.s32.totalorder %v4075_v33, %v5327_v46  ;;  %v5457_v48 = vpop.xlane.xlu1 %1664  ;;  %6734 = vst [vmem:[#allocation39_spill] sm:$0xff] %v5465_v55  ;;  %v6735_v15 = vld [vmem:[#allocation131_spill] sm:$0xff] }
 0x38f   :  { %v1885_v8 = vsel %vm346_vm13, %v1821_v51, 0.0  ;;  %v2014_v61 = vmul.f32 %v1950_v26, %v1950_v26  ;;  %v2643_v35 = vsel %vm2139_vm12, %v2758_v14, 0.0  ;;  %vm397_vm11 = vcmp.ne.s32.totalorder %v5465_v55, 4294967295 }
 0x390   :  { %v1230_v56 = vmul.f32 0.6931472, %v3025_v11  ;;  %v1951_v30 = vsub.f32 1.0, %v6735_v15  ;;  %v2759_v38 = vsel %vm397_vm11, 1.0, %v6578_v57  ;;  %v1807_v3 = vsel %vm536_vm0, %v1623_v12, 0.0 }
 0x391   :  { %v5473_v51 = vpop.eup %3032  ;;  %v2276_v26 = vsel %vm2139_vm12, %v2075_v29, 0.0  ;;  %v2142_v14 = vadd.f32 %v2141_v20, %v2140_v50  ;;  %v2277_v44 = vsel %vm2139_vm12, %v2076_v52, 0.0  ;;  %v1625_v11 = vsel %vm1561_vm10, %v3115_v19, 0.0  ;;  %1808 = vadd.xlane.f32.xlu1 %v1807_v3 }
 0x392   :  { %v2077_v55 = vsel %vm346_vm13, %v2013_v18, 0.0  ;;  %v2143_v12 = vsel %vm2139_vm12, %v1885_v8, 0.0  ;;  %v1886_v29 = vsel %vm347_vm14, %v1822_v36, 0.0  ;;  %v2644_v20 = vadd.f32 %v2643_v35, %v2642_v47  ;;  %v5488_v50 = vpop.xlane.xlu1 %1667  ;;  %v6738_v18 = vld [vmem:[#allocation132_spill] sm:$0xff]  ;;  %v6740_v35 = vld [vmem:[#allocation5_spill] sm:$0xff] }
 0x393   :  { %v2078_v52 = vsel %vm347_vm14, %v2014_v61, 0.0  ;;  %v1823_v16 = vsub.f32 %v4779_v54, %v6735_v15  ;;  %v2645_v46 = vsel %vm2139_vm12, %v2759_v38, 0.0  ;;  %vm398_vm13 = vcmp.ne.s32.totalorder %v5498_v34, 4294967295  ;;  %v6739_v8 = vld [vmem:[#allocation112_spill] sm:$0xff] }
 0x394   :  { %v2015_v19 = vmul.f32 %v1951_v30, %v1951_v30  ;;  %v1952_v36 = vsub.f32 1.0, %v6738_v18  ;;  %v2760_v42 = vsel %vm398_vm13, 1.0, %v6578_v57  ;;  %v1813_v47 = vsel %vm536_vm0, %v1625_v11, 0.0 }
 0x395   :  { %3034 = vlog2.f32 %v6739_v8  ;;  %v2278_v54 = vadd.f32 %v2277_v44, %v2276_v26  ;;  %v2279_v61 = vsel %vm2139_vm12, %v2077_v55, 0.0  ;;  %1814 = vadd.xlane.f32.xlu1 %v1813_v47  ;;  %v5509_v15 = vadd.f32 %v1228_v59, %v6740_v35  ;;  %v5523_v59 = vld [vmem:[%s6173_s1 + $0x1b8] sm:$0xff] }
 0x396   :  { %v2144_v38 = vadd.f32 %v2143_v12, %v2142_v14  ;;  %v2145_v30 = vsel %vm2139_vm12, %v1886_v29, 0.0  ;;  %v2281_v3 = vsel %vm2139_vm12, %v2078_v52, 0.0  ;;  %v2646_v33 = vadd.f32 %v2645_v46, %v2644_v20  ;;  %v5513_v62 = vpop.xlane.xlu1 %1670  ;;  %v6742_v52 = vld [vmem:[#allocation6_spill] sm:$0xff] }
 0x397   :  { %v1887_v11 = vsel %vm348_vm15, %v1823_v16, 0.0  ;;  %v1824_v26 = vsub.f32 %v4788_v39, %v6738_v18  ;;  %v2647_v55 = vsel %vm2139_vm12, %v2760_v42, 0.0  ;;  %vm399_vm0 = vcmp.ne.s32.totalorder %v5523_v59, 4294967295 }
 0x398   :  { %v2280_v14 = vadd.f32 %v2279_v61, %v2278_v54  ;;  %v2079_v44 = vsel %vm348_vm15, %v2015_v19, 0.0  ;;  %v2016_v12 = vmul.f32 %v1952_v36, %v1952_v36  ;;  %v2761_v16 = vsel %vm399_vm0, 1.0, %v6578_v57 }
 0x399   :  { %v1232_v39 = vmul.f32 0.6931472, %v5414_v9  ;;  %v1234_v29 = vmul.f32 0.6931472, %v5423_v31  ;;  %v1953_v20 = vsub.f32 1.0, %v4462_v1  ;;  %v5535_v46 = vadd.f32 %v1230_v56, %v6742_v52  ;;  %v5547_v31 = vld [vmem:[%s6173_s1 + $0x1c0] sm:$0xff] }
 0x39a   :  { %v2146_v18 = vadd.f32 %v2145_v30, %v2144_v38  ;;  %v2282_v42 = vadd.f32 %v2281_v3, %v2280_v14  ;;  %v2147_v47 = vsel %vm2139_vm12, %v1887_v11, 0.0  ;;  %v2648_v34 = vadd.f32 %v2647_v55, %v2646_v33  ;;  %v5538_v19 = vpop.xlane.xlu1 %1673  ;;  %v6744_v3 = vld [vmem:[#allocation7_spill] sm:$0xff] }
 0x39b   :  { %v2283_v36 = vsel %vm2139_vm12, %v2079_v44, 0.0  ;;  %v1888_v54 = vsel %vm349_vm1, %v1824_v26, 0.0  ;;  %v2649_v9 = vsel %vm2139_vm12, %v2761_v16, 0.0  ;;  %vm400_vm14 = vcmp.ne.s32.totalorder %v5547_v31, 4294967295  ;;  %v6745_v26 = vld [vmem:[#allocation8_spill] sm:$0xff] }
 0x39c   :  { %v2080_v56 = vsel %vm349_vm1, %v2016_v12, 0.0  ;;  %v1825_v33 = vsub.f32 %v4791_v22, %v4462_v1  ;;  %v2762_v61 = vsel %vm400_vm14, 1.0, %v6578_v57  ;;  %v1954_v35 = vsub.f32 1.0, %v5250_v23  ;;  %v5568_v1 = vld [vmem:[%s6173_s1 + $0x1c8] sm:$0xff] }
 0x39d   :  { %v1236_v38 = vmul.f32 0.6931472, %v5451_v58  ;;  %v2017_v30 = vmul.f32 %v1953_v20, %v1953_v20  ;;  %v5560_v11 = vadd.f32 %v1232_v39, %v6744_v3  ;;  %v5563_v55 = vadd.f32 %v1234_v29, %v6745_v26 }
 0x39e   :  { %v2148_v14 = vadd.f32 %v2147_v47, %v2146_v18  ;;  %v2284_v44 = vadd.f32 %v2283_v36, %v2282_v42  ;;  %v2650_v12 = vadd.f32 %v2649_v9, %v2648_v34  ;;  %vm401_vm15 = vcmp.ne.s32.totalorder %v5568_v1, 4294967295  ;;  %v5571_v22 = vpop.xlane.xlu1 %1676 }
 0x39f   :  { %6746 = vst [vmem:[#allocation89_spill] sm:$0xff] %v5563_v55  ;;  %v3035_v58 = vpop.eup %3034  ;;  %v2149_v16 = vsel %vm2139_vm12, %v1888_v54, 0.0  ;;  %v2285_v39 = vsel %vm2139_vm12, %v2080_v56, 0.0  ;;  %v2651_v29 = vsel %vm2139_vm12, %v2762_v61, 0.0  ;;  %v2763_v20 = vsel %vm401_vm15, 1.0, %v6578_v57 }
 0x3a0   :  { %v1889_v18 = vsel %vm350_vm2, %v1825_v33, 0.0  ;;  %v1826_v42 = vsub.f32 %v4794_v37, %v5250_v23  ;;  %v2018_v47 = vmul.f32 %v1954_v35, %v1954_v35  ;;  %v1955_v34 = vsub.f32 1.0, %v5306_v4  ;;  %v5593_v37 = vld [vmem:[%s6173_s1 + $0x1d0] sm:$0xff] }
 0x3a1   :  { %v1238_v36 = vmul.f32 0.6931472, %v5473_v51  ;;  %v2081_v8 = vsel %vm350_vm2, %v2017_v30, 0.0  ;;  %v1827_v54 = vsub.f32 %v4805_v25, %v5306_v4  ;;  %v1956_v9 = vsub.f32 1.0, %v5347_v21  ;;  %v5606_v4 = vld [vmem:[%s6173_s1 + $0x1d8] sm:$0xff] }
 0x3a2   :  { %v2150_v56 = vadd.f32 %v2149_v16, %v2148_v14  ;;  %v2286_v61 = vadd.f32 %v2285_v39, %v2284_v44  ;;  %v2652_v3 = vadd.f32 %v2651_v29, %v2650_v12  ;;  %vm6405_vm1 = vcmp.ne.s32.totalorder %v5593_v37, 4294967295  ;;  %v5596_v23 = vpop.xlane.xlu1 %1679  ;;  %v6750_v30 = vld [vmem:[#allocation9_spill] sm:$0xff]  ;;  %v6755_v12 = vld [vmem:[#allocation10_spill] sm:$0xff] }
 0x3a3   :  { %v2151_v51 = vsel %vm2139_vm12, %v1889_v18, 0.0  ;;  %v2653_v33 = vsel %vm2139_vm12, %v2763_v20, 0.0  ;;  %v2764_v25 = vsel %vm6405_vm1, 1.0, %v6578_v57  ;;  %vm403_vm2 = vcmp.ne.s32.totalorder %v5606_v4, 4294967295 }
 0x3a4   :  { %v2287_v35 = vsel %vm2139_vm12, %v2081_v8, 0.0  ;;  %v1890_v26 = vsel %vm351_vm3, %v1826_v42, 0.0  ;;  %v2082_v14 = vsel %vm351_vm3, %v2018_v47, 0.0  ;;  %v2019_v44 = vmul.f32 %v1955_v34, %v1955_v34 }
 0x3a5   :  { %v1891_v16 = vsel %vm352_vm4, %v1827_v54, 0.0  ;;  %v1828_v39 = vsub.f32 %v4840_v28, %v5347_v21  ;;  %v2020_v29 = vmul.f32 %v1956_v9, %v1956_v9  ;;  %v1957_v20 = vsub.f32 1.0, %v5385_v6 }
 0x3a6   :  { %v1240_v52 = vmul.f32 0.6931472, %v3035_v58  ;;  %v2654_v18 = vadd.f32 %v2653_v33, %v2652_v3  ;;  %v2765_v8 = vsel %vm403_vm2, 1.0, %v6578_v57  ;;  %v5622_v42 = vpop.xlane.xlu1 %1682  ;;  %v5625_v47 = vadd.f32 %v1236_v38, %v6750_v30  ;;  %v6751_v33 = vld [vmem:[#allocation133_spill] sm:$0xff] }
 0x3a7   :  { %v2152_v34 = vadd.f32 %v2151_v51, %v2150_v56  ;;  %v2288_v55 = vadd.f32 %v2287_v35, %v2286_v61  ;;  %v2153_v54 = vsel %vm2139_vm12, %v1890_v26, 0.0  ;;  %v2655_v28 = vsel %vm2139_vm12, %v2764_v25, 0.0 }
 0x3a8   :  { %v2289_v21 = vsel %vm2139_vm12, %v2082_v14, 0.0  ;;  %v2083_v58 = vsel %vm352_vm4, %v2019_v44, 0.0  ;;  %v2155_v9 = vsel %vm2139_vm12, %v1891_v16, 0.0  ;;  %v1829_v3 = vsub.f32 %v4849_v53, %v5385_v6  ;;  %v6754_v14 = vld [vmem:[#allocation11_spill] sm:$0xff] }
 0x3a9   :  { %vm6752_vm3 = vcmp.ne.s32.totalorder %v6751_v33, 4294967295  ;;  %v2021_v61 = vmul.f32 %v1957_v20, %v1957_v20  ;;  %v1958_v51 = vsub.f32 1.0, %v5421_v13  ;;  %v2154_v25 = vadd.f32 %v2153_v54, %v2152_v34  ;;  %v6756_v54 = vld [vmem:[#allocation117_spill] sm:$0xff] }
 0x3aa   :  { %v1892_v38 = vsel %vm6752_vm3, %v1828_v39, 0.0  ;;  %vm6753_vm7 = vmmov %vm6752_vm3  ;;  %v1959_v35 = vsub.f32 1.0, %v5457_v48  ;;  %v5641_v26 = vpop.xlane.xlu1 %1685  ;;  %v5644_v44 = vadd.f32 %v1240_v52, %v6754_v14  ;;  %v5647_v16 = vadd.f32 %v1238_v36, %v6755_v12 }
 0x3ab   :  { %v2084_v56 = vsel %vm6753_vm7, %v2020_v29, 0.0  ;;  %v2290_v53 = vadd.f32 %v2289_v21, %v2288_v55  ;;  %v2291_v6 = vsel %vm2139_vm12, %v2083_v58, 0.0  ;;  %v2656_v39 = vadd.f32 %v2655_v28, %v2654_v18 }
 0x3ac   :  { %v2657_v29 = vsel %vm2139_vm12, %v2765_v8, 0.0  ;;  %v2156_v20 = vadd.f32 %v2155_v9, %v2154_v25  ;;  %v2157_v30 = vsel %vm2139_vm12, %v1892_v38, 0.0  ;;  %v2293_v34 = vsel %vm2139_vm12, %v2084_v56, 0.0  ;;  %v5663_v8 = vld [vmem:[%s6173_s1 + $0x1e0] sm:$0xff] }
 0x3ad   :  { %vm6757_vm4 = vcmp.ne.s32.totalorder %v6756_v54, 4294967295  ;;  %v1830_v36 = vsub.f32 %v4852_v49, %v5421_v13  ;;  %v2022_v55 = vmul.f32 %v1958_v51, %v1958_v51  ;;  %v1960_v21 = vsub.f32 1.0, %v5488_v50  ;;  %v5676_v13 = vld [vmem:[%s6173_s1 + $0x1e8] sm:$0xff]  ;;  %v6759_v51 = vld [vmem:[#allocation134_spill] sm:$0xff] }
 0x3ae   :  { %v1893_v33 = vsel %vm6757_vm4, %v1829_v3, 0.0  ;;  %vm6758_vm10 = vmmov %vm6757_vm4  ;;  %v2292_v18 = vadd.f32 %v2291_v6, %v2290_v53  ;;  %vm6404_vm3 = vcmp.ne.s32.totalorder %v5663_v8, 4294967295  ;;  %v1831_v28 = vsub.f32 %v4855_v0, %v5457_v48  ;;  %v5668_v9 = vpop.xlane.xlu1 %1688  ;;  %v6762_v53 = vld [vmem:[#allocation118_spill] sm:$0xff] }
 0x3af   :  { %v2085_v52 = vsel %vm6758_vm10, %v2021_v61, 0.0  ;;  %v2023_v58 = vmul.f32 %v1959_v35, %v1959_v35  ;;  %v2658_v3 = vadd.f32 %v2657_v29, %v2656_v39  ;;  %v2766_v49 = vsel %vm6404_vm3, 1.0, %v6578_v57 }
 0x3b0   :  { %vm6407_vm7 = vcmp.ne.s32.totalorder %v5676_v13, 4294967295  ;;  %v2158_v38 = vadd.f32 %v2157_v30, %v2156_v20  ;;  %v2294_v56 = vadd.f32 %v2293_v34, %v2292_v18  ;;  %v2159_v61 = vsel %vm2139_vm12, %v1893_v33, 0.0 }
 0x3b1   :  { %v2295_v0 = vsel %vm2139_vm12, %v2085_v52, 0.0  ;;  %v1961_v48 = vsub.f32 1.0, %v5513_v62  ;;  %vm6760_vm4 = vcmp.ne.s32.totalorder %v6759_v51, 4294967295  ;;  %v1832_v14 = vsub.f32 %v4864_v40, %v5488_v50 }
 0x3b2   :  { %v1894_v25 = vsel %vm6760_vm4, %v1830_v36, 0.0  ;;  %vm6761_vm10 = vmmov %vm6760_vm4  ;;  %v2024_v12 = vmul.f32 %v1960_v21, %v1960_v21  ;;  %vm6763_vm3 = vcmp.ne.s32.totalorder %v6762_v53, 4294967295  ;;  %v1833_v29 = vsub.f32 %v4900_v5, %v5513_v62  ;;  %v5695_v30 = vpop.xlane.xlu1 %1691  ;;  %v6765_v21 = vld [vmem:[#allocation135_spill] sm:$0xff] }
 0x3b3   :  { %v2086_v35 = vsel %vm6761_vm10, %v2022_v55, 0.0  ;;  %v1895_v6 = vsel %vm6763_vm3, %v1831_v28, 0.0  ;;  %vm6764_vm1 = vmmov %vm6763_vm3  ;;  %v1962_v20 = vsub.f32 1.0, %v5538_v19  ;;  %v2659_v34 = vsel %vm2139_vm12, %v2766_v49, 0.0 }
 0x3b4   :  { %v2087_v39 = vsel %vm6764_vm1, %v2023_v58, 0.0  ;;  %v2767_v40 = vsel %vm6407_vm7, 1.0, %v6578_v57  ;;  %v2160_v50 = vadd.f32 %v2159_v61, %v2158_v38  ;;  %v2296_v54 = vadd.f32 %v2295_v0, %v2294_v56  ;;  %v6768_v58 = vld [vmem:[#allocation119_spill] sm:$0xff] }
 0x3b5   :  { %v2161_v33 = vsel %vm2139_vm12, %v1894_v25, 0.0  ;;  %v2297_v52 = vsel %vm2139_vm12, %v2086_v35, 0.0  ;;  %v2025_v36 = vmul.f32 %v1961_v48, %v1961_v48  ;;  %v1963_v55 = vsub.f32 1.0, %v5571_v22 }
 0x3b6   :  { %v2163_v5 = vsel %vm2139_vm12, %v1895_v6, 0.0  ;;  %v2299_v62 = vsel %vm2139_vm12, %v2087_v39, 0.0  ;;  %vm6766_vm1 = vcmp.ne.s32.totalorder %v6765_v21, 4294967295  ;;  %vm6769_vm4 = vcmp.ne.s32.totalorder %v6768_v58, 4294967295  ;;  %v5715_v0 = vpop.xlane.xlu1 %1694  ;;  %v6776_v58 = vld [vmem:[#allocation136_spill] sm:$0xff] }
 0x3b7   :  { %v1896_v18 = vsel %vm6766_vm1, %v1832_v14, 0.0  ;;  %vm6767_vm3 = vmmov %vm6766_vm1  ;;  %v1897_v49 = vsel %vm6769_vm4, %v1833_v29, 0.0  ;;  %v1834_v38 = vsub.f32 %v4903_v43, %v5538_v19  ;;  %v2026_v56 = vmul.f32 %v1962_v20, %v1962_v20 }
 0x3b8   :  { %v2088_v28 = vsel %vm6767_vm3, %v2024_v12, 0.0  ;;  %v1964_v61 = vsub.f32 1.0, %v5596_v23  ;;  %v5717_v48 = vadd.f32 %v2659_v34, %v2658_v3  ;;  %v2162_v51 = vadd.f32 %v2161_v33, %v2160_v50  ;;  %vm6770_vm10 = vmmov %vm6769_vm4 }
 0x3b9   :  { %v2298_v25 = vadd.f32 %v2297_v52, %v2296_v54  ;;  %v1835_v35 = vsub.f32 %v4908_v24, %v5571_v22  ;;  %v2661_v14 = vsel %vm2139_vm12, %v2767_v40, 0.0  ;;  %v2165_v12 = vsel %vm2139_vm12, %v1896_v18, 0.0  ;;  %v6773_v54 = vld [vmem:[#allocation120_spill] sm:$0xff] }
 0x3ba   :  { %v2089_v53 = vsel %vm6770_vm10, %v2025_v36, 0.0  ;;  %v2027_v43 = vmul.f32 %v1963_v55, %v1963_v55  ;;  %v2164_v19 = vadd.f32 %v2163_v5, %v2162_v51  ;;  %v2301_v39 = vsel %vm2139_vm12, %v2088_v28, 0.0  ;;  %v5733_v34 = vpop.xlane.xlu1 %1697  ;;  %v5742_v36 = vld [vmem:[%s6173_s1 + $0x1f0] sm:$0xff] }
 0x3bb   :  { %v2300_v6 = vadd.f32 %v2299_v62, %v2298_v25  ;;  %v2167_v3 = vsel %vm2139_vm12, %v1897_v49, 0.0  ;;  %vm6771_vm1 = vcmp.ne.s32.totalorder %v4259_v63, 4294967295  ;;  %v1836_v22 = vsub.f32 %v4919_v17, %v5596_v23 }
 0x3bc   :  { %v1898_v29 = vsel %vm6771_vm1, %v1834_v38, 0.0  ;;  %vm6772_vm3 = vmmov %vm6771_vm1  ;;  %v2028_v20 = vmul.f32 %v1964_v61, %v1964_v61  ;;  %v2166_v40 = vadd.f32 %v2165_v12, %v2164_v19  ;;  %v2303_v50 = vsel %vm2139_vm12, %v2089_v53, 0.0 }
 0x3bd   :  { %v2090_v24 = vsel %vm6772_vm3, %v2026_v56, 0.0  ;;  %vm6774_vm4 = vcmp.ne.s32.totalorder %v6773_v54, 4294967295  ;;  %v1965_v52 = vsub.f32 1.0, %v5622_v42  ;;  %vm6406_vm10 = vcmp.ne.s32.totalorder %v5742_v36, 4294967295 }
 0x3be   :  { %v1899_v33 = vsel %vm6774_vm4, %v1835_v35, 0.0  ;;  %v2302_v63 = vadd.f32 %v2301_v39, %v2300_v6  ;;  %vm6775_vm1 = vmmov %vm6774_vm4  ;;  %v1837_v23 = vsub.f32 %v4926_v10, %v5622_v42  ;;  %v2168_v55 = vadd.f32 %v2167_v3, %v2166_v40  ;;  %v5757_v56 = vpop.xlane.xlu1 %1700 }
 0x3bf   :  { %v2091_v17 = vsel %vm6775_vm1, %v2027_v43, 0.0  ;;  %v2169_v5 = vsel %vm2139_vm12, %v1898_v29, 0.0  ;;  %v2305_v62 = vsel %vm2139_vm12, %v2090_v24, 0.0  ;;  %v1966_v21 = vsub.f32 1.0, %v5641_v26 }
 0x3c0   :  { %v2304_v18 = vadd.f32 %v2303_v50, %v2302_v63  ;;  %v2171_v28 = vsel %vm2139_vm12, %v1899_v33, 0.0  ;;  %vm6777_vm3 = vcmp.ne.s32.totalorder %v6776_v58, 4294967295  ;;  %v2307_v10 = vsel %vm2139_vm12, %v2091_v17, 0.0 }
 0x3c1   :  { %v1900_v49 = vsel %vm6777_vm3, %v1836_v22, 0.0  ;;  %vm6778_vm4 = vmmov %vm6777_vm3  ;;  %v2029_v42 = vmul.f32 %v1965_v52, %v1965_v52  ;;  %v1838_v61 = vsub.f32 %v4934_v2, %v5641_v26  ;;  %v1967_v51 = vsub.f32 1.0, %v5668_v9  ;;  %v1719_v2 = vpop.xlane.xlu0 %1718  ;;  %v5775_v26 = vld [vmem:[%s6173_s1 + $0x1f8] sm:$0xff] }
 0x3c2   :  { %v2092_v38 = vsel %vm6778_vm4, %v2028_v20, 0.0  ;;  %v2768_v25 = vsel %vm6406_vm10, 1.0, %v6578_v57  ;;  %v2170_v35 = vadd.f32 %v2169_v5, %v2168_v55  ;;  %v2306_v12 = vadd.f32 %v2305_v62, %v2304_v18  ;;  %v5779_v22 = vpop.xlane.xlu1 %1703 }
 0x3c3   :  { %vm6779_vm1 = vcmp.ne.s32.totalorder %v4152_v41, 4294967295  ;;  %v2173_v43 = vsel %vm2139_vm12, %v1900_v49, 0.0  ;;  %v2309_v19 = vsel %vm2139_vm12, %v2092_v38, 0.0  ;;  %v2030_v6 = vmul.f32 %v1966_v21, %v1966_v21 }
 0x3c4   :  { %v1901_v53 = vsel %vm6779_vm1, %v1837_v23, 0.0  ;;  %v1839_v39 = vsub.f32 %v4945_v60, %v5668_v9  ;;  %vm407_vm3 = vcmp.ne.s32.totalorder %v5775_v26, 4294967295  ;;  %v2172_v3 = vadd.f32 %v2171_v28, %v2170_v35  ;;  %vm6780_vm4 = vmmov %vm6779_vm1  ;;  %v6781_v60 = vld [vmem:[#allocation137_spill] sm:$0xff]  ;;  %v6787_v35 = vld [vmem:[#allocation138_spill] sm:$0xff] }
 0x3c5   :  { %v2308_v29 = vadd.f32 %v2307_v10, %v2306_v12  ;;  %v1968_v24 = vsub.f32 1.0, %v5695_v30  ;;  %v2093_v20 = vsel %vm6780_vm4, %v2029_v42, 0.0  ;;  %v2175_v40 = vsel %vm2139_vm12, %v1901_v53, 0.0  ;;  %v6784_v23 = vld [vmem:[#allocation121_spill] sm:$0xff] }
 0x3c6   :  { %vm6782_vm1 = vcmp.ne.s32.totalorder %v6781_v60, 4294967295  ;;  %v2031_v50 = vmul.f32 %v1967_v51, %v1967_v51  ;;  %v2174_v54 = vadd.f32 %v2173_v43, %v2172_v3  ;;  %v1977_v52 = vsub.f32 1.0, %v1719_v2  ;;  %v5798_v58 = vpop.xlane.xlu1 %1706 }
 0x3c7   :  { %v1902_v9 = vsel %vm6782_vm1, %v1838_v61, 0.0  ;;  %v2310_v33 = vadd.f32 %v2309_v19, %v2308_v29  ;;  %v1969_v63 = vsub.f32 1.0, %v5715_v0  ;;  %vm6783_vm10 = vmmov %vm6782_vm1  ;;  %vm6785_vm7 = vcmp.ne.s32.totalorder %v6784_v23, 4294967295 }
 0x3c8   :  { %v2094_v17 = vsel %vm6783_vm10, %v2030_v6, 0.0  ;;  %v1903_v55 = vsel %vm6785_vm7, %v1839_v39, 0.0  ;;  %v1840_v41 = vsub.f32 %v4961_v27, %v5695_v30  ;;  %v5794_v5 = vadd.f32 %v2661_v14, %v5717_v48  ;;  %vm6786_vm4 = vmmov %vm6785_vm7 }
 0x3c9   :  { %v2176_v62 = vadd.f32 %v2175_v40, %v2174_v54  ;;  %v2311_v21 = vsel %vm2139_vm12, %v2093_v20, 0.0  ;;  %v2177_v18 = vsel %vm2139_vm12, %v1902_v9, 0.0  ;;  %v2032_v28 = vmul.f32 %v1968_v24, %v1968_v24  ;;  %v6792_v24 = vld [vmem:[#allocation122_spill] sm:$0xff]  ;;  %v6795_v54 = vld [vmem:[#allocation139_spill] sm:$0xff] }
 0x3ca   :  { %v2095_v49 = vsel %vm6786_vm4, %v2031_v50, 0.0  ;;  %v1849_v38 = vsub.f32 %v5049_v45, %v1719_v2  ;;  %v1841_v10 = vsub.f32 %v5005_v7, %v5715_v0  ;;  %v5808_v27 = vsel %vm407_vm3, 1.0, %v6578_v57  ;;  %v6789_v45 = vld [vmem:[#allocation16_spill] sm:$0xff]  ;;  %v1710_v19 = vpop.xlane.xlu1 %1709 }
 0x3cb   :  { %v2313_v30 = vsel %vm2139_vm12, %v2094_v17, 0.0  ;;  %v2179_v48 = vsel %vm2139_vm12, %v1903_v55, 0.0  ;;  %v2041_v14 = vmul.f32 %v1977_v52, %v1977_v52  ;;  %v2033_v42 = vmul.f32 %v1969_v63, %v1969_v63  ;;  %v6797_v52 = vld [vmem:[#allocation17_spill] sm:$0xff] }
 0x3cc   :  { %v2312_v61 = vadd.f32 %v2311_v21, %v2310_v33  ;;  %v2178_v51 = vadd.f32 %v2177_v18, %v2176_v62  ;;  %vm6788_vm7 = vcmp.ne.s32.totalorder %v6787_v35, 4294967295  ;;  %v1842_v53 = vsub.f32 %v6789_v45, %v5733_v34  ;;  %v6801_v35 = vld [vmem:[#allocation25_spill] sm:$0xff]  ;;  %v6802_v45 = vld [vmem:[#allocation68_spill] sm:$0xff] }
 0x3cd   :  { %v1904_v12 = vsel %vm6788_vm7, %v1840_v41, 0.0  ;;  %v2315_v7 = vsel %vm2139_vm12, %v2095_v49, 0.0  ;;  %vm6790_vm10 = vmmov %vm6788_vm7  ;;  %v1970_v43 = vsub.f32 1.0, %v5733_v34  ;;  %v5821_v6 = vsel %vm2139_vm12, %v2768_v25, 0.0  ;;  %v1746_v41 = vpop.xlane.xlu0 %1745 }
 0x3ce   :  { %v2096_v0 = vsel %vm6790_vm10, %v2032_v28, 0.0  ;;  %v2314_v39 = vadd.f32 %v2313_v30, %v2312_v61  ;;  %v2180_v2 = vadd.f32 %v2179_v48, %v2178_v51  ;;  %v1913_v29 = vsel %vm374_vm8, %v1849_v38, 0.0  ;;  %v1713_v21 = vpop.xlane.xlu1 %1712  ;;  %v6798_v38 = vld [vmem:[#allocation66_spill] sm:$0xff]  ;;  %v6799_v61 = vld [vmem:[#allocation123_spill] sm:$0xff] }
 0x3cf   :  { %vm6793_vm1 = vcmp.ne.s32.totalorder %v6792_v24, 4294967295  ;;  %v2181_v40 = vsel %vm2139_vm12, %v1904_v12, 0.0  ;;  %v2105_v60 = vsel %vm374_vm8, %v2041_v14, 0.0  ;;  %v1971_v9 = vsub.f32 1.0, %v5757_v56 }
 0x3d0   :  { %v1905_v20 = vsel %vm6793_vm1, %v1841_v10, 0.0  ;;  %vm6794_vm4 = vmmov %vm6793_vm1  ;;  %v2316_v25 = vadd.f32 %v2315_v7, %v2314_v39  ;;  %v2317_v50 = vsel %vm2139_vm12, %v2096_v0, 0.0  ;;  %vm6796_vm7 = vcmp.ne.s32.totalorder %v6795_v54, 4294967295 }
 0x3d1   :  { %v2097_v34 = vsel %vm6794_vm4, %v2033_v42, 0.0  ;;  %v1906_v33 = vsel %vm6796_vm7, %v1842_v53, 0.0  ;;  %v1843_v63 = vsub.f32 %v6797_v52, %v5757_v56  ;;  %v5839_v17 = vsel %vm2139_vm12, %v1913_v29, 0.0  ;;  %vm6803_vm10 = vmmov %vm6796_vm7  ;;  %v6804_v29 = vld [vmem:[#allocation140_spill] sm:$0xff] }
 0x3d2   :  { %v2183_v23 = vsel %vm2139_vm12, %v1905_v20, 0.0  ;;  %v2034_v55 = vmul.f32 %v1970_v43, %v1970_v43  ;;  %v1972_v62 = vsub.f32 1.0, %v5779_v22  ;;  %v2182_v18 = vadd.f32 %v2181_v40, %v2180_v2  ;;  %v1716_v39 = vpop.xlane.xlu1 %1715  ;;  %v6806_v20 = vld [vmem:[#allocation69_spill] sm:$0xff] }
 0x3d3   :  { %v5844_v28 = vsel %vm2139_vm12, %v2105_v60, 0.0  ;;  %v2319_v49 = vsel %vm2139_vm12, %v2097_v34, 0.0  ;;  %v1844_v10 = vsub.f32 %v6798_v38, %v5779_v22  ;;  %v2318_v56 = vadd.f32 %v2317_v50, %v2316_v25 }
 0x3d4   :  { %v2185_v30 = vsel %vm2139_vm12, %v1906_v33, 0.0  ;;  %v2035_v48 = vmul.f32 %v1971_v9, %v1971_v9  ;;  %v1973_v14 = vsub.f32 1.0, %v5798_v58  ;;  %v2184_v42 = vadd.f32 %v2183_v23, %v2182_v18  ;;  %v6809_v33 = vld [vmem:[#allocation124_spill] sm:$0xff] }
 0x3d5   :  { %vm6800_vm8 = vcmp.ne.s32.totalorder %v6799_v61, 4294967295  ;;  %v1858_v12 = vsub.f32 %v6801_v35, %v1746_v41  ;;  %v1845_v53 = vsub.f32 %v6802_v45, %v5798_v58  ;;  %v2320_v7 = vadd.f32 %v2319_v49, %v2318_v56  ;;  %v6813_v56 = vld [vmem:[#allocation141_spill] sm:$0xff] }
 0x3d6   :  { %v1907_v51 = vsel %vm6800_vm8, %v1843_v63, 0.0  ;;  %v2098_v0 = vsel %vm6803_vm10, %v2034_v55, 0.0  ;;  %v2036_v22 = vmul.f32 %v1972_v62, %v1972_v62  ;;  %v1974_v43 = vsub.f32 1.0, %v1710_v19  ;;  %vm6807_vm4 = vmmov %vm6800_vm8  ;;  %v6811_v63 = vld [vmem:[#allocation70_spill] sm:$0xff]  ;;  %v1722_v18 = vpop.xlane.xlu1 %1721 }
 0x3d7   :  { %v2186_v2 = vadd.f32 %v2185_v30, %v2184_v42  ;;  %v1986_v3 = vsub.f32 1.0, %v1746_v41  ;;  %vm6805_vm1 = vcmp.ne.s32.totalorder %v6804_v29, 4294967295  ;;  %v1846_v40 = vsub.f32 %v6806_v20, %v1710_v19 }
 0x3d8   :  { %v1908_v24 = vsel %vm6805_vm1, %v1844_v10, 0.0  ;;  %v2099_v60 = vsel %vm6807_vm4, %v2035_v48, 0.0  ;;  %v2187_v34 = vsel %vm2139_vm12, %v1907_v51, 0.0  ;;  %v2037_v58 = vmul.f32 %v1973_v14, %v1973_v14  ;;  %vm6812_vm8 = vmmov %vm6805_vm1  ;;  %v1752_v10 = vpop.xlane.xlu0 %1751  ;;  %v6815_v48 = vld [vmem:[#allocation18_spill] sm:$0xff] }
 0x3d9   :  { %v1975_v9 = vsub.f32 1.0, %v1713_v21  ;;  %v2321_v25 = vsel %vm2139_vm12, %v2098_v0, 0.0  ;;  %v1922_v54 = vsel %vm383_vm6, %v1858_v12, 0.0  ;;  %vm6810_vm7 = vcmp.ne.s32.totalorder %v6809_v33, 4294967295 }
 0x3da   :  { %v1909_v52 = vsel %vm6810_vm7, %v1845_v53, 0.0  ;;  %v1847_v23 = vsub.f32 %v6811_v63, %v1713_v21  ;;  %v2100_v19 = vsel %vm6812_vm8, %v2036_v22, 0.0  ;;  %v2189_v55 = vsel %vm2139_vm12, %v1908_v24, 0.0  ;;  %vm6816_vm1 = vmmov %vm6810_vm7  ;;  %v6817_v53 = vld [vmem:[#allocation125_spill] sm:$0xff] }
 0x3db   :  { %v2038_v41 = vmul.f32 %v1974_v43, %v1974_v43  ;;  %v1976_v62 = vsub.f32 1.0, %v1716_v39  ;;  %v2188_v49 = vadd.f32 %v2187_v34, %v2186_v2  ;;  %v2323_v38 = vsel %vm2139_vm12, %v2099_v60, 0.0  ;;  %v1725_v2 = vpop.xlane.xlu1 %1724  ;;  %v6822_v34 = vld [vmem:[#allocation79_spill] sm:$0xff] }
 0x3dc   :  { %vm6814_vm10 = vcmp.ne.s32.totalorder %v6813_v56, 4294967295  ;;  %v1848_v14 = vsub.f32 %v6815_v48, %v1716_v39  ;;  %v2322_v42 = vadd.f32 %v2321_v25, %v2320_v7  ;;  %v2101_v21 = vsel %vm6816_vm1, %v2037_v58, 0.0  ;;  %v1758_v63 = vpop.xlane.xlu0 %1757 }
 0x3dd   :  { %v1910_v30 = vsel %vm6814_vm10, %v1846_v40, 0.0  ;;  %v2191_v61 = vsel %vm2139_vm12, %v1909_v52, 0.0  ;;  %v2039_v51 = vmul.f32 %v1975_v9, %v1975_v9  ;;  %v2050_v35 = vmul.f32 %v1986_v3, %v1986_v3  ;;  %vm6819_vm7 = vmmov %vm6814_vm10  ;;  %v6820_v40 = vld [vmem:[#allocation142_spill] sm:$0xff] }
 0x3de   :  { %v2190_v12 = vadd.f32 %v2189_v55, %v2188_v49  ;;  %v2325_v45 = vsel %vm2139_vm12, %v2100_v19, 0.0  ;;  %vm6818_vm4 = vcmp.ne.s32.totalorder %v6817_v53, 4294967295  ;;  %v2324_v22 = vadd.f32 %v2323_v38, %v2322_v42  ;;  %v6828_v42 = vld [vmem:[#allocation28_spill] sm:$0xff] }
 0x3df   :  { %v1911_v0 = vsel %vm6818_vm4, %v1847_v23, 0.0  ;;  %v2102_v43 = vsel %vm6819_vm7, %v2038_v41, 0.0  ;;  %v2193_v39 = vsel %vm2139_vm12, %v1910_v30, 0.0  ;;  %v2040_v7 = vmul.f32 %v1976_v62, %v1976_v62  ;;  %vm6823_vm10 = vmmov %vm6818_vm4  ;;  %v1728_v38 = vpop.xlane.xlu1 %1727  ;;  %v6825_v30 = vld [vmem:[#allocation20_spill] sm:$0xff] }
 0x3e0   :  { %v1988_v29 = vsub.f32 1.0, %v1752_v10  ;;  %v2192_v24 = vadd.f32 %v2191_v61, %v2190_v12  ;;  %v2327_v20 = vsel %vm2139_vm12, %v2101_v21, 0.0  ;;  %vm6821_vm8 = vcmp.ne.s32.totalorder %v6820_v40, 4294967295  ;;  %v6829_v53 = vld [vmem:[#allocation72_spill] sm:$0xff] }
 0x3e1   :  { %v1912_v3 = vsel %vm6821_vm8, %v1848_v14, 0.0  ;;  %v2326_v60 = vadd.f32 %v2325_v45, %v2324_v22  ;;  %v1860_v58 = vsub.f32 %v6822_v34, %v1752_v10  ;;  %v2103_v9 = vsel %vm6823_vm10, %v2039_v51, 0.0  ;;  %vm6824_vm1 = vmmov %vm6821_vm8  ;;  %v6834_v34 = vld [vmem:[#allocation71_spill] sm:$0xff] }
 0x3e2   :  { %v2195_v25 = vsel %vm2139_vm12, %v1911_v0, 0.0  ;;  %v2114_v33 = vsel %vm383_vm6, %v2050_v35, 0.0  ;;  %v5896_v52 = vsel %vm2139_vm12, %v1922_v54, 0.0  ;;  %v2194_v23 = vadd.f32 %v2193_v39, %v2192_v24  ;;  %v6826_v54 = vld [vmem:[#allocation19_spill] sm:$0xff] }
 0x3e3   :  { %v2329_v19 = vsel %vm2139_vm12, %v2102_v43, 0.0  ;;  %v2328_v55 = vadd.f32 %v2327_v20, %v2326_v60  ;;  %v2104_v41 = vsel %vm6824_vm1, %v2040_v7, 0.0  ;;  %v2197_v62 = vsel %vm2139_vm12, %v1912_v3, 0.0  ;;  %v6831_v20 = vld [vmem:[#allocation143_spill] sm:$0xff]  ;;  %v6833_v3 = vld [vmem:[#allocation22_spill] sm:$0xff] }
 0x3e4   :  { %v1978_v49 = vsub.f32 1.0, %v1722_v18  ;;  %v2052_v10 = vmul.f32 %v1988_v29, %v1988_v29  ;;  %v2196_v56 = vadd.f32 %v2195_v25, %v2194_v23  ;;  %v2331_v50 = vsel %vm2139_vm12, %v2103_v9, 0.0  ;;  %v6836_v23 = vld [vmem:[#allocation127_spill] sm:$0xff] }
 0x3e5   :  { %v1850_v48 = vsub.f32 %v6825_v30, %v1722_v18  ;;  %vm6827_vm6 = vcmp.ne.s32.totalorder %v6826_v54, 4294967295  ;;  %v1862_v21 = vsub.f32 %v6828_v42, %v1758_v63  ;;  %v2330_v61 = vadd.f32 %v2329_v19, %v2328_v55  ;;  %v1731_v18 = vpop.xlane.xlu1 %1730  ;;  %v6838_v55 = vld [vmem:[#allocation73_spill] sm:$0xff]  ;;  %v1764_v30 = vpop.xlane.xlu0 %1763  ;;  %v6842_v54 = vld [vmem:[#allocation74_spill] sm:$0xff] }
 0x3e6   :  { %v1924_v14 = vsel %vm6827_vm6, %v1860_v58, 0.0  ;;  %v1979_v51 = vsub.f32 1.0, %v1725_v2  ;;  %v1990_v35 = vsub.f32 1.0, %v1758_v63  ;;  %v2198_v12 = vadd.f32 %v2197_v62, %v2196_v56  ;;  %vm6830_vm4 = vmmov %vm6827_vm6 }
 0x3e7   :  { %v2333_v45 = vsel %vm2139_vm12, %v2104_v41, 0.0  ;;  %v1851_v0 = vsub.f32 %v6829_v53, %v1725_v2  ;;  %v5910_v22 = vsel %vm2139_vm12, %v2114_v33, 0.0  ;;  %v2332_v43 = vadd.f32 %v2331_v50, %v2330_v61 }
 0x3e8   :  { %v2042_v39 = vmul.f32 %v1978_v49, %v1978_v49  ;;  %v1980_v7 = vsub.f32 1.0, %v1728_v38  ;;  %v2116_v29 = vsel %vm6830_vm4, %v2052_v10, 0.0  ;;  %v5915_v24 = vsel %vm2139_vm12, %v1924_v14, 0.0 }
 0x3e9   :  { %vm6832_vm7 = vcmp.ne.s32.totalorder %v6831_v20, 4294967295  ;;  %v1852_v60 = vsub.f32 %v6833_v3, %v1728_v38  ;;  %vm6835_vm8 = vcmp.ne.s32.totalorder %v6834_v34, 4294967295  ;;  %v2334_v58 = vadd.f32 %v2333_v45, %v2332_v43  ;;  %v1734_v56 = vpop.xlane.xlu1 %1733  ;;  %v6848_v3 = vld [vmem:[#allocation145_spill] sm:$0xff]  ;;  %v6850_v34 = vld [vmem:[#allocation75_spill] sm:$0xff] }
 0x3ea   :  { %v1914_v40 = vsel %vm6832_vm7, %v1850_v48, 0.0  ;;  %v1926_v2 = vsel %vm6835_vm8, %v1862_v21, 0.0  ;;  %v2043_v9 = vmul.f32 %v1979_v51, %v1979_v51  ;;  %v1981_v25 = vsub.f32 1.0, %v1731_v18  ;;  %vm6839_vm1 = vmmov %vm6832_vm7 }
 0x3eb   :  { %v2054_v33 = vmul.f32 %v1990_v35, %v1990_v35  ;;  %v2200_v63 = vadd.f32 %v5839_v17, %v2198_v12  ;;  %vm6837_vm10 = vcmp.ne.s32.totalorder %v6836_v23, 4294967295  ;;  %v1853_v41 = vsub.f32 %v6838_v55, %v1731_v18  ;;  %v6840_v17 = vld [vmem:[#allocation144_spill] sm:$0xff]  ;;  %vm6844_vm7 = vmmov %vm6835_vm8 }
 0x3ec   :  { %v1915_v19 = vsel %vm6837_vm10, %v1851_v0, 0.0  ;;  %v5927_v62 = vsel %vm2139_vm12, %v2116_v29, 0.0  ;;  %v2106_v49 = vsel %vm6839_vm1, %v2042_v39, 0.0  ;;  %v2201_v38 = vsel %vm2139_vm12, %v1914_v40, 0.0  ;;  %vm6843_vm4 = vmmov %vm6837_vm10  ;;  %v6845_v0 = vld [vmem:[#allocation128_spill] sm:$0xff] }
 0x3ed   :  { %v2044_v10 = vmul.f32 %v1980_v7, %v1980_v7  ;;  %v5933_v50 = vsel %vm2139_vm12, %v1926_v2, 0.0  ;;  %vm6841_vm6 = vcmp.ne.s32.totalorder %v6840_v17, 4294967295  ;;  %v1854_v14 = vsub.f32 %v6842_v54, %v1734_v56  ;;  %v1737_v29 = vpop.xlane.xlu1 %1736  ;;  %v1770_v17 = vpop.xlane.xlu0 %1769 }
 0x3ee   :  { %v1916_v48 = vsel %vm6841_vm6, %v1852_v60, 0.0  ;;  %v1982_v42 = vsub.f32 1.0, %v1734_v56  ;;  %v2336_v21 = vadd.f32 %v5844_v28, %v2334_v58  ;;  %v2107_v61 = vsel %vm6843_vm4, %v2043_v9, 0.0  ;;  %vm6847_vm10 = vmmov %vm6841_vm6 }
 0x3ef   :  { %v2203_v51 = vsel %vm2139_vm12, %v1915_v19, 0.0  ;;  %v2045_v35 = vmul.f32 %v1981_v25, %v1981_v25  ;;  %v2118_v12 = vsel %vm6844_vm7, %v2054_v33, 0.0  ;;  %v2202_v45 = vadd.f32 %v2201_v38, %v2200_v63  ;;  %v6852_v19 = vld [vmem:[#allocation146_spill] sm:$0xff] }
 0x3f0   :  { %v2337_v53 = vsel %vm2139_vm12, %v2106_v49, 0.0  ;;  %vm6846_vm8 = vcmp.ne.s32.totalorder %v6845_v0, 4294967295  ;;  %v1864_v39 = vsub.f32 %v5268_v32, %v1764_v30  ;;  %v2108_v28 = vsel %vm6847_vm10, %v2044_v10, 0.0 }
 0x3f1   :  { %v1917_v43 = vsel %vm6846_vm8, %v1853_v41, 0.0  ;;  %v2205_v7 = vsel %vm2139_vm12, %v1916_v48, 0.0  ;;  %v2046_v18 = vmul.f32 %v1982_v42, %v1982_v42  ;;  %v2204_v20 = vadd.f32 %v2203_v51, %v2202_v45  ;;  %vm6851_vm6 = vmmov %vm6846_vm8  ;;  %v1740_v56 = vpop.xlane.xlu1 %1739 }
 0x3f2   :  { %v2339_v40 = vsel %vm2139_vm12, %v2107_v61, 0.0  ;;  %vm6849_vm1 = vcmp.ne.s32.totalorder %v6848_v3, 4294967295  ;;  %v1855_v2 = vsub.f32 %v6850_v34, %v1737_v29  ;;  %v2338_v58 = vadd.f32 %v2337_v53, %v2336_v21  ;;  %v6856_v21 = vld [vmem:[#allocation24_spill] sm:$0xff] }
 0x3f3   :  { %v1918_v60 = vsel %vm6849_vm1, %v1854_v14, 0.0  ;;  %v2109_v9 = vsel %vm6851_vm6, %v2045_v35, 0.0  ;;  %v2207_v32 = vsel %vm2139_vm12, %v1917_v43, 0.0  ;;  %v1983_v25 = vsub.f32 1.0, %v1737_v29  ;;  %vm6854_vm7 = vmmov %vm6849_vm1  ;;  %v6855_v14 = vld [vmem:[#allocation77_spill] sm:$0xff]  ;;  %v6859_v43 = vld [vmem:[#allocation14_spill] sm:$0xff] }
 0x3f4   :  { %v1992_v33 = vsub.f32 1.0, %v1764_v30  ;;  %v2206_v63 = vadd.f32 %v2205_v7, %v2204_v20  ;;  %v2341_v23 = vsel %vm2139_vm12, %v2108_v28, 0.0  ;;  %vm6853_vm4 = vcmp.ne.s32.totalorder %v6852_v19, 4294967295  ;;  %v1776_v19 = vpop.xlane.xlu0 %1775 }
 0x3f5   :  { %v1919_v55 = vsel %vm6853_vm4, %v1855_v2, 0.0  ;;  %v2340_v41 = vadd.f32 %v2339_v40, %v2338_v58  ;;  %v2110_v49 = vsel %vm6854_vm7, %v2046_v18, 0.0  ;;  %v2209_v38 = vsel %vm2139_vm12, %v1918_v60, 0.0  ;;  %vm6858_vm10 = vmmov %vm6853_vm4  ;;  %v1743_v3 = vpop.xlane.xlu1 %1742  ;;  %v6862_v2 = vld [vmem:[#allocation23_spill] sm:$0xff] }
 0x3f6   :  { %v2047_v10 = vmul.f32 %v1983_v25, %v1983_v25  ;;  %v2208_v48 = vadd.f32 %v2207_v32, %v2206_v63  ;;  %v2343_v54 = vsel %vm2139_vm12, %v2109_v9, 0.0  ;;  %v1856_v30 = vsub.f32 %v6855_v14, %v1740_v56  ;;  %v6863_v32 = vld [vmem:[#allocation81_spill] sm:$0xff] }
 0x3f7   :  { %v1984_v42 = vsub.f32 1.0, %v1740_v56  ;;  %vm6857_vm8 = vcmp.ne.s32.totalorder %v6856_v21, 4294967295  ;;  %v2342_v51 = vadd.f32 %v2341_v23, %v2340_v41  ;;  %v2211_v45 = vsel %vm2139_vm12, %v1919_v55, 0.0 }
 0x3f8   :  { %v1928_v61 = vsel %vm6857_vm8, %v1864_v39, 0.0  ;;  %v2111_v35 = vsel %vm6858_vm10, %v2047_v10, 0.0  ;;  %v2210_v53 = vadd.f32 %v2209_v38, %v2208_v48  ;;  %v2345_v0 = vsel %vm2139_vm12, %v2110_v49, 0.0  ;;  %v6864_v49 = vld [vmem:[#allocation15_spill] sm:$0xff]  ;;  %vm6866_vm7 = vmmov %vm6857_vm8 }
 0x3f9   :  { %vm6860_vm1 = vcmp.ne.s32.totalorder %v6859_v43, 4294967295  ;;  %v2048_v7 = vmul.f32 %v1984_v42, %v1984_v42  ;;  %v2056_v18 = vmul.f32 %v1992_v33, %v1992_v33  ;;  %v1994_v29 = vsub.f32 1.0, %v1770_v17 }
 0x3fa   :  { %v1920_v28 = vsel %vm6860_vm1, %v1856_v30, 0.0  ;;  %v2344_v20 = vadd.f32 %v2343_v54, %v2342_v51  ;;  %v2212_v39 = vadd.f32 %v2211_v45, %v2210_v53  ;;  %v2347_v60 = vsel %vm2139_vm12, %v2111_v35, 0.0  ;;  %vm6861_vm6 = vmmov %vm6860_vm1  ;;  %v1749_v54 = vpop.xlane.xlu1 %1748  ;;  %v6867_v30 = vld [vmem:[#allocation78_spill] sm:$0xff]  ;;  %v6868_v51 = vld [vmem:[#allocation27_spill] sm:$0xff] }
 0x3fb   :  { %v2213_v40 = vsel %vm2139_vm12, %v1920_v28, 0.0  ;;  %v2112_v34 = vsel %vm6861_vm6, %v2048_v7, 0.0  ;;  %v1857_v58 = vsub.f32 %v6862_v2, %v1743_v3  ;;  %v5980_v9 = vsel %vm2139_vm12, %v2118_v12, 0.0  ;;  %v6870_v45 = vld [vmem:[#allocation84_spill] sm:$0xff]  ;;  %v6872_v7 = vld [vmem:[#allocation67_spill] sm:$0xff]  ;;  %v1782_v2 = vpop.xlane.xlu0 %1781 }
 0x3fc   :  { %v1866_v25 = vsub.f32 %v6863_v32, %v1770_v17  ;;  %v2346_v63 = vadd.f32 %v2345_v0, %v2344_v20  ;;  %v1985_v33 = vsub.f32 1.0, %v1743_v3  ;;  %v5984_v23 = vsel %vm2139_vm12, %v1928_v61, 0.0 }
 0x3fd   :  { %v2214_v55 = vadd.f32 %v2213_v40, %v2212_v39  ;;  %v2349_v41 = vsel %vm2139_vm12, %v2112_v34, 0.0  ;;  %vm6865_vm4 = vcmp.ne.s32.totalorder %v6864_v49, 4294967295  ;;  %v2058_v10 = vmul.f32 %v1994_v29, %v1994_v29 }
 0x3fe   :  { %v1921_v38 = vsel %vm6865_vm4, %v1857_v58, 0.0  ;;  %v2348_v56 = vadd.f32 %v2347_v60, %v2346_v63  ;;  %v2049_v48 = vmul.f32 %v1985_v33, %v1985_v33  ;;  %v2120_v17 = vsel %vm6866_vm7, %v2056_v18, 0.0  ;;  %vm6871_vm10 = vmmov %vm6865_vm4  ;;  %v1755_v60 = vpop.xlane.xlu1 %1754  ;;  %v6877_v33 = vld [vmem:[#allocation85_spill] sm:$0xff] }
 0x3ff   :  { %v2215_v12 = vsel %vm2139_vm12, %v1921_v38, 0.0  ;;  %v1859_v42 = vsub.f32 %v6867_v30, %v1749_v54  ;;  %v1987_v61 = vsub.f32 1.0, %v1749_v54  ;;  %vm6869_vm8 = vcmp.ne.s32.totalorder %v6868_v51, 4294967295  ;;  %v6881_v51 = vld [vmem:[#allocation80_spill] sm:$0xff] }
 0x400   :  { %v2216_v14 = vadd.f32 %v2215_v12, %v2214_v55  ;;  %v1930_v35 = vsel %vm6869_vm8, %v1866_v25, 0.0  ;;  %v1868_v53 = vsub.f32 %v6870_v45, %v1776_v19  ;;  %v2350_v0 = vadd.f32 %v2349_v41, %v2348_v56  ;;  %vm6874_vm6 = vmmov %vm6869_vm8  ;;  %v6876_v25 = vld [vmem:[#allocation29_spill] sm:$0xff] }
 0x401   :  { %v2113_v43 = vsel %vm6871_vm10, %v2049_v48, 0.0  ;;  %vm6873_vm1 = vcmp.ne.s32.totalorder %v6872_v7, 4294967295  ;;  %v2051_v21 = vmul.f32 %v1987_v61, %v1987_v61  ;;  %v2122_v20 = vsel %vm6874_vm6, %v2058_v10, 0.0  ;;  %v6879_v10 = vld [vmem:[#allocation21_spill] sm:$0xff] }
 0x402   :  { %v2351_v28 = vsel %vm2139_vm12, %v2113_v43, 0.0  ;;  %v1923_v29 = vsel %vm6873_vm1, %v1859_v42, 0.0  ;;  %v2218_v18 = vadd.f32 %v5896_v52, %v2216_v14  ;;  %v1996_v40 = vsub.f32 1.0, %v1776_v19  ;;  %vm6875_vm4 = vmmov %vm6873_vm1  ;;  %v1761_v30 = vpop.xlane.xlu1 %1760  ;;  %v1788_v42 = vpop.xlane.xlu0 %1787 }
 0x403   :  { %v2352_v3 = vadd.f32 %v2351_v28, %v2350_v0  ;;  %v2219_v39 = vsel %vm2139_vm12, %v1923_v29, 0.0  ;;  %v2365_v34 = vsel %vm2139_vm12, %v2120_v17, 0.0  ;;  %v2115_v58 = vsel %vm6875_vm4, %v2051_v21, 0.0  ;;  %v6884_v29 = vld [vmem:[#allocation76_spill] sm:$0xff] }
 0x404   :  { %v2220_v32 = vadd.f32 %v2219_v39, %v2218_v18  ;;  %v1861_v63 = vsub.f32 %v6876_v25, %v1755_v60  ;;  %vm6878_vm7 = vcmp.ne.s32.totalorder %v6877_v33, 4294967295  ;;  %v2355_v19 = vsel %vm2139_vm12, %v2115_v58, 0.0 }
 0x405   :  { %v1932_v52 = vsel %vm6878_vm7, %v1868_v53, 0.0  ;;  %v2354_v55 = vadd.f32 %v5910_v22, %v2352_v3  ;;  %v1989_v41 = vsub.f32 1.0, %v1755_v60  ;;  %v2233_v49 = vsel %vm2139_vm12, %v1930_v35, 0.0  ;;  %v6882_v53 = vld [vmem:[#allocation87_spill] sm:$0xff]  ;;  %vm6886_vm6 = vmmov %vm6878_vm7 }
 0x406   :  { %v6015_v38 = vsel %vm2139_vm12, %v2122_v20, 0.0  ;;  %vm6880_vm8 = vcmp.ne.s32.totalorder %v6879_v10, 4294967295  ;;  %v2222_v48 = vadd.f32 %v5915_v24, %v2220_v32  ;;  %v2060_v12 = vmul.f32 %v1996_v40, %v1996_v40  ;;  %v6888_v32 = vld [vmem:[#allocation30_spill] sm:$0xff] }
 0x407   :  { %v1925_v56 = vsel %vm6880_vm8, %v1861_v63, 0.0  ;;  %v2356_v54 = vadd.f32 %v2355_v19, %v2354_v55  ;;  %v2053_v17 = vmul.f32 %v1989_v41, %v1989_v41  ;;  %v6022_v22 = vsel %vm2139_vm12, %v1932_v52, 0.0  ;;  %vm6883_vm10 = vmmov %vm6880_vm8  ;;  %v6890_v41 = vld [vmem:[#allocation32_spill] sm:$0xff] }
 0x408   :  { %v2223_v14 = vsel %vm2139_vm12, %v1925_v56, 0.0  ;;  %v1863_v35 = vsub.f32 %v6881_v51, %v1761_v30  ;;  %v1991_v45 = vsub.f32 1.0, %v1761_v30  ;;  %v1870_v0 = vsub.f32 %v6882_v53, %v1782_v2  ;;  %v6891_v56 = vld [vmem:[#allocation26_spill] sm:$0xff] }
 0x409   :  { %v2224_v61 = vadd.f32 %v2223_v14, %v2222_v48  ;;  %v1998_v43 = vsub.f32 1.0, %v1782_v2  ;;  %v2117_v24 = vsel %vm6883_vm10, %v2053_v17, 0.0  ;;  %v2358_v28 = vadd.f32 %v5927_v62, %v2356_v54  ;;  %v1767_v2 = vpop.xlane.xlu1 %1766  ;;  %v6894_v53 = vld [vmem:[#allocation82_spill] sm:$0xff] }
 0x40a   :  { %v2359_v7 = vsel %vm2139_vm12, %v2117_v24, 0.0  ;;  %vm6885_vm1 = vcmp.ne.s32.totalorder %v6884_v29, 4294967295  ;;  %v2055_v18 = vmul.f32 %v1991_v45, %v1991_v45  ;;  %v2124_v40 = vsel %vm6886_vm6, %v2060_v12, 0.0 }
 0x40b   :  { %v1927_v21 = vsel %vm6885_vm1, %v1863_v35, 0.0  ;;  %v2226_v20 = vadd.f32 %v5933_v50, %v2224_v61  ;;  %v2000_v3 = vsub.f32 1.0, %v1788_v42  ;;  %v2360_v39 = vadd.f32 %v2359_v7, %v2358_v28  ;;  %vm6887_vm4 = vmmov %vm6885_vm1  ;;  %v1794_v35 = vpop.xlane.xlu0 %1793 }
 0x40c   :  { %v2227_v60 = vsel %vm2139_vm12, %v1927_v21, 0.0  ;;  %v2119_v58 = vsel %vm6887_vm4, %v2055_v18, 0.0  ;;  %v1865_v25 = vsub.f32 %v6888_v32, %v1767_v2  ;;  %v1993_v63 = vsub.f32 1.0, %v1767_v2  ;;  %v6896_v21 = vld [vmem:[#allocation83_spill] sm:$0xff] }
 0x40d   :  { %v2228_v62 = vadd.f32 %v2227_v60, %v2226_v20  ;;  %v1934_v55 = vsel %vm395_vm9, %v1870_v0, 0.0  ;;  %v2062_v19 = vmul.f32 %v1998_v43, %v1998_v43  ;;  %v2362_v50 = vadd.f32 %v5980_v9, %v2360_v39  ;;  %v1773_v51 = vpop.xlane.xlu1 %1772 }
 0x40e   :  { %v2363_v33 = vsel %vm2139_vm12, %v2119_v58, 0.0  ;;  %v1872_v10 = vsub.f32 %v6890_v41, %v1788_v42  ;;  %vm6892_vm7 = vcmp.ne.s32.totalorder %v6891_v56, 4294967295  ;;  %v2057_v12 = vmul.f32 %v1993_v63, %v1993_v63  ;;  %v6900_v63 = vld [vmem:[#allocation86_spill] sm:$0xff] }
 0x40f   :  { %v1929_v48 = vsel %vm6892_vm7, %v1865_v25, 0.0  ;;  %v2230_v54 = vadd.f32 %v5984_v23, %v2228_v62  ;;  %v2373_v17 = vsel %vm2139_vm12, %v2124_v40, 0.0  ;;  %v2064_v14 = vmul.f32 %v2000_v3, %v2000_v3  ;;  %vm6893_vm8 = vmmov %vm6892_vm7  ;;  %v6898_v62 = vld [vmem:[#allocation36_spill] sm:$0xff]  ;;  %v6901_v56 = vld [vmem:[#allocation34_spill] sm:$0xff] }
 0x410   :  { %v2364_v30 = vadd.f32 %v2363_v33, %v2362_v50  ;;  %v2231_v61 = vsel %vm2139_vm12, %v1929_v48, 0.0  ;;  %v2121_v9 = vsel %vm6893_vm8, %v2057_v12, 0.0  ;;  %v1867_v42 = vsub.f32 %v6894_v53, %v1773_v51 }
 0x411   :  { %v2232_v45 = vadd.f32 %v2231_v61, %v2230_v54  ;;  %v1995_v0 = vsub.f32 1.0, %v1773_v51  ;;  %v2126_v43 = vsel %vm395_vm9, %v2062_v19, 0.0  ;;  %v2241_v23 = vsel %vm2139_vm12, %v1934_v55, 0.0  ;;  %v1779_v58 = vpop.xlane.xlu1 %1778 }
 0x412   :  { %v2366_v24 = vadd.f32 %v2365_v34, %v2364_v30  ;;  %v2367_v28 = vsel %vm2139_vm12, %v2121_v9, 0.0  ;;  %v1936_v29 = vsel %vm397_vm11, %v1872_v10, 0.0  ;;  %vm6897_vm10 = vcmp.ne.s32.totalorder %v6896_v21, 4294967295  ;;  %v1800_v10 = vpop.xlane.xlu0 %1799  ;;  %v6903_v9 = vld [vmem:[#allocation31_spill] sm:$0xff] }
 0x413   :  { %v1931_v18 = vsel %vm6897_vm10, %v1867_v42, 0.0  ;;  %v2059_v20 = vmul.f32 %v1995_v0, %v1995_v0  ;;  %v2234_v40 = vadd.f32 %v2233_v49, %v2232_v45  ;;  %v2128_v3 = vsel %vm397_vm11, %v2064_v14, 0.0  ;;  %vm6899_vm9 = vmmov %vm6897_vm10 }
 0x414   :  { %v2002_v39 = vsub.f32 1.0, %v1794_v35  ;;  %v2368_v60 = vadd.f32 %v2367_v28, %v2366_v24  ;;  %v2235_v2 = vsel %vm2139_vm12, %v1931_v18, 0.0  ;;  %v1874_v34 = vsub.f32 %v6898_v62, %v1794_v35 }
 0x415   :  { %v2123_v32 = vsel %vm6899_vm9, %v2059_v20, 0.0  ;;  %v2236_v25 = vadd.f32 %v2235_v2, %v2234_v40  ;;  %v1869_v52 = vsub.f32 %v6900_v63, %v1779_v58  ;;  %v2377_v55 = vsel %vm2139_vm12, %v2126_v43, 0.0  ;;  %v1785_v51 = vpop.xlane.xlu1 %1784  ;;  %v6906_v2 = vld [vmem:[#allocation33_spill] sm:$0xff] }
 0x416   :  { %v2370_v49 = vadd.f32 %v6015_v38, %v2368_v60  ;;  %v2371_v19 = vsel %vm2139_vm12, %v2123_v32, 0.0  ;;  %v1997_v50 = vsub.f32 1.0, %v1779_v58  ;;  %v2245_v33 = vsel %vm2139_vm12, %v1936_v29, 0.0  ;;  %v1806_v40 = vpop.xlane.xlu0 %1805 }
 0x417   :  { %v2381_v41 = vsel %vm2139_vm12, %v2128_v3, 0.0  ;;  %vm6902_vm11 = vcmp.ne.s32.totalorder %v6901_v56, 4294967295  ;;  %v2238_v12 = vadd.f32 %v6022_v22, %v2236_v25  ;;  %v2066_v54 = vmul.f32 %v2002_v39, %v2002_v39 }
 0x418   :  { %v1933_v48 = vsel %vm6902_vm11, %v1869_v52, 0.0  ;;  %v2372_v14 = vadd.f32 %v2371_v19, %v2370_v49  ;;  %v2061_v30 = vmul.f32 %v1997_v50, %v1997_v50  ;;  %v1938_v38 = vsel %vm399_vm0, %v1874_v34, 0.0  ;;  %vm6904_vm1 = vmmov %vm6902_vm11 }
 0x419   :  { %v2239_v61 = vsel %vm2139_vm12, %v1933_v48, 0.0  ;;  %v1871_v45 = vsub.f32 %v6903_v9, %v1785_v51  ;;  %v1999_v53 = vsub.f32 1.0, %v1785_v51  ;;  %v1876_v42 = vsub.f32 %v5509_v15, %v1800_v10  ;;  %v1791_v39 = vpop.xlane.xlu1 %1790 }
 0x41a   :  { %v2240_v35 = vadd.f32 %v2239_v61, %v2238_v12  ;;  %v2004_v0 = vsub.f32 1.0, %v1800_v10  ;;  %v2125_v43 = vsel %vm6904_vm1, %v2061_v30, 0.0  ;;  %v2374_v22 = vadd.f32 %v2373_v17, %v2372_v14  ;;  %v6908_v30 = vld [vmem:[#allocation37_spill] sm:$0xff] }
 0x41b   :  { %v2375_v24 = vsel %vm2139_vm12, %v2125_v43, 0.0  ;;  %v1935_v7 = vsel %vm396_vm5, %v1871_v45, 0.0  ;;  %v2063_v29 = vmul.f32 %v1999_v53, %v1999_v53  ;;  %v2130_v18 = vsel %vm399_vm0, %v2066_v54, 0.0  ;;  %v1812_v54 = vpop.xlane.xlu0 %1811 }
 0x41c   :  { %v2242_v21 = vadd.f32 %v2241_v23, %v2240_v35  ;;  %v2249_v20 = vsel %vm2139_vm12, %v1938_v38, 0.0  ;;  %v2376_v3 = vadd.f32 %v2375_v24, %v2374_v22  ;;  %v2243_v15 = vsel %vm2139_vm12, %v1935_v7, 0.0 }
 0x41d   :  { %v2127_v17 = vsel %vm396_vm5, %v2063_v29, 0.0  ;;  %v1873_v58 = vsub.f32 %v6906_v2, %v1791_v39  ;;  %v2001_v62 = vsub.f32 1.0, %v1791_v39  ;;  %v1940_v23 = vsel %vm401_vm15, %v1876_v42, 0.0  ;;  %v1797_v12 = vpop.xlane.xlu1 %1796 }
 0x41e   :  { %v2244_v60 = vadd.f32 %v2243_v15, %v2242_v21  ;;  %v2068_v34 = vmul.f32 %v2004_v0, %v2004_v0  ;;  %v2378_v59 = vadd.f32 %v2377_v55, %v2376_v3  ;;  %v2379_v32 = vsel %vm2139_vm12, %v2127_v17, 0.0 }
 0x41f   :  { %v2006_v25 = vsub.f32 1.0, %v1806_v40  ;;  %v1937_v52 = vsel %vm398_vm13, %v1873_v58, 0.0  ;;  %v2065_v49 = vmul.f32 %v2001_v62, %v2001_v62  ;;  %v2385_v50 = vsel %vm2139_vm12, %v2130_v18, 0.0  ;;  %v1818_v15 = vpop.xlane.xlu0 %1817 }
 0x420   :  { %v2246_v19 = vadd.f32 %v2245_v33, %v2244_v60  ;;  %v1878_v10 = vsub.f32 %v5560_v11, %v1806_v40  ;;  %v2380_v56 = vadd.f32 %v2379_v32, %v2378_v59  ;;  %v2247_v48 = vsel %vm2139_vm12, %v1937_v52, 0.0 }
 0x421   :  { %v2129_v55 = vsel %vm398_vm13, %v2065_v49, 0.0  ;;  %v1875_v61 = vsub.f32 %v6908_v30, %v1797_v12  ;;  %v2003_v51 = vsub.f32 1.0, %v1797_v12  ;;  %v2132_v38 = vsel %vm401_vm15, %v2068_v34, 0.0  ;;  %v1803_v24 = vpop.xlane.xlu1 %1802  ;;  %v6911_v34 = vld [vmem:[#allocation89_spill] sm:$0xff] }
 0x422   :  { %v2248_v14 = vadd.f32 %v2247_v48, %v2246_v19  ;;  %v2253_v33 = vsel %vm2139_vm12, %v1940_v23, 0.0  ;;  %v2382_v35 = vadd.f32 %v2381_v41, %v2380_v56  ;;  %v2383_v11 = vsel %vm2139_vm12, %v2129_v55, 0.0 }
 0x423   :  { %v2070_v9 = vmul.f32 %v2006_v25, %v2006_v25  ;;  %v1939_v45 = vsel %vm400_vm14, %v1875_v61, 0.0  ;;  %v2067_v53 = vmul.f32 %v2003_v51, %v2003_v51  ;;  %v1942_v0 = vsel %vm403_vm2, %v1878_v10, 0.0 }
 0x424   :  { %v2250_v42 = vadd.f32 %v2249_v20, %v2248_v14  ;;  %v1880_v43 = vsub.f32 %v5625_v47, %v1812_v54  ;;  %v2384_v22 = vadd.f32 %v2383_v11, %v2382_v35  ;;  %v2251_v1 = vsel %vm2139_vm12, %v1939_v45, 0.0 }
 0x425   :  { %v2008_v28 = vsub.f32 1.0, %v1812_v54  ;;  %v2131_v41 = vsel %vm400_vm14, %v2067_v53, 0.0  ;;  %v1877_v29 = vsub.f32 %v5535_v46, %v1803_v24  ;;  %v2389_v21 = vsel %vm2139_vm12, %v2132_v38, 0.0  ;;  %v1809_v58 = vpop.xlane.xlu1 %1808 }
 0x426   :  { %v2252_v7 = vadd.f32 %v2251_v1, %v2250_v42  ;;  %v2386_v18 = vadd.f32 %v2385_v50, %v2384_v22  ;;  %v2387_v20 = vsel %vm2139_vm12, %v2131_v41, 0.0  ;;  %v2005_v40 = vsub.f32 1.0, %v1803_v24 }
 0x427   :  { %v2134_v47 = vsel %vm403_vm2, %v2070_v9, 0.0  ;;  %v2257_v3 = vsel %vm2139_vm12, %v1942_v0, 0.0  ;;  %vm6909_vm5 = vcmp.ne.s32.totalorder %v5593_v37, 4294967295  ;;  %vm6910_vm13 = vcmp.ne.s32.totalorder %v5676_v13, 4294967295 }
 0x428   :  { %v1941_v39 = vsel %vm6909_vm5, %v1877_v29, 0.0  ;;  %v2254_v31 = vadd.f32 %v2253_v33, %v2252_v7  ;;  %v1944_v17 = vsel %vm6910_vm13, %v1880_v43, 0.0  ;;  %v2388_v46 = vadd.f32 %v2387_v20, %v2386_v18  ;;  %vm6912_vm0 = vmmov %vm6909_vm5 }
 0x429   :  { %v2069_v60 = vmul.f32 %v2005_v40, %v2005_v40  ;;  %v2255_v2 = vsel %vm2139_vm12, %v1941_v39, 0.0  ;;  %v2072_v62 = vmul.f32 %v2008_v28, %v2008_v28  ;;  %v1879_v4 = vsub.f32 %v6911_v34, %v1809_v58  ;;  %vm6915_vm2 = vmmov %vm6910_vm13 }
 0x42a   :  { %v2256_v23 = vadd.f32 %v2255_v2, %v2254_v31  ;;  %v2007_v59 = vsub.f32 1.0, %v1809_v58  ;;  %v1882_v32 = vsub.f32 %v5644_v44, %v1818_v15  ;;  %v2010_v25 = vsub.f32 1.0, %v1818_v15  ;;  %v1815_v44 = vpop.xlane.xlu1 %1814 }
 0x42b   :  { %v2133_v63 = vsel %vm6912_vm0, %v2069_v60, 0.0  ;;  %v2390_v52 = vadd.f32 %v2389_v21, %v2388_v46  ;;  %vm6913_vm14 = vcmp.ne.s32.totalorder %v5663_v8, 4294967295  ;;  %v2393_v56 = vsel %vm2139_vm12, %v2134_v47, 0.0 }
 0x42c   :  { %v2391_v49 = vsel %vm2139_vm12, %v2133_v63, 0.0  ;;  %v1943_v19 = vsel %vm6913_vm14, %v1879_v4, 0.0  ;;  %v2071_v50 = vmul.f32 %v2007_v59, %v2007_v59  ;;  %v2258_v10 = vadd.f32 %v2257_v3, %v2256_v23  ;;  %vm6914_vm15 = vmmov %vm6913_vm14  ;;  %v6918_v4 = vld [vmem:[#allocation113_spill] sm:$0xff] }
 0x42d   :  { %v2261_v48 = vsel %vm2139_vm12, %v1944_v17, 0.0  ;;  %v2392_v12 = vadd.f32 %v2391_v49, %v2390_v52  ;;  %v2259_v54 = vsel %vm2139_vm12, %v1943_v19, 0.0  ;;  %v1881_v14 = vsub.f32 %v5647_v16, %v1815_v44 }
 0x42e   :  { %v2135_v37 = vsel %vm6914_vm15, %v2071_v50, 0.0  ;;  %v2260_v55 = vadd.f32 %v2259_v54, %v2258_v10  ;;  %v2009_v30 = vsub.f32 1.0, %v1815_v44  ;;  %v2136_v61 = vsel %vm6915_vm2, %v2072_v62, 0.0  ;;  %v2676_v50 = vld [vmem:[%s6174_s2] sm:$0x1] }
 0x42f   :  { %v2074_v51 = vmul.f32 %v2010_v25, %v2010_v25  ;;  %v2394_v38 = vadd.f32 %v2393_v56, %v2392_v12  ;;  %v2395_v33 = vsel %vm2139_vm12, %v2135_v37, 0.0  ;;  %v1946_v35 = vsel %vm407_vm3, %v1882_v32, 0.0 }
 0x430   :  { %vm6916_vm6 = vcmp.ne.s32.totalorder %v5742_v36, 4294967295  ;;  %v2073_v9 = vmul.f32 %v2009_v30, %v2009_v30  ;;  %v2262_v8 = vadd.f32 %v2261_v48, %v2260_v55  ;;  %v2664_v16 = vadd.f32 %v5821_v6, %v5794_v5 }
 0x431   :  { %v1945_v11 = vsel %vm6916_vm6, %v1881_v14, 0.0  ;;  %v2396_v45 = vadd.f32 %v2395_v33, %v2394_v38  ;;  %v2397_v13 = vsel %vm2139_vm12, %v2136_v61, 0.0  ;;  %vm6917_vm4 = vmmov %vm6916_vm6  ;;  %v2665_v43 = vsel %vm2139_vm12, %v5808_v27, 0.0 }
 0x432   :  { %v2263_v53 = vsel %vm2139_vm12, %v1945_v11, 0.0  ;;  %v2137_v42 = vsel %vm6917_vm4, %v2073_v9, 0.0  ;;  %v2138_v22 = vsel %vm407_vm3, %v2074_v51, 0.0  ;;  %v2265_v1 = vsel %vm2139_vm12, %v1946_v35, 0.0 }
 0x433   :  { %v2264_v0 = vadd.f32 %v2263_v53, %v2262_v8  ;;  %v2399_v24 = vsel %vm2139_vm12, %v2137_v42, 0.0  ;;  %v2398_v28 = vadd.f32 %v2397_v13, %v2396_v45  ;;  %v2401_v5 = vsel %vm2139_vm12, %v2138_v22, 0.0 }
 0x434   :  { %v2666_v6 = vadd.f32 %v2665_v43, %v2664_v16  ;;  %vm2677_vm12 = vcmp.eq.s32.totalorder %v6918_v4, 0  ;;  %vm2680_vm3 = vcmp.eq.s32.totalorder %v6918_v4, 1  ;;  %vm2684_vm7 = vcmp.eq.s32.totalorder %v6918_v4, 2 }
 0x435   :  { %v2266_v41 = vadd.f32 %v2265_v1, %v2264_v0  ;;  %v2400_v7 = vadd.f32 %v2399_v24, %v2398_v28 }
 0x437   :  { %2267 = vadd.xlane.f32.xlu1 %v2266_v41  ;;  %v2402_v36 = vadd.f32 %v2401_v5, %v2400_v7 }
 0x439   :  { %2403 = vadd.xlane.f32.xlu0 %v2402_v36 }
 0x43b   :  { %2667 = vadd.xlane.f32.xlu1 %v2666_v6 }
 0x4c4   :  { %v2268_v26 = vpop.xlane.xlu1 %2267 }
 0x4c5   :  { %v2269_v27 = vrot.slane %v2268_v26, 4 }
 0x4c6   :  { %v2404_v21 = vpop.xlane.xlu0 %2403 }
 0x4c7   :  { %v2270_v29 = vadd.f32 %v2269_v27, %v2268_v26  ;;  %v2405_v18 = vrot.slane %v2404_v21, 4 }
 0x4c8   :  { %v2668_v20 = vpop.xlane.xlu1 %2667 }
 0x4c9   :  { %v2271_v40 = vrot.slane %v2270_v29, 2  ;;  %v2669_v47 = vrot.slane %v2668_v20, 4  ;;  %v2406_v3 = vadd.f32 %v2405_v18, %v2404_v21 }
 0x4cb   :  { %v2670_v15 = vadd.f32 %v2669_v47, %v2668_v20  ;;  %v2272_v39 = vadd.f32 %v2271_v40, %v2270_v29  ;;  %v2407_v31 = vrot.slane %v2406_v3, 2 }
 0x4cd   :  { %v2671_v17 = vrot.slane %v2670_v15, 2  ;;  %v2273_v46 = vrot.slane %v2272_v39, 1  ;;  %v2408_v60 = vadd.f32 %v2407_v31, %v2406_v3 }
 0x4cf   :  { %v2672_v2 = vadd.f32 %v2671_v17, %v2670_v15  ;;  %v2274_v58 = vadd.f32 %v2273_v46, %v2272_v39  ;;  %v2409_v62 = vrot.slane %v2408_v60, 1 }
 0x4d1   :  { %2770 = vpush %v2274_v58  ;;  %v2673_v57 = vrot.slane %v2672_v2, 1  ;;  %v2410_v23 = vadd.f32 %v2409_v62, %v2408_v60 }
 0x4d3   :  { %v2674_v34 = vadd.f32 %v2673_v57, %v2672_v2  ;;  %2772 = vpush %v2410_v23 }
 0x4d5   :  { %2774 = vpush %v2674_v34 }
 0x502   :  { %s2771_s25 = spop %2770 }
 0x503   :  { %v2678_v59 = vstv %s2771_s25 }
 0x504   :  { %s2773_s26 = spop %2772  ;;  %v2679_v25 = vsel %vm2677_vm12, %v2678_v59, 0.0 }
 0x505   :  { %v2681_v32 = vstv %s2773_s26 }
 0x506   :  { %s2775_s27 = spop %2774  ;;  %v2682_v63 = vsel %vm2680_vm3, %v2681_v32, 0.0 }
 0x507   :  { %v2685_v52 = vstv %s2775_s27  ;;  %v2683_v49 = vadd.f32 %v2682_v63, %v2679_v25 }
 0x508   :  { %v2686_v19 = vsel %vm2684_vm7, %v2685_v52, 0.0 }
 0x509   :  { %v2687_v10 = vadd.f32 %v2686_v19, %v2683_v49 }
 0x50b   :  { %v2688_v56 = vadd.f32 %v2687_v10, %v2676_v50 }
 0x50d   :  { %2689 = vst [vmem:[%s6174_s2] sm:$0x1] %v2688_v56 }

</bundles_post_ra>
